<compile_context>
chip_gen: v7x
topology: tpu7x:2x2x1
jax: 0.10.0
libtpu: 0.0.40
codegen_flags: <defaults>
</compile_context>

<pallas_src>
import jax
import jax.numpy as jnp
from jax.experimental import pallas as pl
from jax.experimental.pallas import tpu as pltpu


def make_resnet_kernel(num_blocks):
    """Kernel over one batch tile. Refs:
       x_ref:(in, TB) bf16, w_in:(H,in) bf16, b_in:(H,1) f32,
       per block: w1:(H,H) bf16, b1:(H,1) f32, w2:(H,H) bf16, b2:(H,1) f32,
       w_out:(out,H) bf16, b_out:(out,1) f32, o_ref:(out, TB) f32."""

    def kernel(x_ref, w_in_ref, b_in_ref, *rest):
        block_refs = rest[:4 * num_blocks]
        w_out_ref, b_out_ref, o_ref = rest[4 * num_blocks:]

        # Input layer: h = relu(W_in @ x^T + b_in)   -> (H, TILE_B), f32 accumulation.
        h = jnp.dot(w_in_ref[...], x_ref[...],
                    preferred_element_type=jnp.float32) + b_in_ref[...]
        h = jnp.maximum(h, 0.0)

        # Residual blocks: h = relu(W2 @ relu(W1 @ h + b1) + b2 + h)
        for blk in range(num_blocks):
            w1, b1, w2, b2 = block_refs[4 * blk:4 * blk + 4]
            residual = h
            t = jnp.dot(w1[...], h.astype(jnp.bfloat16),
                        preferred_element_type=jnp.float32) + b1[...]
            t = jnp.maximum(t, 0.0)
            t = jnp.dot(w2[...], t.astype(jnp.bfloat16),
                        preferred_element_type=jnp.float32) + b2[...]
            h = jnp.maximum(t + residual, 0.0)

        # Output layer (no activation).
        o_ref[...] = (jnp.dot(w_out_ref[...], h.astype(jnp.bfloat16),
                              preferred_element_type=jnp.float32)
                      + b_out_ref[...]).astype(o_ref.dtype)

    return kernel


def choose_tile_b(batch, target_tile=512):
    """Largest lane-dim batch tile (multiple of 128, <= target_tile) that still leaves
    >= 2 grid steps when batch > 128, so v7x's two TensorCores both get work."""
    padded = pl.cdiv(batch, 128) * 128
    if padded <= 128:
        return 128
    half = (padded // 2 // 128) * 128  # largest tile that keeps >= 2 steps
    return max(128, min(target_tile, half))


def resnet_forward(x, w_in, b_in, blocks, w_out, b_out, *, tile_b=None, target_tile=512):
    """x: (batch, in_features) f32. Weights in PyTorch-native (out, in) layout, biases (out,)."""
    batch, in_features = x.shape
    hidden = w_in.shape[0]
    out_features = w_out.shape[0]
    num_blocks = len(blocks)

    if tile_b is None:
        tile_b = choose_tile_b(batch, target_tile)

    # Batch on lanes: x^T (in_features, batch); bf16 MXU operands; pad batch tail.
    xt = x.T.astype(jnp.bfloat16)
    padded_b = pl.cdiv(batch, tile_b) * tile_b
    if padded_b != batch:
        xt = jnp.pad(xt, ((0, 0), (0, padded_b - batch)))

    def w_prep(w):  # keep (out, in); bf16 for the MXU
        return w.astype(jnp.bfloat16)

    def b_prep(b):  # (out, 1) f32 -> broadcasts along the lane (batch) dim
        return b.reshape(-1, 1).astype(jnp.float32)

    flat_params = [w_prep(w_in), b_prep(b_in)]
    for (w1, b1, w2, b2) in blocks:
        flat_params += [w_prep(w1), b_prep(b1), w_prep(w2), b_prep(b2)]
    flat_params += [w_prep(w_out), b_prep(b_out)]

    grid = (padded_b // tile_b,)

    # VMEM budget: single-buffered params + double-buffered x/out tiles + f32 activation
    # temporaries (spill headroom). Clamp to [32 MiB, 64 MiB] so it also fits v7x per-core.
    param_bytes = sum(int(p.size) * p.dtype.itemsize for p in flat_params)
    io_tile_bytes = 2 * (in_features * tile_b * 2 + out_features * tile_b * 4)
    act_bytes = 6 * hidden * tile_b * 4
    vmem_needed = param_bytes + io_tile_bytes + act_bytes
    vmem_limit = int(min(64 * 1024 * 1024, max(32 * 1024 * 1024, 2 * vmem_needed)))

    flops = 2 * padded_b * (in_features * hidden
                            + num_blocks * 2 * hidden * hidden
                            + hidden * out_features)
    bytes_accessed = (int(xt.size) * 2 + padded_b * out_features * 4 + param_bytes)

    def build_call(single_buffer_params):
        if single_buffer_params:
            # Constant index map across the grid -> a single resident buffer suffices.
            def full_block(arr):
                return pl.BlockSpec(arr.shape, lambda i: (0, 0),
                                    pipeline_mode=pl.Buffered(1))
        else:
            def full_block(arr):
                return pl.BlockSpec(arr.shape, lambda i: (0, 0))

        in_specs = [pl.BlockSpec((in_features, tile_b), lambda i: (0, i))]
        in_specs += [full_block(p) for p in flat_params]

        return pl.pallas_call(
            make_resnet_kernel(num_blocks),
            out_shape=jax.ShapeDtypeStruct((out_features, padded_b), jnp.float32),
            grid=grid,
            in_specs=in_specs,
            out_specs=pl.BlockSpec((out_features, tile_b), lambda i: (0, i)),
            compiler_params=pltpu.CompilerParams(
                dimension_semantics=("parallel",),
                vmem_limit_bytes=vmem_limit),
            cost_estimate=pl.CostEstimate(flops=flops, transcendentals=0,
                                          bytes_accessed=bytes_accessed),
        )

    try:
        out_t = build_call(True)(xt, *flat_params)
    except Exception:
        # Fallback: this jax build rejects pl.Buffered(1); use default double buffering.
        out_t = build_call(False)(xt, *flat_params)

    return out_t[:, :batch].T


def init_linear(key, in_features, out_features):
    """Deterministic init mimicking nn.Linear default (uniform +-1/sqrt(fan_in))."""
    kw, kb = jax.random.split(key)
    bound = 1.0 / jnp.sqrt(jnp.float32(in_features))
    w = jax.random.uniform(kw, (out_features, in_features), jnp.float32, -bound, bound)
    b = jax.random.uniform(kb, (out_features,), jnp.float32, -bound, bound)
    return w, b


def ref_forward(x, w_in, b_in, blocks, w_out, b_out):
    """Pure-JAX reference with the same bf16-operand / f32-accumulate numerics."""
    def lin(h, w, b):
        hb = h.astype(jnp.bfloat16).astype(jnp.float32)
        wb = w.astype(jnp.bfloat16).astype(jnp.float32)
        return hb @ wb.T + b.reshape(1, -1)

    h = jnp.maximum(lin(x, w_in, b_in), 0.0)
    for (w1, b1, w2, b2) in blocks:
        r = h
        t = jnp.maximum(lin(h, w1, b1), 0.0)
        t = lin(t, w2, b2)
        h = jnp.maximum(t + r, 0.0)
    return lin(h, w_out, b_out)


if __name__ == "__main__":
    key = jax.random.PRNGKey(0)
    keys = jax.random.split(key, 8)

    batch = 512          # -> tile_b=256, grid=(2,): exercises the bigger lane tile AND >=2 steps
    input_size = 16
    hidden_units = 128
    output_size = 8
    num_blocks = 2

    w_in, b_in = init_linear(keys[1], input_size, hidden_units)
    blocks = []
    for i in range(num_blocks):
        k1, k2 = jax.random.split(keys[2 + i])
        w1, b1 = init_linear(k1, hidden_units, hidden_units)
        w2, b2 = init_linear(k2, hidden_units, hidden_units)
        blocks.append((w1, b1, w2, b2))
    w_out, b_out = init_linear(keys[6], hidden_units, output_size)

    x = jax.random.normal(keys[0], (batch, input_size), jnp.float32)

    out = resnet_forward(x, w_in, b_in, blocks, w_out, b_out)
    jax.block_until_ready(out)

    ref = ref_forward(x, w_in, b_in, blocks, w_out, b_out)
    assert out.shape == ref.shape, f"shape mismatch {out.shape} vs {ref.shape}"
    assert jnp.allclose(out, ref, atol=2e-3, rtol=2e-3), "mismatch vs reference"

    print("KERNEL_OK")
</pallas_src>

<mosaic_0001>
module attributes {stable_mosaic.version = 11 : i64} {
  func.func @kernel(%arg0: i32, %arg1: memref<16x256xbf16, #tpu.memory_space<vmem>>, %arg2: memref<128x16xbf16, #tpu.memory_space<vmem>>, %arg3: memref<128x1xf32, #tpu.memory_space<vmem>>, %arg4: memref<128x128xbf16, #tpu.memory_space<vmem>>, %arg5: memref<128x1xf32, #tpu.memory_space<vmem>>, %arg6: memref<128x128xbf16, #tpu.memory_space<vmem>>, %arg7: memref<128x1xf32, #tpu.memory_space<vmem>>, %arg8: memref<128x128xbf16, #tpu.memory_space<vmem>>, %arg9: memref<128x1xf32, #tpu.memory_space<vmem>>, %arg10: memref<128x128xbf16, #tpu.memory_space<vmem>>, %arg11: memref<128x1xf32, #tpu.memory_space<vmem>>, %arg12: memref<8x128xbf16, #tpu.memory_space<vmem>>, %arg13: memref<8x1xf32, #tpu.memory_space<vmem>>, %arg14: memref<8x256xf32, #tpu.memory_space<vmem>>) attributes {dimension_semantics = [#tpu.dimension_semantics<parallel>], iteration_bounds = array<i64: 2>, scalar_prefetch = 0 : i64, scratch_operands = 0 : i64, tpu.core_type = #tpu.core_type<tc>, window_params = [{transform_indices = @transform_0, window_bounds = array<i64: 16, 256>}, {pipeline_mode = #tpu.pipeline_mode<synchronous>, transform_indices = @transform_1, window_bounds = array<i64: 128, 16>}, {pipeline_mode = #tpu.pipeline_mode<synchronous>, transform_indices = @transform_2, window_bounds = array<i64: 128, 1>}, {pipeline_mode = #tpu.pipeline_mode<synchronous>, transform_indices = @transform_3, window_bounds = array<i64: 128, 128>}, {pipeline_mode = #tpu.pipeline_mode<synchronous>, transform_indices = @transform_4, window_bounds = array<i64: 128, 1>}, {pipeline_mode = #tpu.pipeline_mode<synchronous>, transform_indices = @transform_5, window_bounds = array<i64: 128, 128>}, {pipeline_mode = #tpu.pipeline_mode<synchronous>, transform_indices = @transform_6, window_bounds = array<i64: 128, 1>}, {pipeline_mode = #tpu.pipeline_mode<synchronous>, transform_indices = @transform_7, window_bounds = array<i64: 128, 128>}, {pipeline_mode = #tpu.pipeline_mode<synchronous>, transform_indices = @transform_8, window_bounds = array<i64: 128, 1>}, {pipeline_mode = #tpu.pipeline_mode<synchronous>, transform_indices = @transform_9, window_bounds = array<i64: 128, 128>}, {pipeline_mode = #tpu.pipeline_mode<synchronous>, transform_indices = @transform_10, window_bounds = array<i64: 128, 1>}, {pipeline_mode = #tpu.pipeline_mode<synchronous>, transform_indices = @transform_11, window_bounds = array<i64: 8, 128>}, {pipeline_mode = #tpu.pipeline_mode<synchronous>, transform_indices = @transform_12, window_bounds = array<i64: 8, 1>}, {transform_indices = @transform_13, window_bounds = array<i64: 8, 256>}]} {
    %c0 = arith.constant 0 : index
    %c0_0 = arith.constant 0 : index
    %0 = vector.load %arg2[%c0, %c0_0] : memref<128x16xbf16, #tpu.memory_space<vmem>>, vector<128x16xbf16>
    %c0_1 = arith.constant 0 : index
    %c0_2 = arith.constant 0 : index
    %1 = vector.load %arg1[%c0_1, %c0_2] : memref<16x256xbf16, #tpu.memory_space<vmem>>, vector<16x256xbf16>
    %cst = arith.constant dense<0.000000e+00> : vector<128x256xf32>
    %2 = tpu.matmul %0, %1, %cst {dimension_numbers = #tpu.dot_dimension_numbers<[1], [0], [0], [1], [0, 0, 1, 1], [], []>} : vector<128x16xbf16>, vector<16x256xbf16>, vector<128x256xf32> -> vector<128x256xf32>
    %c0_3 = arith.constant 0 : index
    %c0_4 = arith.constant 0 : index
    %3 = vector.load %arg3[%c0_3, %c0_4] : memref<128x1xf32, #tpu.memory_space<vmem>>, vector<128x1xf32>
    %4 = vector.broadcast %3 : vector<128x1xf32> to vector<128x256xf32>
    %5 = arith.addf %2, %4 : vector<128x256xf32>
    %cst_5 = arith.constant 0.000000e+00 : f32
    %6 = vector.broadcast %cst_5 : f32 to vector<128x256xf32>
    %7 = arith.maximumf %5, %6 : vector<128x256xf32>
    %c0_6 = arith.constant 0 : index
    %c0_7 = arith.constant 0 : index
    %8 = vector.load %arg4[%c0_6, %c0_7] : memref<128x128xbf16, #tpu.memory_space<vmem>>, vector<128x128xbf16>
    %9 = arith.truncf %7 : vector<128x256xf32> to vector<128x256xbf16>
    %cst_8 = arith.constant dense<0.000000e+00> : vector<128x256xf32>
    %10 = tpu.matmul %8, %9, %cst_8 {dimension_numbers = #tpu.dot_dimension_numbers<[1], [0], [0], [1], [0, 0, 1, 1], [], []>} : vector<128x128xbf16>, vector<128x256xbf16>, vector<128x256xf32> -> vector<128x256xf32>
    %c0_9 = arith.constant 0 : index
    %c0_10 = arith.constant 0 : index
    %11 = vector.load %arg5[%c0_9, %c0_10] : memref<128x1xf32, #tpu.memory_space<vmem>>, vector<128x1xf32>
    %12 = vector.broadcast %11 : vector<128x1xf32> to vector<128x256xf32>
    %13 = arith.addf %10, %12 : vector<128x256xf32>
    %cst_11 = arith.constant 0.000000e+00 : f32
    %14 = vector.broadcast %cst_11 : f32 to vector<128x256xf32>
    %15 = arith.maximumf %13, %14 : vector<128x256xf32>
    %c0_12 = arith.constant 0 : index
    %c0_13 = arith.constant 0 : index
    %16 = vector.load %arg6[%c0_12, %c0_13] : memref<128x128xbf16, #tpu.memory_space<vmem>>, vector<128x128xbf16>
    %17 = arith.truncf %15 : vector<128x256xf32> to vector<128x256xbf16>
    %cst_14 = arith.constant dense<0.000000e+00> : vector<128x256xf32>
    %18 = tpu.matmul %16, %17, %cst_14 {dimension_numbers = #tpu.dot_dimension_numbers<[1], [0], [0], [1], [0, 0, 1, 1], [], []>} : vector<128x128xbf16>, vector<128x256xbf16>, vector<128x256xf32> -> vector<128x256xf32>
    %c0_15 = arith.constant 0 : index
    %c0_16 = arith.constant 0 : index
    %19 = vector.load %arg7[%c0_15, %c0_16] : memref<128x1xf32, #tpu.memory_space<vmem>>, vector<128x1xf32>
    %20 = vector.broadcast %19 : vector<128x1xf32> to vector<128x256xf32>
    %21 = arith.addf %18, %20 : vector<128x256xf32>
    %22 = arith.addf %21, %7 : vector<128x256xf32>
    %cst_17 = arith.constant 0.000000e+00 : f32
    %23 = vector.broadcast %cst_17 : f32 to vector<128x256xf32>
    %24 = arith.maximumf %22, %23 : vector<128x256xf32>
    %c0_18 = arith.constant 0 : index
    %c0_19 = arith.constant 0 : index
    %25 = vector.load %arg8[%c0_18, %c0_19] : memref<128x128xbf16, #tpu.memory_space<vmem>>, vector<128x128xbf16>
    %26 = arith.truncf %24 : vector<128x256xf32> to vector<128x256xbf16>
    %cst_20 = arith.constant dense<0.000000e+00> : vector<128x256xf32>
    %27 = tpu.matmul %25, %26, %cst_20 {dimension_numbers = #tpu.dot_dimension_numbers<[1], [0], [0], [1], [0, 0, 1, 1], [], []>} : vector<128x128xbf16>, vector<128x256xbf16>, vector<128x256xf32> -> vector<128x256xf32>
    %c0_21 = arith.constant 0 : index
    %c0_22 = arith.constant 0 : index
    %28 = vector.load %arg9[%c0_21, %c0_22] : memref<128x1xf32, #tpu.memory_space<vmem>>, vector<128x1xf32>
    %29 = vector.broadcast %28 : vector<128x1xf32> to vector<128x256xf32>
    %30 = arith.addf %27, %29 : vector<128x256xf32>
    %cst_23 = arith.constant 0.000000e+00 : f32
    %31 = vector.broadcast %cst_23 : f32 to vector<128x256xf32>
    %32 = arith.maximumf %30, %31 : vector<128x256xf32>
    %c0_24 = arith.constant 0 : index
    %c0_25 = arith.constant 0 : index
    %33 = vector.load %arg10[%c0_24, %c0_25] : memref<128x128xbf16, #tpu.memory_space<vmem>>, vector<128x128xbf16>
    %34 = arith.truncf %32 : vector<128x256xf32> to vector<128x256xbf16>
    %cst_26 = arith.constant dense<0.000000e+00> : vector<128x256xf32>
    %35 = tpu.matmul %33, %34, %cst_26 {dimension_numbers = #tpu.dot_dimension_numbers<[1], [0], [0], [1], [0, 0, 1, 1], [], []>} : vector<128x128xbf16>, vector<128x256xbf16>, vector<128x256xf32> -> vector<128x256xf32>
    %c0_27 = arith.constant 0 : index
    %c0_28 = arith.constant 0 : index
    %36 = vector.load %arg11[%c0_27, %c0_28] : memref<128x1xf32, #tpu.memory_space<vmem>>, vector<128x1xf32>
    %37 = vector.broadcast %36 : vector<128x1xf32> to vector<128x256xf32>
    %38 = arith.addf %35, %37 : vector<128x256xf32>
    %39 = arith.addf %38, %24 : vector<128x256xf32>
    %cst_29 = arith.constant 0.000000e+00 : f32
    %40 = vector.broadcast %cst_29 : f32 to vector<128x256xf32>
    %41 = arith.maximumf %39, %40 : vector<128x256xf32>
    %c0_30 = arith.constant 0 : index
    %c0_31 = arith.constant 0 : index
    %42 = vector.load %arg12[%c0_30, %c0_31] : memref<8x128xbf16, #tpu.memory_space<vmem>>, vector<8x128xbf16>
    %43 = arith.truncf %41 : vector<128x256xf32> to vector<128x256xbf16>
    %cst_32 = arith.constant dense<0.000000e+00> : vector<8x256xf32>
    %44 = tpu.matmul %42, %43, %cst_32 {dimension_numbers = #tpu.dot_dimension_numbers<[1], [0], [0], [1], [0, 0, 1, 1], [], []>} : vector<8x128xbf16>, vector<128x256xbf16>, vector<8x256xf32> -> vector<8x256xf32>
    %c0_33 = arith.constant 0 : index
    %c0_34 = arith.constant 0 : index
    %45 = vector.load %arg13[%c0_33, %c0_34] : memref<8x1xf32, #tpu.memory_space<vmem>>, vector<8x1xf32>
    %46 = vector.broadcast %45 : vector<8x1xf32> to vector<8x256xf32>
    %47 = arith.addf %44, %46 : vector<8x256xf32>
    %c0_35 = arith.constant 0 : index
    %c0_36 = arith.constant 0 : index
    %48 = vector.load %arg14[%c0_35, %c0_36] : memref<8x256xf32, #tpu.memory_space<vmem>>, vector<8x256xf32>
    tpu.vector_store %arg14[%c0_35, %c0_36], %47 {strides = array<i32>} : memref<8x256xf32, #tpu.memory_space<vmem>>, vector<8x256xf32>,
    return
  }
  func.func @transform_0(%arg0: i32) -> (i32, i32) {
    %c0_i32 = arith.constant 0 : i32
    %c0_i32_0 = arith.constant 0 : i32
    return %c0_i32, %arg0 : i32, i32
  }
  func.func @transform_1(%arg0: i32) -> (i32, i32) {
    %c0_i32 = arith.constant 0 : i32
    %c0_i32_0 = arith.constant 0 : i32
    %c0_i32_1 = arith.constant 0 : i32
    return %c0_i32, %c0_i32_0 : i32, i32
  }
  func.func @transform_2(%arg0: i32) -> (i32, i32) {
    %c0_i32 = arith.constant 0 : i32
    %c0_i32_0 = arith.constant 0 : i32
    %c0_i32_1 = arith.constant 0 : i32
    return %c0_i32, %c0_i32_0 : i32, i32
  }
  func.func @transform_3(%arg0: i32) -> (i32, i32) {
    %c0_i32 = arith.constant 0 : i32
    %c0_i32_0 = arith.constant 0 : i32
    %c0_i32_1 = arith.constant 0 : i32
    return %c0_i32, %c0_i32_0 : i32, i32
  }
  func.func @transform_4(%arg0: i32) -> (i32, i32) {
    %c0_i32 = arith.constant 0 : i32
    %c0_i32_0 = arith.constant 0 : i32
    %c0_i32_1 = arith.constant 0 : i32
    return %c0_i32, %c0_i32_0 : i32, i32
  }
  func.func @transform_5(%arg0: i32) -> (i32, i32) {
    %c0_i32 = arith.constant 0 : i32
    %c0_i32_0 = arith.constant 0 : i32
    %c0_i32_1 = arith.constant 0 : i32
    return %c0_i32, %c0_i32_0 : i32, i32
  }
  func.func @transform_6(%arg0: i32) -> (i32, i32) {
    %c0_i32 = arith.constant 0 : i32
    %c0_i32_0 = arith.constant 0 : i32
    %c0_i32_1 = arith.constant 0 : i32
    return %c0_i32, %c0_i32_0 : i32, i32
  }
  func.func @transform_7(%arg0: i32) -> (i32, i32) {
    %c0_i32 = arith.constant 0 : i32
    %c0_i32_0 = arith.constant 0 : i32
    %c0_i32_1 = arith.constant 0 : i32
    return %c0_i32, %c0_i32_0 : i32, i32
  }
  func.func @transform_8(%arg0: i32) -> (i32, i32) {
    %c0_i32 = arith.constant 0 : i32
    %c0_i32_0 = arith.constant 0 : i32
    %c0_i32_1 = arith.constant 0 : i32
    return %c0_i32, %c0_i32_0 : i32, i32
  }
  func.func @transform_9(%arg0: i32) -> (i32, i32) {
    %c0_i32 = arith.constant 0 : i32
    %c0_i32_0 = arith.constant 0 : i32
    %c0_i32_1 = arith.constant 0 : i32
    return %c0_i32, %c0_i32_0 : i32, i32
  }
  func.func @transform_10(%arg0: i32) -> (i32, i32) {
    %c0_i32 = arith.constant 0 : i32
    %c0_i32_0 = arith.constant 0 : i32
    %c0_i32_1 = arith.constant 0 : i32
    return %c0_i32, %c0_i32_0 : i32, i32
  }
  func.func @transform_11(%arg0: i32) -> (i32, i32) {
    %c0_i32 = arith.constant 0 : i32
    %c0_i32_0 = arith.constant 0 : i32
    %c0_i32_1 = arith.constant 0 : i32
    return %c0_i32, %c0_i32_0 : i32, i32
  }
  func.func @transform_12(%arg0: i32) -> (i32, i32) {
    %c0_i32 = arith.constant 0 : i32
    %c0_i32_0 = arith.constant 0 : i32
    %c0_i32_1 = arith.constant 0 : i32
    return %c0_i32, %c0_i32_0 : i32, i32
  }
  func.func @transform_13(%arg0: i32) -> (i32, i32) {
    %c0_i32 = arith.constant 0 : i32
    %c0_i32_0 = arith.constant 0 : i32
    return %c0_i32, %arg0 : i32, i32
  }
}

module attributes {stable_mosaic.version = 11 : i64} {
  func.func @kernel(%arg0: i32, %arg1: memref<16x256xbf16, #tpu.memory_space<vmem>>, %arg2: memref<128x16xbf16, #tpu.memory_space<vmem>>, %arg3: memref<128x1xf32, #tpu.memory_space<vmem>>, %arg4: memref<128x128xbf16, #tpu.memory_space<vmem>>, %arg5: memref<128x1xf32, #tpu.memory_space<vmem>>, %arg6: memref<128x128xbf16, #tpu.memory_space<vmem>>, %arg7: memref<128x1xf32, #tpu.memory_space<vmem>>, %arg8: memref<128x128xbf16, #tpu.memory_space<vmem>>, %arg9: memref<128x1xf32, #tpu.memory_space<vmem>>, %arg10: memref<128x128xbf16, #tpu.memory_space<vmem>>, %arg11: memref<128x1xf32, #tpu.memory_space<vmem>>, %arg12: memref<8x128xbf16, #tpu.memory_space<vmem>>, %arg13: memref<8x1xf32, #tpu.memory_space<vmem>>, %arg14: memref<8x256xf32, #tpu.memory_space<vmem>>) attributes {dimension_semantics = [#tpu.dimension_semantics<parallel>], iteration_bounds = array<i64: 2>, scalar_prefetch = 0 : i64, scratch_operands = 0 : i64, tpu.core_type = #tpu.core_type<tc>, window_params = [{transform_indices = @transform_0, window_bounds = array<i64: 16, 256>}, {pipeline_mode = #tpu.pipeline_mode<synchronous>, transform_indices = @transform_1, window_bounds = array<i64: 128, 16>}, {pipeline_mode = #tpu.pipeline_mode<synchronous>, transform_indices = @transform_2, window_bounds = array<i64: 128, 1>}, {pipeline_mode = #tpu.pipeline_mode<synchronous>, transform_indices = @transform_3, window_bounds = array<i64: 128, 128>}, {pipeline_mode = #tpu.pipeline_mode<synchronous>, transform_indices = @transform_4, window_bounds = array<i64: 128, 1>}, {pipeline_mode = #tpu.pipeline_mode<synchronous>, transform_indices = @transform_5, window_bounds = array<i64: 128, 128>}, {pipeline_mode = #tpu.pipeline_mode<synchronous>, transform_indices = @transform_6, window_bounds = array<i64: 128, 1>}, {pipeline_mode = #tpu.pipeline_mode<synchronous>, transform_indices = @transform_7, window_bounds = array<i64: 128, 128>}, {pipeline_mode = #tpu.pipeline_mode<synchronous>, transform_indices = @transform_8, window_bounds = array<i64: 128, 1>}, {pipeline_mode = #tpu.pipeline_mode<synchronous>, transform_indices = @transform_9, window_bounds = array<i64: 128, 128>}, {pipeline_mode = #tpu.pipeline_mode<synchronous>, transform_indices = @transform_10, window_bounds = array<i64: 128, 1>}, {pipeline_mode = #tpu.pipeline_mode<synchronous>, transform_indices = @transform_11, window_bounds = array<i64: 8, 128>}, {pipeline_mode = #tpu.pipeline_mode<synchronous>, transform_indices = @transform_12, window_bounds = array<i64: 8, 1>}, {transform_indices = @transform_13, window_bounds = array<i64: 8, 256>}]} {
    %c0 = arith.constant 0 : index
    %c0_0 = arith.constant 0 : index
    %0 = vector.load %arg2[%c0, %c0_0] : memref<128x16xbf16, #tpu.memory_space<vmem>>, vector<128x16xbf16>
    %c0_1 = arith.constant 0 : index
    %c0_2 = arith.constant 0 : index
    %1 = vector.load %arg1[%c0_1, %c0_2] : memref<16x256xbf16, #tpu.memory_space<vmem>>, vector<16x256xbf16>
    %cst = arith.constant dense<0.000000e+00> : vector<128x256xf32>
    %2 = tpu.matmul %0, %1, %cst {dimension_numbers = #tpu.dot_dimension_numbers<[1], [0], [0], [1], [0, 0, 1, 1], [], []>} : vector<128x16xbf16>, vector<16x256xbf16>, vector<128x256xf32> -> vector<128x256xf32>
    %c0_3 = arith.constant 0 : index
    %c0_4 = arith.constant 0 : index
    %3 = vector.load %arg3[%c0_3, %c0_4] : memref<128x1xf32, #tpu.memory_space<vmem>>, vector<128x1xf32>
    %4 = vector.broadcast %3 : vector<128x1xf32> to vector<128x256xf32>
    %5 = arith.addf %2, %4 : vector<128x256xf32>
    %cst_5 = arith.constant 0.000000e+00 : f32
    %6 = vector.broadcast %cst_5 : f32 to vector<128x256xf32>
    %7 = arith.maximumf %5, %6 : vector<128x256xf32>
    %c0_6 = arith.constant 0 : index
    %c0_7 = arith.constant 0 : index
    %8 = vector.load %arg4[%c0_6, %c0_7] : memref<128x128xbf16, #tpu.memory_space<vmem>>, vector<128x128xbf16>
    %9 = arith.truncf %7 : vector<128x256xf32> to vector<128x256xbf16>
    %cst_8 = arith.constant dense<0.000000e+00> : vector<128x256xf32>
    %10 = tpu.matmul %8, %9, %cst_8 {dimension_numbers = #tpu.dot_dimension_numbers<[1], [0], [0], [1], [0, 0, 1, 1], [], []>} : vector<128x128xbf16>, vector<128x256xbf16>, vector<128x256xf32> -> vector<128x256xf32>
    %c0_9 = arith.constant 0 : index
    %c0_10 = arith.constant 0 : index
    %11 = vector.load %arg5[%c0_9, %c0_10] : memref<128x1xf32, #tpu.memory_space<vmem>>, vector<128x1xf32>
    %12 = vector.broadcast %11 : vector<128x1xf32> to vector<128x256xf32>
    %13 = arith.addf %10, %12 : vector<128x256xf32>
    %cst_11 = arith.constant 0.000000e+00 : f32
    %14 = vector.broadcast %cst_11 : f32 to vector<128x256xf32>
    %15 = arith.maximumf %13, %14 : vector<128x256xf32>
    %c0_12 = arith.constant 0 : index
    %c0_13 = arith.constant 0 : index
    %16 = vector.load %arg6[%c0_12, %c0_13] : memref<128x128xbf16, #tpu.memory_space<vmem>>, vector<128x128xbf16>
    %17 = arith.truncf %15 : vector<128x256xf32> to vector<128x256xbf16>
    %cst_14 = arith.constant dense<0.000000e+00> : vector<128x256xf32>
    %18 = tpu.matmul %16, %17, %cst_14 {dimension_numbers = #tpu.dot_dimension_numbers<[1], [0], [0], [1], [0, 0, 1, 1], [], []>} : vector<128x128xbf16>, vector<128x256xbf16>, vector<128x256xf32> -> vector<128x256xf32>
    %c0_15 = arith.constant 0 : index
    %c0_16 = arith.constant 0 : index
    %19 = vector.load %arg7[%c0_15, %c0_16] : memref<128x1xf32, #tpu.memory_space<vmem>>, vector<128x1xf32>
    %20 = vector.broadcast %19 : vector<128x1xf32> to vector<128x256xf32>
    %21 = arith.addf %18, %20 : vector<128x256xf32>
    %22 = arith.addf %21, %7 : vector<128x256xf32>
    %cst_17 = arith.constant 0.000000e+00 : f32
    %23 = vector.broadcast %cst_17 : f32 to vector<128x256xf32>
    %24 = arith.maximumf %22, %23 : vector<128x256xf32>
    %c0_18 = arith.constant 0 : index
    %c0_19 = arith.constant 0 : index
    %25 = vector.load %arg8[%c0_18, %c0_19] : memref<128x128xbf16, #tpu.memory_space<vmem>>, vector<128x128xbf16>
    %26 = arith.truncf %24 : vector<128x256xf32> to vector<128x256xbf16>
    %cst_20 = arith.constant dense<0.000000e+00> : vector<128x256xf32>
    %27 = tpu.matmul %25, %26, %cst_20 {dimension_numbers = #tpu.dot_dimension_numbers<[1], [0], [0], [1], [0, 0, 1, 1], [], []>} : vector<128x128xbf16>, vector<128x256xbf16>, vector<128x256xf32> -> vector<128x256xf32>
    %c0_21 = arith.constant 0 : index
    %c0_22 = arith.constant 0 : index
    %28 = vector.load %arg9[%c0_21, %c0_22] : memref<128x1xf32, #tpu.memory_space<vmem>>, vector<128x1xf32>
    %29 = vector.broadcast %28 : vector<128x1xf32> to vector<128x256xf32>
    %30 = arith.addf %27, %29 : vector<128x256xf32>
    %cst_23 = arith.constant 0.000000e+00 : f32
    %31 = vector.broadcast %cst_23 : f32 to vector<128x256xf32>
    %32 = arith.maximumf %30, %31 : vector<128x256xf32>
    %c0_24 = arith.constant 0 : index
    %c0_25 = arith.constant 0 : index
    %33 = vector.load %arg10[%c0_24, %c0_25] : memref<128x128xbf16, #tpu.memory_space<vmem>>, vector<128x128xbf16>
    %34 = arith.truncf %32 : vector<128x256xf32> to vector<128x256xbf16>
    %cst_26 = arith.constant dense<0.000000e+00> : vector<128x256xf32>
    %35 = tpu.matmul %33, %34, %cst_26 {dimension_numbers = #tpu.dot_dimension_numbers<[1], [0], [0], [1], [0, 0, 1, 1], [], []>} : vector<128x128xbf16>, vector<128x256xbf16>, vector<128x256xf32> -> vector<128x256xf32>
    %c0_27 = arith.constant 0 : index
    %c0_28 = arith.constant 0 : index
    %36 = vector.load %arg11[%c0_27, %c0_28] : memref<128x1xf32, #tpu.memory_space<vmem>>, vector<128x1xf32>
    %37 = vector.broadcast %36 : vector<128x1xf32> to vector<128x256xf32>
    %38 = arith.addf %35, %37 : vector<128x256xf32>
    %39 = arith.addf %38, %24 : vector<128x256xf32>
    %cst_29 = arith.constant 0.000000e+00 : f32
    %40 = vector.broadcast %cst_29 : f32 to vector<128x256xf32>
    %41 = arith.maximumf %39, %40 : vector<128x256xf32>
    %c0_30 = arith.constant 0 : index
    %c0_31 = arith.constant 0 : index
    %42 = vector.load %arg12[%c0_30, %c0_31] : memref<8x128xbf16, #tpu.memory_space<vmem>>, vector<8x128xbf16>
    %43 = arith.truncf %41 : vector<128x256xf32> to vector<128x256xbf16>
    %cst_32 = arith.constant dense<0.000000e+00> : vector<8x256xf32>
    %44 = tpu.matmul %42, %43, %cst_32 {dimension_numbers = #tpu.dot_dimension_numbers<[1], [0], [0], [1], [0, 0, 1, 1], [], []>} : vector<8x128xbf16>, vector<128x256xbf16>, vector<8x256xf32> -> vector<8x256xf32>
    %c0_33 = arith.constant 0 : index
    %c0_34 = arith.constant 0 : index
    %45 = vector.load %arg13[%c0_33, %c0_34] : memref<8x1xf32, #tpu.memory_space<vmem>>, vector<8x1xf32>
    %46 = vector.broadcast %45 : vector<8x1xf32> to vector<8x256xf32>
    %47 = arith.addf %44, %46 : vector<8x256xf32>
    %c0_35 = arith.constant 0 : index
    %c0_36 = arith.constant 0 : index
    %48 = vector.load %arg14[%c0_35, %c0_36] : memref<8x256xf32, #tpu.memory_space<vmem>>, vector<8x256xf32>
    tpu.vector_store %arg14[%c0_35, %c0_36], %47 {strides = array<i32>} : memref<8x256xf32, #tpu.memory_space<vmem>>, vector<8x256xf32>,
    return
  }
  func.func @transform_0(%arg0: i32) -> (i32, i32) {
    %c0_i32 = arith.constant 0 : i32
    %c0_i32_0 = arith.constant 0 : i32
    return %c0_i32, %arg0 : i32, i32
  }
  func.func @transform_1(%arg0: i32) -> (i32, i32) {
    %c0_i32 = arith.constant 0 : i32
    %c0_i32_0 = arith.constant 0 : i32
    %c0_i32_1 = arith.constant 0 : i32
    return %c0_i32, %c0_i32_0 : i32, i32
  }
  func.func @transform_2(%arg0: i32) -> (i32, i32) {
    %c0_i32 = arith.constant 0 : i32
    %c0_i32_0 = arith.constant 0 : i32
    %c0_i32_1 = arith.constant 0 : i32
    return %c0_i32, %c0_i32_0 : i32, i32
  }
  func.func @transform_3(%arg0: i32) -> (i32, i32) {
    %c0_i32 = arith.constant 0 : i32
    %c0_i32_0 = arith.constant 0 : i32
    %c0_i32_1 = arith.constant 0 : i32
    return %c0_i32, %c0_i32_0 : i32, i32
  }
  func.func @transform_4(%arg0: i32) -> (i32, i32) {
    %c0_i32 = arith.constant 0 : i32
    %c0_i32_0 = arith.constant 0 : i32
    %c0_i32_1 = arith.constant 0 : i32
    return %c0_i32, %c0_i32_0 : i32, i32
  }
  func.func @transform_5(%arg0: i32) -> (i32, i32) {
    %c0_i32 = arith.constant 0 : i32
    %c0_i32_0 = arith.constant 0 : i32
    %c0_i32_1 = arith.constant 0 : i32
    return %c0_i32, %c0_i32_0 : i32, i32
  }
  func.func @transform_6(%arg0: i32) -> (i32, i32) {
    %c0_i32 = arith.constant 0 : i32
    %c0_i32_0 = arith.constant 0 : i32
    %c0_i32_1 = arith.constant 0 : i32
    return %c0_i32, %c0_i32_0 : i32, i32
  }
  func.func @transform_7(%arg0: i32) -> (i32, i32) {
    %c0_i32 = arith.constant 0 : i32
    %c0_i32_0 = arith.constant 0 : i32
    %c0_i32_1 = arith.constant 0 : i32
    return %c0_i32, %c0_i32_0 : i32, i32
  }
  func.func @transform_8(%arg0: i32) -> (i32, i32) {
    %c0_i32 = arith.constant 0 : i32
    %c0_i32_0 = arith.constant 0 : i32
    %c0_i32_1 = arith.constant 0 : i32
    return %c0_i32, %c0_i32_0 : i32, i32
  }
  func.func @transform_9(%arg0: i32) -> (i32, i32) {
    %c0_i32 = arith.constant 0 : i32
    %c0_i32_0 = arith.constant 0 : i32
    %c0_i32_1 = arith.constant 0 : i32
    return %c0_i32, %c0_i32_0 : i32, i32
  }
  func.func @transform_10(%arg0: i32) -> (i32, i32) {
    %c0_i32 = arith.constant 0 : i32
    %c0_i32_0 = arith.constant 0 : i32
    %c0_i32_1 = arith.constant 0 : i32
    return %c0_i32, %c0_i32_0 : i32, i32
  }
  func.func @transform_11(%arg0: i32) -> (i32, i32) {
    %c0_i32 = arith.constant 0 : i32
    %c0_i32_0 = arith.constant 0 : i32
    %c0_i32_1 = arith.constant 0 : i32
    return %c0_i32, %c0_i32_0 : i32, i32
  }
  func.func @transform_12(%arg0: i32) -> (i32, i32) {
    %c0_i32 = arith.constant 0 : i32
    %c0_i32_0 = arith.constant 0 : i32
    %c0_i32_1 = arith.constant 0 : i32
    return %c0_i32, %c0_i32_0 : i32, i32
  }
  func.func @transform_13(%arg0: i32) -> (i32, i32) {
    %c0_i32 = arith.constant 0 : i32
    %c0_i32_0 = arith.constant 0 : i32
    return %c0_i32, %arg0 : i32, i32
  }
}

</mosaic_0001>

<bundles_post_ra>
// kernel: tpu_custom_call.1
= control target key start
LH: loop header
LB: loop body
LE: loop exit
PB: predicated region body
PF: predicated region fallthrough
CT: control target
= control target key end

     0   :  { %s3598_s0 = inlined_call_operand.vmem [shape: bf16[16,512], index: 0, kind: input, shape index: {}]   ;;  %s3599_s1 = inlined_call_operand.vmem [shape: bf16[128,16], index: 1, kind: input, shape index: {}]   ;;  %s3600_s2 = inlined_call_operand.vmem [shape: f32[128,1], index: 2, kind: input, shape index: {}]   ;;  %s3601_s3 = inlined_call_operand.vmem [shape: bf16[128,128], index: 3, kind: input, shape index: {}]   ;;  %s3602_s4 = inlined_call_operand.vmem [shape: f32[128,1], index: 4, kind: input, shape index: {}]   ;;  %s3603_s5 = inlined_call_operand.vmem [shape: bf16[128,128], index: 5, kind: input, shape index: {}]   ;;  %s3604_s6 = inlined_call_operand.vmem [shape: f32[128,1], index: 6, kind: input, shape index: {}]   ;;  %s3605_s7 = inlined_call_operand.vmem [shape: bf16[128,128], index: 7, kind: input, shape index: {}]   ;;  %s3606_s8 = inlined_call_operand.vmem [shape: f32[128,1], index: 8, kind: input, shape index: {}]   ;;  %s3607_s9 = inlined_call_operand.vmem [shape: bf16[128,128], index: 9, kind: input, shape index: {}]   ;;  %s3608_s10 = inlined_call_operand.vmem [shape: f32[128,1], index: 10, kind: input, shape index: {}]   ;;  %s3609_s11 = inlined_call_operand.vmem [shape: bf16[8,128], index: 11, kind: input, shape index: {}]   ;;  %s3610_s12 = inlined_call_operand.vmem [shape: f32[8,1], index: 12, kind: input, shape index: {}]   ;;  %s3611_s13 = inlined_call_operand.hbm [shape: f32[8,512], index: 13, kind: output, shape index: {}]  }
   0x1   :  { %3664 = sst [smem:[#allocation6_spill]] %s3598_s0 }
   0x2   :  { %3665 = sst [smem:[#allocation7_spill]] %s3599_s1 }
   0x3   :  { %18 = vsyncpa [#allocation4], 0 }
   0x4   :  { %20 = vsyncpa [#allocation4 + $0x1], 0  ;;  %s2598_s25 = smov 0   ;;  %s2600_s26 = smov 0  }
   0x5   :  { %s2602_s27 = smov 0   ;;  %s2604_s28 = smov 0  }
   0x6 LB: > { %s3612_s29 = sadd.s32 4294967295, %s2524_s28   ;;  %s2309_s30 = sadd.s32 4294967294, %s2524_s28   ;;  %s2524_s28 = sphi %s2604_s28, %s3725_s28   ;;  %s2520_s27 = sphi %s2602_s27, %s3724_s27   ;;  %s2516_s26 = sphi %s2600_s26, %s3723_s26   ;;  %s2512_s25 = sphi %s2598_s25, %s3722_s25  }
   0x7   : > { %s2621_s14 = sadd.s32 1, %s2524_s28   ;;  %s33_s15 = sadd.s32 1, %s2520_s27 }
   0x8   : > { %s30_s16 = ssub.s32 %s2524_s28, %s2621_s14  ;;  %p40_p0 = scmp.ne.s32.totalorder %s2520_s27, %s2516_s26 }
   0x9   : > { %p31_p1 = scmp.eq.s32.totalorder %s30_s16, 0  ;;  %p41_p2 = scmp.eq.s32.totalorder %s2524_s28, 0 }
   0xa   : > { %p322_p3 = scmp.eq.s32.totalorder %s3612_s29, 1  ;;  %p327_p4 = scmp.ne.s32.totalorder %s2516_s26, %s2512_s25 }
   0xb   : > { %s2634_s17 = scalar_select %p31_p1, %s2520_s27, %s33_s15  }
   0xc   : > { %p42_p5 = por %p41_p2, %p40_p0  ;;  %p2636_p6 = por %p322_p3, %p40_p0 }
   0xd   : > { %p328_p7 = scmp.eq.s32.totalorder %s2309_s30, 1  ;;  %p2311_p9 = scmp.ge.s32.totalorder %s2524_s28, 2 }
   0xf   : > { %p2640_p8 = por %p328_p7, %p327_p4  ;;  %380 = sbr.rel (%p2311_p9) target bundleno = 33 (0x21), region = 64 }
  0x16   : > { %383 = sbr.rel (!%p42_p5) target bundleno = 33 (0x21), region = 68  ;;  %s385_s20 = sand.u32 (%p42_p5), 1, %s2520_s27  }
  0x17   : > { %s2373_s21 = sshll.u32 (%p42_p5), %s2524_s28, 3  ;;  %s2312_s22 = sshll.u32 (%p42_p5), %s385_s20, 4 }
  0x18   : > { %s3668_s0 = sld [smem:[#allocation6_spill]] (%p42_p5)  ;;  %s387_s30 = scalar_lea.vmem (%p42_p5), [#allocation2], %s2312_s22 }
  0x1e   : > { %s390_s15 = scalar_lea.vmem %s3668_s0, %s2373_s21 }
  0x1f   : > { %v420_v0 = vld [vmem:[%s390_s15] sm:$0xff]  ;;  %v422_v1 = vld [vmem:[%s390_s15 + $0x10] sm:$0xff] }
  0x20   : > { %421 = vst [vmem:[%s387_s30] sm:$0xff] %v420_v0  ;;  %423 = vst [vmem:[%s387_s30 + $0x8] sm:$0xff] %v422_v1 }
  0x21 PF: > { %p2315_p10 = scmp.ge.s32.totalorder %s2524_s28, 1  ;;  %p428_p11 = scmp.lt.s32.totalorder %s2524_s28, 3 }
  0x23   : > { %p429_p12 = pnand %p2315_p10, %p428_p11 }
  0x24   : > { %v501_v2 = vld [vmem:[%s3600_s2 + $0x10] sm:$0xff] (!%p429_p12)  ;;  %v499_v3 = vld [vmem:[%s3600_s2] sm:$0xff] (!%p429_p12)  ;;  %s3613_s22 = sand.u32 (!%p429_p12), 1, %s2516_s26   ;;  %v2526_v4 = vmov (!%p429_p12), 0   ;;  %v502_v5 = vld [vmem:[%s3600_s2 + $0x18] sm:$0xff] (!%p429_p12)  ;;  %s3669_s1 = sld [smem:[#allocation7_spill]] (!%p429_p12) }
  0x25   : > { %432 = sbr.rel (%p429_p12) target bundleno = 1666 (0x682), region = 106  ;;  %2418 = vset.pattern.permute.xlu1 (!%p429_p12), %v2526_v4  ;;  %2417 = vset.pattern.permute.xlu0 (!%p429_p12), %v2526_v4  ;;  %s2668_s15 = sshll.u32 (!%p429_p12), %s3613_s22, 4  ;;  %v500_v6 = vld [vmem:[%s3600_s2 + $0x8] sm:$0xff] (!%p429_p12)  ;;  %v503_v10 = vld [vmem:[%s3600_s2 + $0x20] sm:$0xff] (!%p429_p12)  ;;  %vm645_vm0 = vcmask (!%p429_p12), 130048   ;;  %v506_v13 = vld [vmem:[%s3600_s2 + $0x38] sm:$0xff] (!%p429_p12) }
  0x26   : > { %527 = vperm.xlu1 (!%p429_p12), %2418, %v501_v2   ;;  %517 = vperm.xlu0 (!%p429_p12), %2417, %v499_v3   ;;  %s437_s16 = scalar_lea.vmem (!%p429_p12), [#allocation2], %s2668_s15  ;;  %v504_v9 = vld [vmem:[%s3600_s2 + $0x28] sm:$0xff] (!%p429_p12)  ;;  %v505_v14 = vld [vmem:[%s3600_s2 + $0x30] sm:$0xff] (!%p429_p12)  ;;  %v507_v16 = vld [vmem:[%s3600_s2 + $0x40] sm:$0xff] (!%p429_p12)  ;;  %s3720_s0 = sadd.s32 (!%p429_p12), 4294967295, %s2524_s28  }
  0x27   : > { %v2419_v7 = vld [vmem:[%s437_s16 + $0x4] ss:$8 sps:$4 sm:$0xff] (!%p429_p12)   ;;  %702 = vmatprep.mubr.bf16.mxu0 (!%p429_p12), %v2526_v4  ;;  %742 = vmatprep.mubr.bf16.mxu1 (!%p429_p12), %v2526_v4  ;;  %v2421_v8 = vld [vmem:[%s437_s16] ss:$8 sps:$4 sm:$0xff] (!%p429_p12)   ;;  %s477_s20 = scalar_lea.vmem (!%p429_p12), [#allocation3], %s2668_s15  ;;  %s3721_s15 = sand.u32 (!%p429_p12), 1, %s2516_s26  }
  0x28   : > { %670 = vmatprep.subr.bf16.mxu0 (!%p429_p12), %v2419_v7  ;;  %2375 = vmatprep.subr.bf16.mxu1 (!%p429_p12), %v2419_v7  ;;  %v508_v15 = vld [vmem:[%s3600_s2 + $0x48] sm:$0xff] (!%p429_p12)  ;;  %v510_v19 = vld [vmem:[%s3600_s2 + $0x58] sm:$0xff] (!%p429_p12)  ;;  %v509_v20 = vld [vmem:[%s3600_s2 + $0x50] sm:$0xff] (!%p429_p12)  ;;  %s2244_s21 = sshll.u32 (!%p429_p12), %s477_s20, 4  ;;  %s2230_s29 = scalar_lea.sflag (!%p429_p12), [#allocation4], %s3721_s15  ;;  %s3555_s21 = int_to_ptr.vmem [resolvable:$true] %s2244_s21 }
  0x29   : > { %671 = vmatpush1.bf16.msra.mxu0 (!%p429_p12), %v2421_v8  ;;  %2376 = vmatpush1.bf16.msra.mxu1 (!%p429_p12), %v2421_v8  ;;  %v512_v21 = vld [vmem:[%s3600_s2 + $0x68] sm:$0xff] (!%p429_p12)  ;;  %v511_v22 = vld [vmem:[%s3600_s2 + $0x60] sm:$0xff] (!%p429_p12)  ;;  %v514_v25 = vld [vmem:[%s3600_s2 + $0x78] sm:$0xff] (!%p429_p12)  ;;  %s2462_s30 = scalar_lea.vmem (!%p429_p12), %s3555_s21, 256  ;;  %s2527_s16 = smov (!%p429_p12), [#allocation3]  }
  0x2a   : > { %532 = vperm.xlu1 (!%p429_p12), %2418, %v502_v5   ;;  %522 = vperm.xlu0 (!%p429_p12), %2417, %v500_v6   ;;  %v2422_v11 = vld [vmem:[%s3669_s1] sm:$0xff] (!%p429_p12)   ;;  %v2424_v17 = vld [vmem:[%s3669_s1 + $0x8] sm:$0xff] (!%p429_p12)   ;;  %v2426_v23 = vld [vmem:[%s3669_s1 + $0x10] sm:$0xff] (!%p429_p12)   ;;  %p2463_p13 = scmp.ne.s32.totalorder (!%p429_p12), %s3555_s21, %s2462_s30 }
  0x2b   : > { %v2423_v12 = vld [vmem:[%s3669_s1 + $0x20] sm:$0xff] (!%p429_p12)   ;;  %v2425_v18 = vld [vmem:[%s3669_s1 + $0x28] sm:$0xff] (!%p429_p12)   ;;  %v2427_v24 = vld [vmem:[%s3669_s1 + $0x30] sm:$0xff] (!%p429_p12)  }
  0x2c   : > { %2328 = vmatmul.mubr.msk.bf16.vlgmr.msra.gmra.mrb[0].mxu0 %vm645_vm0, %v2422_v11  ;;  %2332 = vmatmul.mubr.msk.bf16.vlgmr.msra.gmra.mrb[0].mxu1 %vm645_vm0, %v2423_v12  ;;  %v513_v26 = vld [vmem:[%s3600_s2 + $0x70] sm:$0xff]  ;;  %v848_v27 = vld [vmem:[%s3602_s4 + $0x8] sm:$0xff]  ;;  %v847_v28 = vld [vmem:[%s3602_s4] sm:$0xff]  ;;  %p2464_p0 = pnand %p2463_p13, %p2636_p6 }
  0x2d   : > { %712 = vmatprep.mubr.bf16.mxu0 %v2526_v4  ;;  %752 = vmatprep.mubr.bf16.mxu1 %v2526_v4  ;;  %v2428_v29 = vld [vmem:[%s3669_s1 + $0x18] sm:$0xff]   ;;  %v849_v32 = vld [vmem:[%s3602_s4 + $0x10] sm:$0xff]  ;;  %v852_v33 = vld [vmem:[%s3602_s4 + $0x28] sm:$0xff] }
  0x2e   : > { %542 = vperm.xlu1 %2418, %v504_v9   ;;  %537 = vperm.xlu0 %2417, %v503_v10   ;;  %v2429_v30 = vld [vmem:[%s3669_s1 + $0x38] sm:$0xff]   ;;  %v851_v34 = vld [vmem:[%s3602_s4 + $0x20] sm:$0xff]  ;;  %v853_v36 = vld [vmem:[%s3602_s4 + $0x30] sm:$0xff]  ;;  %s2374_s1 = sshll.u32 %s3720_s0, 8  ;;  %p2465_p1 = pneg %p2464_p0 }
  0x2f   : > { %v850_v31 = vld [vmem:[%s3602_s4 + $0x18] sm:$0xff]  ;;  %v856_v37 = vld [vmem:[%s3602_s4 + $0x48] sm:$0xff]  ;;  %v855_v38 = vld [vmem:[%s3602_s4 + $0x40] sm:$0xff]  ;;  %s3553_s22 = scalar_lea.hbm %s3611_s13, %s2374_s1  ;;  %s2466_s0 = sshll.u32 %s2527_s16, 4  ;;  %s2467_s0 = int_to_ptr.vmem [resolvable:$false] %s2466_s0 }
  0x30   : > { %v854_v35 = vld [vmem:[%s3602_s4 + $0x38] sm:$0xff]  ;;  %v857_v40 = vld [vmem:[%s3602_s4 + $0x50] sm:$0xff]  ;;  %v860_v41 = vld [vmem:[%s3602_s4 + $0x68] sm:$0xff]  ;;  %s2468_s1 = scalar_lea.vmem %s2467_s0, 512  ;;  %p2469_p2 = scmp.lt.s32.totalorder %s3555_s21, %s2467_s0 }
  0x31   : > { %v858_v39 = vld [vmem:[%s3602_s4 + $0x58] sm:$0xff]  ;;  %v859_v42 = vld [vmem:[%s3602_s4 + $0x60] sm:$0xff]  ;;  %v861_v44 = vld [vmem:[%s3602_s4 + $0x70] sm:$0xff]  ;;  %p2470_p3 = scmp.lt.s32.totalorder %s2468_s1, %s2462_s30 }
  0x32   : > { %552 = vperm.xlu1 %2418, %v506_v13   ;;  %547 = vperm.xlu0 %2417, %v505_v14   ;;  %v862_v43 = vld [vmem:[%s3602_s4 + $0x78] sm:$0xff]  ;;  %v1169_v45 = vld [vmem:[%s3604_s6 + $0x8] sm:$0xff]  ;;  %v1168_v46 = vld [vmem:[%s3604_s6] sm:$0xff] }
  0x33   : > { %v1171_v47 = vld [vmem:[%s3604_s6 + $0x18] sm:$0xff]  ;;  %v1170_v48 = vld [vmem:[%s3604_s6 + $0x10] sm:$0xff]  ;;  %v1173_v49 = vld [vmem:[%s3604_s6 + $0x28] sm:$0xff]  ;;  %p2471_p4 = por %p2470_p3, %p2469_p2 }
  0x34   : > { %2329 = vmatmul.mubr.msk.bf16.gmra.mrb[4].mxu0 %vm645_vm0, %v2424_v17  ;;  %2333 = vmatmul.mubr.msk.bf16.gmra.mrb[4].mxu1 %vm645_vm0, %v2425_v18  ;;  %v1172_v50 = vld [vmem:[%s3604_s6 + $0x20] sm:$0xff]  ;;  %v1175_v51 = vld [vmem:[%s3604_s6 + $0x38] sm:$0xff]  ;;  %v1174_v52 = vld [vmem:[%s3604_s6 + $0x30] sm:$0xff] }
  0x35   : > { %722 = vmatprep.mubr.bf16.mxu0 %v2526_v4  ;;  %762 = vmatprep.mubr.bf16.mxu1 %v2526_v4  ;;  %v1177_v53 = vld [vmem:[%s3604_s6 + $0x48] sm:$0xff]  ;;  %v1176_v54 = vld [vmem:[%s3604_s6 + $0x40] sm:$0xff]  ;;  %v1179_v55 = vld [vmem:[%s3604_s6 + $0x58] sm:$0xff]  ;;  %p2472_p5 = pnand %p2471_p4, %p2465_p1 }
  0x36   : > { %562 = vperm.xlu1 %2418, %v508_v15   ;;  %557 = vperm.xlu0 %2417, %v507_v16   ;;  %v1178_v56 = vld [vmem:[%s3604_s6 + $0x50] sm:$0xff]  ;;  %v1181_v57 = vld [vmem:[%s3604_s6 + $0x68] sm:$0xff]  ;;  %v1180_v58 = vld [vmem:[%s3604_s6 + $0x60] sm:$0xff] }
  0x37   : > { %v1183_v59 = vld [vmem:[%s3604_s6 + $0x78] sm:$0xff]  ;;  %v1182_v60 = vld [vmem:[%s3604_s6 + $0x70] sm:$0xff]  ;;  %v1522_v61 = vld [vmem:[%s3606_s8 + $0x8] sm:$0xff] }
  0x38   : > { %v1521_v62 = vld [vmem:[%s3606_s8] sm:$0xff]  ;;  %v1524_v63 = vld [vmem:[%s3606_s8 + $0x18] sm:$0xff]  ;;  %v1523_v0 = vld [vmem:[%s3606_s8 + $0x10] sm:$0xff] }
  0x39   : > { %v1526_v1 = vld [vmem:[%s3606_s8 + $0x28] sm:$0xff]  ;;  %v1525_v2 = vld [vmem:[%s3606_s8 + $0x20] sm:$0xff]  ;;  %v1528_v3 = vld [vmem:[%s3606_s8 + $0x38] sm:$0xff] }
  0x3a   : > { %572 = vperm.xlu1 %2418, %v510_v19   ;;  %567 = vperm.xlu0 %2417, %v509_v20   ;;  %v1527_v5 = vld [vmem:[%s3606_s8 + $0x30] sm:$0xff]  ;;  %v1530_v6 = vld [vmem:[%s3606_s8 + $0x48] sm:$0xff]  ;;  %v1529_v7 = vld [vmem:[%s3606_s8 + $0x40] sm:$0xff] }
  0x3b   : > { %v1532_v8 = vld [vmem:[%s3606_s8 + $0x58] sm:$0xff]  ;;  %v1531_v9 = vld [vmem:[%s3606_s8 + $0x50] sm:$0xff]  ;;  %v1534_v10 = vld [vmem:[%s3606_s8 + $0x68] sm:$0xff] }
  0x3c   : > { %2330 = vmatmul.mubr.msk.bf16.gmra.mrb[8].mxu0 %vm645_vm0, %v2426_v23  ;;  %2334 = vmatmul.mubr.msk.bf16.gmra.mrb[8].mxu1 %vm645_vm0, %v2427_v24  ;;  %v1533_v11 = vld [vmem:[%s3606_s8 + $0x60] sm:$0xff]  ;;  %v1536_v12 = vld [vmem:[%s3606_s8 + $0x78] sm:$0xff]  ;;  %v1535_v13 = vld [vmem:[%s3606_s8 + $0x70] sm:$0xff] }
  0x3d   : > { %732 = vmatprep.mubr.bf16.mxu0 %v2526_v4  ;;  %772 = vmatprep.mubr.bf16.mxu1 %v2526_v4  ;;  %v1843_v14 = vld [vmem:[%s3608_s10 + $0x8] sm:$0xff]  ;;  %v1842_v15 = vld [vmem:[%s3608_s10] sm:$0xff]  ;;  %v1845_v16 = vld [vmem:[%s3608_s10 + $0x18] sm:$0xff] }
  0x3e   : > { %582 = vperm.xlu1 %2418, %v512_v21   ;;  %577 = vperm.xlu0 %2417, %v511_v22   ;;  %v1844_v17 = vld [vmem:[%s3608_s10 + $0x10] sm:$0xff]  ;;  %v1847_v18 = vld [vmem:[%s3608_s10 + $0x28] sm:$0xff]  ;;  %v1846_v19 = vld [vmem:[%s3608_s10 + $0x20] sm:$0xff] }
  0x3f   : > { %v1849_v20 = vld [vmem:[%s3608_s10 + $0x38] sm:$0xff]  ;;  %v1848_v21 = vld [vmem:[%s3608_s10 + $0x30] sm:$0xff]  ;;  %v1851_v22 = vld [vmem:[%s3608_s10 + $0x48] sm:$0xff] }
  0x40   : > { %v1850_v23 = vld [vmem:[%s3608_s10 + $0x40] sm:$0xff]  ;;  %v1853_v24 = vld [vmem:[%s3608_s10 + $0x58] sm:$0xff] }
  0x42   : > { %592 = vperm.xlu1 %2418, %v514_v25   ;;  %587 = vperm.xlu0 %2417, %v513_v26   ;;  %v1852_v25 = vld [vmem:[%s3608_s10 + $0x50] sm:$0xff]  ;;  %v1855_v26 = vld [vmem:[%s3608_s10 + $0x68] sm:$0xff] }
  0x44   : > { %2331 = vmatmul.mubr.msk.bf16.gmra.mrb[12].mxu0 %vm645_vm0, %v2428_v29  ;;  %2335 = vmatmul.mubr.msk.bf16.gmra.mrb[12].mxu1 %vm645_vm0, %v2429_v30  ;;  %v1856_v29 = vld [vmem:[%s3608_s10 + $0x70] sm:$0xff]  ;;  %v2180_v30 = vld [vmem:[%s3610_s12] sm:$0xff] }
  0x45   : > { %1023 = vmatprep.mubr.bf16.mxu1 %v2526_v4  ;;  %1344 = vmatprep.mubr.bf16.mxu0 %v2526_v4 }
  0x46   : > { %870 = vperm.xlu1 %2418, %v848_v27   ;;  %865 = vperm.xlu0 %2417, %v847_v28   ;;  %v1854_v27 = vld [vmem:[%s3608_s10 + $0x60] sm:$0xff]  ;;  %v1857_v28 = vld [vmem:[%s3608_s10 + $0x78] sm:$0xff] }
  0x4a   : > { %880 = vperm.xlu1 %2418, %v850_v31   ;;  %875 = vperm.xlu0 %2417, %v849_v32  }
  0x4e   : > { %890 = vperm.xlu1 %2418, %v852_v33   ;;  %885 = vperm.xlu0 %2417, %v851_v34  }
  0x52   : > { %900 = vperm.xlu1 %2418, %v854_v35   ;;  %895 = vperm.xlu0 %2417, %v853_v36  }
  0x56   : > { %910 = vperm.xlu1 %2418, %v856_v37   ;;  %905 = vperm.xlu0 %2417, %v855_v38  }
  0x5a   : > { %920 = vperm.xlu1 %2418, %v858_v39   ;;  %915 = vperm.xlu0 %2417, %v857_v40  }
  0x5e   : > { %930 = vperm.xlu1 %2418, %v860_v41   ;;  %925 = vperm.xlu0 %2417, %v859_v42  }
  0x62   : > { %940 = vperm.xlu1 %2418, %v862_v43   ;;  %935 = vperm.xlu0 %2417, %v861_v44  }
  0x66   : > { %1191 = vperm.xlu1 %2418, %v1169_v45   ;;  %1186 = vperm.xlu0 %2417, %v1168_v46  }
  0x6a   : > { %1201 = vperm.xlu1 %2418, %v1171_v47   ;;  %1196 = vperm.xlu0 %2417, %v1170_v48  }
  0x6e   : > { %1211 = vperm.xlu1 %2418, %v1173_v49   ;;  %1206 = vperm.xlu0 %2417, %v1172_v50  }
  0x72   : > { %1221 = vperm.xlu1 %2418, %v1175_v51   ;;  %1216 = vperm.xlu0 %2417, %v1174_v52  }
  0x76   : > { %1231 = vperm.xlu1 %2418, %v1177_v53   ;;  %1226 = vperm.xlu0 %2417, %v1176_v54  }
  0x7a   : > { %1241 = vperm.xlu1 %2418, %v1179_v55   ;;  %1236 = vperm.xlu0 %2417, %v1178_v56  }
  0x7e   : > { %1251 = vperm.xlu1 %2418, %v1181_v57   ;;  %1246 = vperm.xlu0 %2417, %v1180_v58  }
  0x82   : > { %1261 = vperm.xlu1 %2418, %v1183_v59   ;;  %1256 = vperm.xlu0 %2417, %v1182_v60  }
  0x86   : > { %1544 = vperm.xlu1 %2418, %v1522_v61   ;;  %1539 = vperm.xlu0 %2417, %v1521_v62  }
  0x8a   : > { %1554 = vperm.xlu1 %2418, %v1524_v63   ;;  %1549 = vperm.xlu0 %2417, %v1523_v0  }
  0x8e   : > { %1564 = vperm.xlu1 %2418, %v1526_v1   ;;  %1559 = vperm.xlu0 %2417, %v1525_v2  }
  0x92   : > { %1574 = vperm.xlu1 %2418, %v1528_v3   ;;  %1569 = vperm.xlu0 %2417, %v1527_v5  }
  0x96   : > { %1584 = vperm.xlu1 %2418, %v1530_v6   ;;  %1579 = vperm.xlu0 %2417, %v1529_v7  }
  0x9a   : > { %1594 = vperm.xlu1 %2418, %v1532_v8   ;;  %1589 = vperm.xlu0 %2417, %v1531_v9  }
  0x9e   : > { %1604 = vperm.xlu1 %2418, %v1534_v10   ;;  %1599 = vperm.xlu0 %2417, %v1533_v11  }
  0xa2   : > { %1614 = vperm.xlu1 %2418, %v1536_v12   ;;  %1609 = vperm.xlu0 %2417, %v1535_v13  }
  0xa5   : > { %v528_v31 = vpop.permute.xlu1 %527  ;;  %v518_v32 = vpop.permute.xlu0 %517 }
  0xa6   : > { %1865 = vperm.xlu1 %2418, %v1843_v14   ;;  %1860 = vperm.xlu0 %2417, %v1842_v15  }
  0xa9   : > { %v533_v33 = vpop.permute.xlu1 %532  ;;  %v523_v34 = vpop.permute.xlu0 %522 }
  0xaa   : > { %1875 = vperm.xlu1 %2418, %v1845_v16   ;;  %1870 = vperm.xlu0 %2417, %v1844_v17  }
  0xad   : > { %v543_v35 = vpop.permute.xlu1 %542  ;;  %v538_v36 = vpop.permute.xlu0 %537 }
  0xae   : > { %1885 = vperm.xlu1 %2418, %v1847_v18   ;;  %1880 = vperm.xlu0 %2417, %v1846_v19  }
  0xb1   : > { %v2962_v52 = vpop.permute.xlu1 %552  ;;  %v548_v54 = vpop.permute.xlu0 %547 }
  0xb2   : > { %1895 = vperm.xlu1 %2418, %v1849_v20   ;;  %1890 = vperm.xlu0 %2417, %v1848_v21  }
  0xb5   : > { %v563_v10 = vpop.permute.xlu1 %562  ;;  %v558_v13 = vpop.permute.xlu0 %557 }
  0xb6   : > { %1905 = vperm.xlu1 %2418, %v1851_v22   ;;  %1900 = vperm.xlu0 %2417, %v1850_v23  }
  0xba   : > { %1915 = vperm.xlu1 %2418, %v1853_v24   ;;  %1910 = vperm.xlu0 %2417, %v1852_v25  }
  0xbe   : > { %1925 = vperm.xlu1 %2418, %v1855_v26   ;;  %1920 = vperm.xlu0 %2417, %v1854_v27  }
  0xc2   : > { %1935 = vperm.xlu1 %2418, %v1857_v28   ;;  %1930 = vperm.xlu0 %2417, %v1856_v29  }
  0xc6   : > { %2183 = vperm.xlu0 %2417, %v2180_v30  }
  0xff   : > { %v704_v37 = vpop.f32.mrb[0].mxu0  ;;  %v2947_v38 = vpop.f32.mrb[0].mxu1 }
 0x100   : > { %v706_v39 = vpop.f32.mrb[1].mxu0  ;;  %v746_v40 = vpop.f32.mrb[1].mxu1  ;;  %v2953_v44 = vadd.f32 %v704_v37, %v518_v32 }
 0x101   : > { %v2949_v41 = vadd.f32 %v706_v39, %v518_v32  ;;  %v708_v42 = vpop.f32.mrb[2].mxu0  ;;  %v2951_v43 = vpop.f32.mrb[2].mxu1 }
 0x102   : > { %v2955_v45 = vadd.f32 %v708_v42, %v523_v34  ;;  %v710_v46 = vpop.f32.mrb[3].mxu0  ;;  %v750_v48 = vpop.f32.mrb[3].mxu1  ;;  %v783_v53 = vmax.f32 %v2953_v44, 0.0 }
 0x103   : > { %v2957_v47 = vadd.f32 %v710_v46, %v523_v34  ;;  %v784_v50 = vmax.f32 %v2949_v41, 0.0  ;;  %v573_v32 = vpop.permute.xlu1 %572 }
 0x104   : > { %v785_v49 = vmax.f32 %v2955_v45, 0.0 }
 0x105   : > { %v786_v51 = vmax.f32 %v2957_v47, 0.0 }
 0x106   : > { %v831_v57 = vpack.c.bf16 %v785_v49, %v783_v53 }
 0x107   : > { %v832_v55 = vpack.c.bf16 %v786_v51, %v784_v50  ;;  %v714_v56 = vpop.f32.mrb[4].mxu0  ;;  %v2973_v58 = vpop.f32.mrb[4].mxu1 }
 0x108   : > { %v716_v59 = vpop.f32.mrb[5].mxu0  ;;  %v756_v61 = vpop.f32.mrb[5].mxu1  ;;  %v2977_v63 = vadd.f32 %v714_v56, %v528_v31 }
 0x109   : > { %v2975_v60 = vadd.f32 %v716_v59, %v528_v31  ;;  %v718_v62 = vpop.f32.mrb[6].mxu0  ;;  %991 = vmatprep.subr.bf16.mxu1 %v832_v55  ;;  %v2981_v1 = vpop.f32.mrb[6].mxu1 }
 0x10a   : > { %v2979_v0 = vadd.f32 %v718_v62, %v533_v33  ;;  %v720_v2 = vpop.f32.mrb[7].mxu0  ;;  %992 = vmatpush1.bf16.msra.mxu1 %v831_v57  ;;  %v760_v5 = vpop.f32.mrb[7].mxu1  ;;  %v787_v9 = vmax.f32 %v2977_v63, 0.0  ;;  %v3033_v62 = vadd.f32 %v2947_v38, %v558_v13 }
 0x10b   : > { %v2983_v3 = vadd.f32 %v720_v2, %v533_v33  ;;  %v788_v7 = vmax.f32 %v2975_v60, 0.0  ;;  %v568_v33 = vpop.permute.xlu0 %567 }
 0x10c   : > { %v789_v6 = vmax.f32 %v2979_v0, 0.0 }
 0x10d   : > { %v3638_v8 = vmax.f32 %v2983_v3, 0.0 }
 0x10e   : > { %v833_v14 = vpack.c.bf16 %v789_v6, %v787_v9 }
 0x10f   : > { %v834_v11 = vpack.c.bf16 %v3638_v8, %v788_v7  ;;  %v724_v12 = vpop.f32.mrb[8].mxu0  ;;  %v2997_v15 = vpop.f32.mrb[8].mxu1 }
 0x110   : > { %v726_v16 = vpop.f32.mrb[9].mxu0  ;;  %v766_v17 = vpop.f32.mrb[9].mxu1  ;;  %v3001_v21 = vadd.f32 %v724_v12, %v538_v36  ;;  %v3040_v12 = vadd.f32 %v2951_v43, %v563_v10 }
 0x111   : > { %993 = vmatprep.subr.bf16.mxu1 %v834_v11  ;;  %v2999_v18 = vadd.f32 %v726_v16, %v538_v36  ;;  %v728_v19 = vpop.f32.mrb[10].mxu0  ;;  %v768_v20 = vpop.f32.mrb[10].mxu1  ;;  %v3019_v36 = vadd.f32 %v750_v48, %v563_v10  ;;  %v3044_v16 = vadd.f32 %v756_v61, %v568_v33 }
 0x112   : > { %994 = vmatpush1.bf16.msra.mxu1 %v833_v14  ;;  %v3003_v22 = vadd.f32 %v728_v19, %v543_v35  ;;  %v730_v23 = vpop.f32.mrb[11].mxu0  ;;  %v770_v24 = vpop.f32.mrb[11].mxu1  ;;  %v3636_v29 = vmax.f32 %v3001_v21, 0.0  ;;  %v3046_v19 = vadd.f32 %v760_v5, %v573_v32  ;;  %v3617_v61 = vmax.f32 %v3040_v12, 0.0 }
 0x113   : > { %v3005_v25 = vadd.f32 %v730_v23, %v543_v35  ;;  %v3637_v27 = vmax.f32 %v2999_v18, 0.0  ;;  %v3017_v35 = vadd.f32 %v746_v40, %v558_v13  ;;  %v583_v13 = vpop.permute.xlu1 %582  ;;  %v578_v10 = vpop.permute.xlu0 %577  ;;  %v3058_v5 = vadd.f32 %v2973_v58, %v568_v33 }
 0x114   : > { %v3635_v26 = vmax.f32 %v3003_v22, 0.0  ;;  %v3075_v58 = vadd.f32 %v766_v17, %v578_v10 }
 0x115   : > { %v3634_v28 = vmax.f32 %v3005_v25, 0.0  ;;  %v3616_v11 = vmax.f32 %v3017_v35, 0.0  ;;  %v3629_v33 = vmax.f32 %v3058_v5, 0.0 }
 0x116   : > { %v835_v37 = vpack.c.bf16 %v3635_v26, %v3636_v29 }
 0x117   : > { %v734_v30 = vpop.f32.mrb[12].mxu0  ;;  %v3011_v31 = vpop.f32.mrb[12].mxu1  ;;  %v836_v34 = vpack.c.bf16 %v3634_v28, %v3637_v27 }
 0x118   : > { %v736_v39 = vpop.f32.mrb[13].mxu0  ;;  %v776_v42 = vpop.f32.mrb[13].mxu1  ;;  %v3027_v57 = vadd.f32 %v734_v30, %v548_v54  ;;  %v3618_v30 = vmax.f32 %v3033_v62, 0.0 }
 0x119   : > { %v3025_v46 = vadd.f32 %v736_v39, %v548_v54  ;;  %v738_v55 = vpop.f32.mrb[14].mxu0  ;;  %v778_v56 = vpop.f32.mrb[14].mxu1  ;;  %995 = vmatprep.subr.bf16.mxu1 %v836_v34  ;;  %v3615_v54 = vmax.f32 %v3019_v36, 0.0  ;;  %v3061_v34 = vadd.f32 %v2981_v1, %v573_v32 }
 0x11a   : > { %v3030_v59 = vadd.f32 %v738_v55, %v2962_v52  ;;  %v740_v40 = vpop.f32.mrb[15].mxu0  ;;  %v780_v48 = vpop.f32.mrb[15].mxu1  ;;  %996 = vmatpush1.bf16.msra.mxu1 %v835_v37  ;;  %v3630_v55 = vmax.f32 %v3044_v16, 0.0  ;;  %v839_v32 = vpack.c.bf16 %v3617_v61, %v3618_v30  ;;  %v3627_v61 = vmax.f32 %v3075_v58, 0.0 }
 0x11b   : > { %v3036_v2 = vadd.f32 %v740_v40, %v2962_v52  ;;  %v3633_v23 = vmax.f32 %v3025_v46, 0.0  ;;  %v3632_v52 = vmax.f32 %v3027_v57, 0.0  ;;  %v840_v39 = vpack.c.bf16 %v3615_v54, %v3616_v11  ;;  %v593_v1 = vpop.permute.xlu1 %592 }
 0x11c   : > { %v3631_v14 = vmax.f32 %v3030_v59, 0.0  ;;  %v3619_v40 = vmax.f32 %v3046_v19, 0.0  ;;  %v3628_v54 = vmax.f32 %v3061_v34, 0.0  ;;  %v3083_v11 = vadd.f32 %v768_v20, %v583_v13 }
 0x11d   : > { %v3614_v38 = vmax.f32 %v3036_v2, 0.0 }
 0x11e   : > { %v837_v37 = vpack.c.bf16 %v3631_v14, %v3632_v52  ;;  %v841_v20 = vpack.c.bf16 %v3628_v54, %v3629_v33 }
 0x11f   : > { %v838_v43 = vpack.c.bf16 %v3614_v38, %v3633_v23  ;;  %v3073_v38 = vadd.f32 %v770_v24, %v583_v13  ;;  %v842_v24 = vpack.c.bf16 %v3619_v40, %v3630_v55  ;;  %v3625_v13 = vmax.f32 %v3083_v11, 0.0 }
 0x120   : > { %v3103_v40 = vadd.f32 %v778_v56, %v593_v1 }
 0x121   : > { %997 = vmatprep.subr.bf16.mxu1 %v838_v43  ;;  %v3620_v17 = vmax.f32 %v3073_v38, 0.0  ;;  %v3090_v43 = vadd.f32 %v780_v48, %v593_v1 }
 0x122   : > { %998 = vmatpush1.bf16.msra.mxu1 %v837_v37  ;;  %v588_v37 = vpop.permute.xlu0 %587  ;;  %v3622_v1 = vmax.f32 %v3103_v40, 0.0 }
 0x123   : > { %999 = vmatprep.subr.bf16.mxu1 %v840_v39  ;;  %v3093_v39 = vadd.f32 %v2997_v15, %v578_v10  ;;  %v3096_v30 = vadd.f32 %v776_v42, %v588_v37  ;;  %v844_v15 = vpack.c.bf16 %v3620_v17, %v3627_v61  ;;  %v3621_v48 = vmax.f32 %v3090_v43, 0.0 }
 0x124   : > { %v3112_v10 = vadd.f32 %v3011_v31, %v588_v37  ;;  %v2430_v37 = vld [vmem:[%s3601_s3] sm:$0xff]  }
 0x125   : > { %v3626_v42 = vmax.f32 %v3093_v39, 0.0 }
 0x126   : > { %1000 = vmatpush1.bf16.msra.mxu1 %v839_v32  ;;  %v3624_v32 = vmax.f32 %v3096_v30, 0.0  ;;  %v3623_v17 = vmax.f32 %v3112_v10, 0.0 }
 0x127   : > { %1001 = vmatprep.subr.bf16.mxu1 %v842_v24  ;;  %v843_v56 = vpack.c.bf16 %v3625_v13, %v3626_v42 }
 0x128   : > { %v846_v24 = vpack.c.bf16 %v3621_v48, %v3624_v32  ;;  %v845_v31 = vpack.c.bf16 %v3622_v1, %v3623_v17  ;;  %v871_v48 = vpop.permute.xlu1 %870 }
 0x12a   : > { %1002 = vmatpush1.bf16.msra.mxu1 %v841_v20  ;;  %v2431_v20 = vld [vmem:[%s3601_s3 + $0x8] sm:$0xff]  }
 0x12b   : > { %1003 = vmatprep.subr.bf16.mxu1 %v844_v15  ;;  %v2432_v15 = vld [vmem:[%s3601_s3 + $0x10] sm:$0xff]  }
 0x12c   : > { %v881_v26 = vpop.permute.xlu1 %880 }
 0x12e   : > { %1004 = vmatpush1.bf16.msra.mxu1 %v843_v56  ;;  %v2433_v56 = vld [vmem:[%s3601_s3 + $0x18] sm:$0xff]  }
 0x12f   : > { %1005 = vmatprep.subr.bf16.mxu1 %v846_v24  ;;  %v2434_v24 = vld [vmem:[%s3601_s3 + $0x20] sm:$0xff]  }
 0x132   : > { %1006 = vmatpush1.bf16.msra.mxu1 %v845_v31  ;;  %v2435_v31 = vld [vmem:[%s3601_s3 + $0x28] sm:$0xff]  }
 0x135   : > { %1024 = vmatmul.mubr.bf16.vlgmr.msra.gmra.mrb[16].mxu1 %v2430_v37  ;;  %v2436_v37 = vld [vmem:[%s3601_s3 + $0x30] sm:$0xff]  }
 0x136   : > { %1033 = vmatprep.mubr.bf16.mxu1 %v2526_v4 }
 0x13d   : > { %1034 = vmatmul.mubr.bf16.gmra.mrb[20].mxu1 %v2431_v20  ;;  %v2437_v20 = vld [vmem:[%s3601_s3 + $0x38] sm:$0xff]  }
 0x13e   : > { %1043 = vmatprep.mubr.bf16.mxu1 %v2526_v4 }
 0x145   : > { %1044 = vmatmul.mubr.bf16.gmra.mrb[24].mxu1 %v2432_v15  ;;  %v866_v15 = vpop.permute.xlu0 %865 }
 0x146   : > { %1053 = vmatprep.mubr.bf16.mxu1 %v2526_v4 }
 0x149   : > { %v876_v14 = vpop.permute.xlu0 %875 }
 0x14d   : > { %1054 = vmatmul.mubr.bf16.gmra.mrb[28].mxu1 %v2433_v56 }
 0x14e   : > { %1063 = vmatprep.mubr.bf16.mxu1 %v2526_v4 }
 0x155   : > { %1064 = vmatmul.mubr.bf16.gmra.mrb[32].mxu1 %v2434_v24 }
 0x156   : > { %1073 = vmatprep.mubr.bf16.mxu1 %v2526_v4 }
 0x15d   : > { %1074 = vmatmul.mubr.bf16.gmra.mrb[36].mxu1 %v2435_v31 }
 0x15e   : > { %1083 = vmatprep.mubr.bf16.mxu1 %v2526_v4 }
 0x165   : > { %1084 = vmatmul.mubr.bf16.gmra.mrb[40].mxu1 %v2436_v37 }
 0x166   : > { %1093 = vmatprep.mubr.bf16.mxu1 %v2526_v4 }
 0x16d   : > { %1094 = vmatmul.mubr.bf16.gmra.mrb[44].mxu1 %v2437_v20 }
 0x16e   : > { %1697 = vmatprep.mubr.bf16.mxu1 %v2526_v4 }
 0x208   : > { %v1025_v56 = vpop.f32.mrb[16].mxu1 }
 0x209   : > { %v1026_v24 = vadd.f32 %v1025_v56, %v866_v15  ;;  %v1027_v31 = vpop.f32.mrb[17].mxu1 }
 0x20a   : > { %v1028_v1 = vadd.f32 %v1027_v31, %v866_v15  ;;  %v1029_v17 = vpop.f32.mrb[18].mxu1 }
 0x20b   : > { %v1030_v32 = vadd.f32 %v1029_v17, %v871_v48  ;;  %v1031_v13 = vpop.f32.mrb[19].mxu1  ;;  %v1104_v37 = vmax.f32 %v1026_v24, 0.0 }
 0x20c   : > { %v1032_v42 = vadd.f32 %v1031_v13, %v871_v48  ;;  %v1105_v54 = vmax.f32 %v1028_v1, 0.0 }
 0x20d   : > { %v1106_v61 = vmax.f32 %v1030_v32, 0.0 }
 0x20e   : > { %v1107_v33 = vmax.f32 %v1032_v42, 0.0  ;;  %v886_v42 = vpop.permute.xlu0 %885 }
 0x20f   : > { %v1152_v55 = vpack.c.bf16 %v1106_v61, %v1104_v37  ;;  %v891_v37 = vpop.permute.xlu1 %890 }
 0x210   : > { %v1153_v52 = vpack.c.bf16 %v1107_v33, %v1105_v54  ;;  %v1035_v20 = vpop.f32.mrb[20].mxu1 }
 0x211   : > { %v1036_v23 = vadd.f32 %v1035_v20, %v876_v14  ;;  %v1037_v28 = vpop.f32.mrb[21].mxu1 }
 0x212   : > { %v1038_v29 = vadd.f32 %v1037_v28, %v876_v14  ;;  %v1039_v56 = vpop.f32.mrb[22].mxu1  ;;  %1312 = vmatprep.subr.bf16.mxu0 %v1153_v52 }
 0x213   : > { %v1040_v27 = vadd.f32 %v1039_v56, %v881_v26  ;;  %v1041_v15 = vpop.f32.mrb[23].mxu1  ;;  %1313 = vmatpush1.bf16.msra.mxu0 %v1152_v55  ;;  %v1108_v31 = vmax.f32 %v1036_v23, 0.0  ;;  %v896_v56 = vpop.permute.xlu0 %895 }
 0x214   : > { %v1042_v17 = vadd.f32 %v1041_v15, %v881_v26  ;;  %v1109_v48 = vmax.f32 %v1038_v29, 0.0 }
 0x215   : > { %v1110_v13 = vmax.f32 %v1040_v27, 0.0 }
 0x216   : > { %v1111_v32 = vmax.f32 %v1042_v17, 0.0 }
 0x217   : > { %v1154_v1 = vpack.c.bf16 %v1110_v13, %v1108_v31 }
 0x218   : > { %v1155_v61 = vpack.c.bf16 %v1111_v32, %v1109_v48  ;;  %v1045_v24 = vpop.f32.mrb[24].mxu1  ;;  %v901_v48 = vpop.permute.xlu1 %900 }
 0x219   : > { %v1046_v54 = vadd.f32 %v1045_v24, %v886_v42  ;;  %v1047_v33 = vpop.f32.mrb[25].mxu1 }
 0x21a   : > { %v1048_v20 = vadd.f32 %v1047_v33, %v886_v42  ;;  %v1049_v8 = vpop.f32.mrb[26].mxu1  ;;  %1314 = vmatprep.subr.bf16.mxu0 %v1155_v61 }
 0x21b   : > { %v1050_v28 = vadd.f32 %v1049_v8, %v891_v37  ;;  %v1051_v14 = vpop.f32.mrb[27].mxu1  ;;  %1315 = vmatpush1.bf16.msra.mxu0 %v1154_v1  ;;  %v1112_v55 = vmax.f32 %v1046_v54, 0.0 }
 0x21c   : > { %v1052_v52 = vadd.f32 %v1051_v14, %v891_v37  ;;  %v1113_v23 = vmax.f32 %v1048_v20, 0.0 }
 0x21d   : > { %v1114_v26 = vmax.f32 %v1050_v28, 0.0  ;;  %v906_v28 = vpop.permute.xlu0 %905 }
 0x21e   : > { %v1115_v27 = vmax.f32 %v1052_v52, 0.0 }
 0x21f   : > { %v1156_v29 = vpack.c.bf16 %v1114_v26, %v1112_v55 }
 0x220   : > { %v1157_v15 = vpack.c.bf16 %v1115_v27, %v1113_v23  ;;  %v1055_v17 = vpop.f32.mrb[28].mxu1  ;;  %v911_v23 = vpop.permute.xlu1 %910 }
 0x221   : > { %v1056_v31 = vadd.f32 %v1055_v17, %v896_v56  ;;  %v1057_v13 = vpop.f32.mrb[29].mxu1 }
 0x222   : > { %v1058_v32 = vadd.f32 %v1057_v13, %v896_v56  ;;  %v1059_v24 = vpop.f32.mrb[30].mxu1  ;;  %1316 = vmatprep.subr.bf16.mxu0 %v1157_v15 }
 0x223   : > { %v1060_v42 = vadd.f32 %v1059_v24, %v901_v48  ;;  %v1061_v61 = vpop.f32.mrb[31].mxu1  ;;  %1317 = vmatpush1.bf16.msra.mxu0 %v1156_v29  ;;  %v1116_v1 = vmax.f32 %v1056_v31, 0.0 }
 0x224   : > { %v1062_v8 = vadd.f32 %v1061_v61, %v901_v48  ;;  %v1117_v54 = vmax.f32 %v1058_v32, 0.0 }
 0x225   : > { %v1118_v33 = vmax.f32 %v1060_v42, 0.0  ;;  %v916_v42 = vpop.permute.xlu0 %915 }
 0x226   : > { %v1119_v37 = vmax.f32 %v1062_v8, 0.0 }
 0x227   : > { %v1158_v20 = vpack.c.bf16 %v1118_v33, %v1116_v1 }
 0x228   : > { %v1159_v14 = vpack.c.bf16 %v1119_v37, %v1117_v54  ;;  %v1065_v52 = vpop.f32.mrb[32].mxu1  ;;  %v921_v54 = vpop.permute.xlu1 %920 }
 0x229   : > { %v1066_v55 = vadd.f32 %v1065_v52, %v906_v28  ;;  %v1067_v26 = vpop.f32.mrb[33].mxu1 }
 0x22a   : > { %v1068_v27 = vadd.f32 %v1067_v26, %v906_v28  ;;  %v1069_v17 = vpop.f32.mrb[34].mxu1  ;;  %1318 = vmatprep.subr.bf16.mxu0 %v1159_v14 }
 0x22b   : > { %v1070_v56 = vadd.f32 %v1069_v17, %v911_v23  ;;  %v1071_v15 = vpop.f32.mrb[35].mxu1  ;;  %1319 = vmatpush1.bf16.msra.mxu0 %v1158_v20  ;;  %v1120_v29 = vmax.f32 %v1066_v55, 0.0 }
 0x22c   : > { %v1072_v13 = vadd.f32 %v1071_v15, %v911_v23  ;;  %v1121_v31 = vmax.f32 %v1068_v27, 0.0 }
 0x22d   : > { %v1122_v48 = vmax.f32 %v1070_v56, 0.0  ;;  %v926_v56 = vpop.permute.xlu0 %925 }
 0x22e   : > { %v1123_v24 = vmax.f32 %v1072_v13, 0.0 }
 0x22f   : > { %v1160_v32 = vpack.c.bf16 %v1122_v48, %v1120_v29 }
 0x230   : > { %v1161_v61 = vpack.c.bf16 %v1123_v24, %v1121_v31  ;;  %v1075_v8 = vpop.f32.mrb[36].mxu1  ;;  %v931_v31 = vpop.permute.xlu1 %930 }
 0x231   : > { %v1076_v1 = vadd.f32 %v1075_v8, %v916_v42  ;;  %v1077_v33 = vpop.f32.mrb[37].mxu1 }
 0x232   : > { %v1078_v37 = vadd.f32 %v1077_v33, %v916_v42  ;;  %v1079_v52 = vpop.f32.mrb[38].mxu1  ;;  %1320 = vmatprep.subr.bf16.mxu0 %v1161_v61 }
 0x233   : > { %v1080_v28 = vadd.f32 %v1079_v52, %v921_v54  ;;  %v1081_v14 = vpop.f32.mrb[39].mxu1  ;;  %1321 = vmatpush1.bf16.msra.mxu0 %v1160_v32  ;;  %v1124_v20 = vmax.f32 %v1076_v1, 0.0 }
 0x234   : > { %v1082_v26 = vadd.f32 %v1081_v14, %v921_v54  ;;  %v1125_v55 = vmax.f32 %v1078_v37, 0.0 }
 0x235   : > { %v1126_v23 = vmax.f32 %v1080_v28, 0.0  ;;  %v936_v28 = vpop.permute.xlu0 %935 }
 0x236   : > { %v1127_v17 = vmax.f32 %v1082_v26, 0.0 }
 0x237   : > { %v1162_v27 = vpack.c.bf16 %v1126_v23, %v1124_v20 }
 0x238   : > { %v1163_v15 = vpack.c.bf16 %v1127_v17, %v1125_v55  ;;  %v1085_v13 = vpop.f32.mrb[40].mxu1  ;;  %v941_v55 = vpop.permute.xlu1 %940 }
 0x239   : > { %v1086_v29 = vadd.f32 %v1085_v13, %v926_v56  ;;  %v1087_v48 = vpop.f32.mrb[41].mxu1 }
 0x23a   : > { %v1088_v24 = vadd.f32 %v1087_v48, %v926_v56  ;;  %v1089_v8 = vpop.f32.mrb[42].mxu1  ;;  %1322 = vmatprep.subr.bf16.mxu0 %v1163_v15 }
 0x23b   : > { %v1090_v42 = vadd.f32 %v1089_v8, %v931_v31  ;;  %v1091_v61 = vpop.f32.mrb[43].mxu1  ;;  %1323 = vmatpush1.bf16.msra.mxu0 %v1162_v27  ;;  %v1128_v32 = vmax.f32 %v1086_v29, 0.0 }
 0x23c   : > { %v1092_v33 = vadd.f32 %v1091_v61, %v931_v31  ;;  %v1129_v1 = vmax.f32 %v1088_v24, 0.0  ;;  %v2438_v61 = vld [vmem:[%s3603_s5] sm:$0xff]  }
 0x23d   : > { %v1130_v54 = vmax.f32 %v1090_v42, 0.0 }
 0x23e   : > { %v1131_v52 = vmax.f32 %v1092_v33, 0.0  ;;  %v2439_v33 = vld [vmem:[%s3603_s5 + $0x8] sm:$0xff]  }
 0x23f   : > { %v1164_v37 = vpack.c.bf16 %v1130_v54, %v1128_v32  ;;  %v2440_v32 = vld [vmem:[%s3603_s5 + $0x10] sm:$0xff]   ;;  %v2441_v54 = vld [vmem:[%s3603_s5 + $0x18] sm:$0xff]  }
 0x240   : > { %v1165_v14 = vpack.c.bf16 %v1131_v52, %v1129_v1  ;;  %v1095_v26 = vpop.f32.mrb[44].mxu1  ;;  %v2442_v1 = vld [vmem:[%s3603_s5 + $0x20] sm:$0xff]   ;;  %v2443_v52 = vld [vmem:[%s3603_s5 + $0x28] sm:$0xff]  }
 0x241   : > { %v1096_v20 = vadd.f32 %v1095_v26, %v936_v28  ;;  %v1097_v23 = vpop.f32.mrb[45].mxu1 }
 0x242   : > { %v1098_v17 = vadd.f32 %v1097_v23, %v936_v28  ;;  %v1099_v13 = vpop.f32.mrb[46].mxu1  ;;  %1324 = vmatprep.subr.bf16.mxu0 %v1165_v14  ;;  %v2445_v28 = vld [vmem:[%s3603_s5 + $0x38] sm:$0xff]   ;;  %v1187_v14 = vpop.permute.xlu0 %1186 }
 0x243   : > { %v1100_v56 = vadd.f32 %v1099_v13, %v941_v55  ;;  %v1101_v15 = vpop.f32.mrb[47].mxu1  ;;  %1325 = vmatpush1.bf16.msra.mxu0 %v1164_v37  ;;  %v1132_v27 = vmax.f32 %v1096_v20, 0.0  ;;  %v2444_v37 = vld [vmem:[%s3603_s5 + $0x30] sm:$0xff]  }
 0x244   : > { %v1102_v48 = vadd.f32 %v1101_v15, %v941_v55  ;;  %v1133_v29 = vmax.f32 %v1098_v17, 0.0  ;;  %v1192_v55 = vpop.permute.xlu1 %1191 }
 0x245   : > { %v1134_v31 = vmax.f32 %v1100_v56, 0.0 }
 0x246   : > { %v1135_v8 = vmax.f32 %v1102_v48, 0.0 }
 0x247   : > { %v1166_v24 = vpack.c.bf16 %v1134_v31, %v1132_v27 }
 0x248   : > { %v1167_v42 = vpack.c.bf16 %v1135_v8, %v1133_v29 }
 0x24a   : > { %1326 = vmatprep.subr.bf16.mxu0 %v1167_v42  ;;  %v1197_v42 = vpop.permute.xlu0 %1196 }
 0x24b   : > { %1327 = vmatpush1.bf16.msra.mxu0 %v1166_v24 }
 0x24e   : > { %1345 = vmatmul.mubr.bf16.vlgmr.msra.gmra.mrb[16].mxu0 %v2438_v61  ;;  %v1207_v60 = vpop.permute.xlu0 %1206 }
 0x24f   : > { %1354 = vmatprep.mubr.bf16.mxu0 %v2526_v4 }
 0x256   : > { %1355 = vmatmul.mubr.bf16.gmra.mrb[20].mxu0 %v2439_v33 }
 0x257   : > { %1364 = vmatprep.mubr.bf16.mxu0 %v2526_v4 }
 0x25e   : > { %1365 = vmatmul.mubr.bf16.gmra.mrb[24].mxu0 %v2440_v32  ;;  %v1202_v32 = vpop.permute.xlu1 %1201 }
 0x25f   : > { %1374 = vmatprep.mubr.bf16.mxu0 %v2526_v4 }
 0x262   : > { %v1212_v0 = vpop.permute.xlu1 %1211 }
 0x266   : > { %1375 = vmatmul.mubr.bf16.gmra.mrb[28].mxu0 %v2441_v54 }
 0x267   : > { %1384 = vmatprep.mubr.bf16.mxu0 %v2526_v4 }
 0x26e   : > { %1385 = vmatmul.mubr.bf16.gmra.mrb[32].mxu0 %v2442_v1 }
 0x26f   : > { %1394 = vmatprep.mubr.bf16.mxu0 %v2526_v4 }
 0x276   : > { %1395 = vmatmul.mubr.bf16.gmra.mrb[36].mxu0 %v2443_v52 }
 0x277   : > { %1404 = vmatprep.mubr.bf16.mxu0 %v2526_v4 }
 0x27e   : > { %1405 = vmatmul.mubr.bf16.gmra.mrb[40].mxu0 %v2444_v37 }
 0x27f   : > { %1414 = vmatprep.mubr.bf16.mxu0 %v2526_v4 }
 0x286   : > { %1415 = vmatmul.mubr.bf16.gmra.mrb[44].mxu0 %v2445_v28 }
 0x287   : > { %2018 = vmatprep.mubr.bf16.mxu0 %v2526_v4 }
 0x321   : > { %v1346_v26 = vpop.f32.mrb[16].mxu0 }
 0x322   : > { %v1347_v20 = vadd.f32 %v1346_v26, %v1187_v14  ;;  %v1348_v23 = vpop.f32.mrb[17].mxu0  ;;  %v3670_v26 = vmax.f32 %v2983_v3, 0.0 }
 0x323   : > { %v1349_v17 = vadd.f32 %v1348_v23, %v1187_v14  ;;  %v1350_v13 = vpop.f32.mrb[18].mxu0 }
 0x324   : > { %v1351_v56 = vadd.f32 %v1350_v13, %v1192_v55  ;;  %v1352_v15 = vpop.f32.mrb[19].mxu0  ;;  %v3199_v31 = vadd.f32 %v1347_v20, %v783_v53 }
 0x325   : > { %v3195_v48 = vadd.f32 %v1349_v17, %v784_v50  ;;  %v1353_v27 = vadd.f32 %v1352_v15, %v1192_v55 }
 0x326   : > { %v3203_v29 = vadd.f32 %v1351_v56, %v785_v49  ;;  %v1457_v44 = vmax.f32 %v3199_v31, 0.0 }
 0x327   : > { %v3207_v8 = vadd.f32 %v1353_v27, %v786_v51  ;;  %v1458_v41 = vmax.f32 %v3195_v48, 0.0 }
 0x328   : > { %v1459_v24 = vmax.f32 %v3203_v29, 0.0 }
 0x329   : > { %v1460_v50 = vmax.f32 %v3207_v8, 0.0  ;;  %v1356_v61 = vpop.f32.mrb[20].mxu0 }
 0x32a   : > { %v1357_v53 = vadd.f32 %v1356_v61, %v1197_v42  ;;  %v1358_v33 = vpop.f32.mrb[21].mxu0  ;;  %v1505_v51 = vpack.c.bf16 %v1459_v24, %v1457_v44  ;;  %v3671_v61 = vmax.f32 %v2999_v18, 0.0  ;;  %v1217_v18 = vpop.permute.xlu0 %1216 }
 0x32b   : > { %v1359_v45 = vadd.f32 %v1358_v33, %v1197_v42  ;;  %v1360_v49 = vpop.f32.mrb[22].mxu0  ;;  %v1506_v47 = vpack.c.bf16 %v1460_v50, %v1458_v41 }
 0x32c   : > { %v1361_v54 = vadd.f32 %v1360_v49, %v1202_v32  ;;  %v1362_v1 = vpop.f32.mrb[23].mxu0  ;;  %v3227_v28 = vadd.f32 %v1357_v53, %v787_v9  ;;  %v3673_v49 = vmax.f32 %v3003_v22, 0.0  ;;  %v1222_v22 = vpop.permute.xlu1 %1221 }
 0x32d   : > { %v3223_v52 = vadd.f32 %v1359_v45, %v788_v7  ;;  %v1363_v37 = vadd.f32 %v1362_v1, %v1202_v32  ;;  %1665 = vmatprep.subr.bf16.mxu1 %v1506_v47  ;;  %v3672_v32 = vmax.f32 %v3001_v21, 0.0 }
 0x32e   : > { %v3231_v14 = vadd.f32 %v1361_v54, %v789_v6  ;;  %1666 = vmatpush1.bf16.msra.mxu1 %v1505_v51  ;;  %v1461_v63 = vmax.f32 %v3227_v28, 0.0  ;;  %v3674_v51 = vmax.f32 %v3005_v25, 0.0 }
 0x32f   : > { %v3235_v20 = vadd.f32 %v1363_v37, %v3670_v26  ;;  %v1462_v7 = vmax.f32 %v3223_v52, 0.0 }
 0x330   : > { %v1463_v23 = vmax.f32 %v3231_v14, 0.0 }
 0x331   : > { %v3663_v55 = vmax.f32 %v3235_v20, 0.0  ;;  %v1366_v17 = vpop.f32.mrb[24].mxu0 }
 0x332   : > { %v1367_v9 = vadd.f32 %v1366_v17, %v1207_v60  ;;  %v1368_v13 = vpop.f32.mrb[25].mxu0  ;;  %v1507_v15 = vpack.c.bf16 %v1463_v23, %v1461_v63 }
 0x333   : > { %v1369_v6 = vadd.f32 %v1368_v13, %v1207_v60  ;;  %v1370_v56 = vpop.f32.mrb[26].mxu0  ;;  %v1508_v3 = vpack.c.bf16 %v3663_v55, %v1462_v7 }
 0x334   : > { %v1371_v27 = vadd.f32 %v1370_v56, %v1212_v0  ;;  %v1372_v42 = vpop.f32.mrb[27].mxu0  ;;  %v3255_v45 = vadd.f32 %v1367_v9, %v3672_v32  ;;  %v3677_v32 = vmax.f32 %v3030_v59, 0.0  ;;  %v1232_v59 = vpop.permute.xlu1 %1231 }
 0x335   : > { %v3251_v53 = vadd.f32 %v1369_v6, %v3671_v61  ;;  %v1373_v33 = vadd.f32 %v1372_v42, %v1212_v0  ;;  %1667 = vmatprep.subr.bf16.mxu1 %v1508_v3  ;;  %v3676_v61 = vmax.f32 %v3027_v57, 0.0 }
 0x336   : > { %v3259_v47 = vadd.f32 %v1371_v27, %v3673_v49  ;;  %1668 = vmatpush1.bf16.msra.mxu1 %v1507_v15  ;;  %v3662_v21 = vmax.f32 %v3255_v45, 0.0  ;;  %v3675_v15 = vmax.f32 %v3025_v46, 0.0  ;;  %v1227_v46 = vpop.permute.xlu0 %1226  ;;  %v3696_v14 = vmax.f32 %v3255_v45, 0.0 }
 0x337   : > { %v3263_v54 = vadd.f32 %v1373_v33, %v3674_v51  ;;  %v3661_v37 = vmax.f32 %v3251_v53, 0.0  ;;  %v3678_v51 = vmax.f32 %v3036_v2, 0.0 }
 0x338   : > { %v3660_v1 = vmax.f32 %v3259_v47, 0.0 }
 0x339   : > { %v3659_v26 = vmax.f32 %v3263_v54, 0.0  ;;  %v1376_v60 = vpop.f32.mrb[28].mxu0 }
 0x33a   : > { %v1377_v17 = vadd.f32 %v1376_v60, %v1217_v18  ;;  %v1378_v9 = vpop.f32.mrb[29].mxu0  ;;  %v1509_v6 = vpack.c.bf16 %v3660_v1, %v3662_v21 }
 0x33b   : > { %v1379_v13 = vadd.f32 %v1378_v9, %v1217_v18  ;;  %v1380_v0 = vpop.f32.mrb[30].mxu0  ;;  %v1510_v25 = vpack.c.bf16 %v3659_v26, %v3661_v37 }
 0x33c   : > { %v1381_v56 = vadd.f32 %v1380_v0, %v1222_v22  ;;  %v1382_v3 = vpop.f32.mrb[31].mxu0  ;;  %v3283_v33 = vadd.f32 %v1377_v17, %v3676_v61 }
 0x33d   : > { %v3279_v27 = vadd.f32 %v1379_v13, %v3675_v15  ;;  %v1383_v42 = vadd.f32 %v1382_v3, %v1222_v22  ;;  %1669 = vmatprep.subr.bf16.mxu1 %v1510_v25 }
 0x33e   : > { %v3287_v49 = vadd.f32 %v1381_v56, %v3677_v32  ;;  %1670 = vmatpush1.bf16.msra.mxu1 %v1509_v6  ;;  %v3658_v57 = vmax.f32 %v3283_v33, 0.0 }
 0x33f   : > { %v3291_v18 = vadd.f32 %v1383_v42, %v3678_v51  ;;  %v3641_v9 = vmax.f32 %v3279_v27, 0.0  ;;  %v3679_v42 = vmax.f32 %v3017_v35, 0.0  ;;  %v3680_v51 = vmax.f32 %v3033_v62, 0.0  ;;  %v1237_v35 = vpop.permute.xlu0 %1236 }
 0x340   : > { %v3640_v60 = vmax.f32 %v3287_v49, 0.0 }
 0x341   : > { %v3639_v22 = vmax.f32 %v3291_v18, 0.0  ;;  %v1386_v13 = vpop.f32.mrb[32].mxu0 }
 0x342   : > { %v1387_v17 = vadd.f32 %v1386_v13, %v1227_v46  ;;  %v1388_v0 = vpop.f32.mrb[33].mxu0  ;;  %v1511_v6 = vpack.c.bf16 %v3640_v60, %v3658_v57  ;;  %v3681_v13 = vmax.f32 %v3040_v12, 0.0  ;;  %v1242_v12 = vpop.permute.xlu1 %1241 }
 0x343   : > { %v1389_v25 = vadd.f32 %v1388_v0, %v1227_v46  ;;  %v1390_v56 = vpop.f32.mrb[34].mxu0  ;;  %v1512_v2 = vpack.c.bf16 %v3639_v22, %v3641_v9  ;;  %v3682_v22 = vmax.f32 %v3019_v36, 0.0  ;;  %v3685_v9 = vmax.f32 %v3061_v34, 0.0 }
 0x344   : > { %v1391_v3 = vadd.f32 %v1390_v56, %v1232_v59  ;;  %v1392_v15 = vpop.f32.mrb[35].mxu0  ;;  %v3311_v46 = vadd.f32 %v1387_v17, %v3680_v51  ;;  %v3683_v51 = vmax.f32 %v3044_v16, 0.0  ;;  %v1247_v16 = vpop.permute.xlu0 %1246 }
 0x345   : > { %v3307_v61 = vadd.f32 %v1389_v25, %v3679_v42  ;;  %v1393_v32 = vadd.f32 %v1392_v15, %v1232_v59  ;;  %1671 = vmatprep.subr.bf16.mxu1 %v1512_v2 }
 0x346   : > { %v3315_v0 = vadd.f32 %v1391_v3, %v3681_v13  ;;  %1672 = vmatpush1.bf16.msra.mxu1 %v1511_v6  ;;  %v3645_v62 = vmax.f32 %v3311_v46, 0.0  ;;  %v1252_v34 = vpop.permute.xlu1 %1251 }
 0x347   : > { %v3319_v60 = vadd.f32 %v1393_v32, %v3682_v22  ;;  %v3643_v25 = vmax.f32 %v3307_v61, 0.0 }
 0x348   : > { %v3644_v56 = vmax.f32 %v3315_v0, 0.0 }
 0x349   : > { %v3642_v59 = vmax.f32 %v3319_v60, 0.0  ;;  %v1396_v2 = vpop.f32.mrb[36].mxu0 }
 0x34a   : > { %v1397_v17 = vadd.f32 %v1396_v2, %v1237_v35  ;;  %v1398_v15 = vpop.f32.mrb[37].mxu0  ;;  %v1513_v22 = vpack.c.bf16 %v3644_v56, %v3645_v62  ;;  %v3689_v62 = vmax.f32 %v3083_v11, 0.0  ;;  %v1262_v11 = vpop.permute.xlu1 %1261 }
 0x34b   : > { %v1399_v3 = vadd.f32 %v1398_v15, %v1237_v35  ;;  %v1400_v42 = vpop.f32.mrb[38].mxu0  ;;  %v1514_v36 = vpack.c.bf16 %v3642_v59, %v3643_v25  ;;  %v3684_v35 = vmax.f32 %v3058_v5, 0.0  ;;  %v3686_v25 = vmax.f32 %v3046_v19, 0.0 }
 0x34c   : > { %v1401_v6 = vadd.f32 %v1400_v42, %v1242_v12  ;;  %v1402_v32 = vpop.f32.mrb[39].mxu0 }
 0x34d   : > { %v3335_v13 = vadd.f32 %v1399_v3, %v3683_v51  ;;  %v1403_v2 = vadd.f32 %v1402_v32, %v1242_v12  ;;  %1673 = vmatprep.subr.bf16.mxu1 %v1514_v36  ;;  %v3339_v15 = vadd.f32 %v1397_v17, %v3684_v35 }
 0x34e   : > { %v3343_v59 = vadd.f32 %v1401_v6, %v3685_v9  ;;  %1674 = vmatpush1.bf16.msra.mxu1 %v1513_v22 }
 0x34f   : > { %v3347_v56 = vadd.f32 %v1403_v2, %v3686_v25  ;;  %v3647_v3 = vmax.f32 %v3335_v13, 0.0  ;;  %v3649_v5 = vmax.f32 %v3339_v15, 0.0  ;;  %v3687_v2 = vmax.f32 %v3075_v58, 0.0  ;;  %v1257_v58 = vpop.permute.xlu0 %1256 }
 0x350   : > { %v3648_v42 = vmax.f32 %v3343_v59, 0.0 }
 0x351   : > { %v3646_v12 = vmax.f32 %v3347_v56, 0.0  ;;  %v1406_v36 = vpop.f32.mrb[40].mxu0 }
 0x352   : > { %v1407_v17 = vadd.f32 %v1406_v36, %v1247_v16  ;;  %v1408_v32 = vpop.f32.mrb[41].mxu0  ;;  %v1515_v25 = vpack.c.bf16 %v3648_v42, %v3649_v5  ;;  %v3693_v5 = vmax.f32 %v3103_v40, 0.0 }
 0x353   : > { %v1409_v9 = vadd.f32 %v1408_v32, %v1247_v16  ;;  %v1410_v6 = vpop.f32.mrb[42].mxu0  ;;  %v1516_v19 = vpack.c.bf16 %v3646_v12, %v3647_v3  ;;  %v3688_v16 = vmax.f32 %v3093_v39, 0.0  ;;  %v3690_v3 = vmax.f32 %v3073_v38, 0.0 }
 0x354   : > { %v1411_v22 = vadd.f32 %v1410_v6, %v1252_v34  ;;  %v1412_v51 = vpop.f32.mrb[43].mxu0 }
 0x355   : > { %v3363_v35 = vadd.f32 %v1409_v9, %v3687_v2  ;;  %v1413_v36 = vadd.f32 %v1412_v51, %v1252_v34  ;;  %1675 = vmatprep.subr.bf16.mxu1 %v1516_v19  ;;  %v3367_v32 = vadd.f32 %v1407_v17, %v3688_v16 }
 0x356   : > { %v3371_v12 = vadd.f32 %v1411_v22, %v3689_v62  ;;  %1676 = vmatpush1.bf16.msra.mxu1 %v1515_v25 }
 0x357   : > { %v3375_v42 = vadd.f32 %v1413_v36, %v3690_v3  ;;  %v3651_v9 = vmax.f32 %v3363_v35, 0.0  ;;  %v3657_v39 = vmax.f32 %v3367_v32, 0.0  ;;  %v3691_v36 = vmax.f32 %v3096_v30, 0.0 }
 0x358   : > { %v3652_v6 = vmax.f32 %v3371_v12, 0.0 }
 0x359   : > { %v3650_v34 = vmax.f32 %v3375_v42, 0.0  ;;  %v1416_v19 = vpop.f32.mrb[44].mxu0 }
 0x35a   : > { %v1417_v17 = vadd.f32 %v1416_v19, %v1257_v58  ;;  %v1418_v51 = vpop.f32.mrb[45].mxu0  ;;  %v1517_v3 = vpack.c.bf16 %v3652_v6, %v3657_v39 }
 0x35b   : > { %v1419_v62 = vadd.f32 %v1418_v51, %v1257_v58  ;;  %v1420_v22 = vpop.f32.mrb[46].mxu0  ;;  %v1518_v38 = vpack.c.bf16 %v3650_v34, %v3651_v9  ;;  %v3692_v58 = vmax.f32 %v3112_v10, 0.0  ;;  %v3694_v9 = vmax.f32 %v3090_v43, 0.0  ;;  %v2446_v10 = vld [vmem:[%s3605_s7] sm:$0xff]  }
 0x35c   : > { %v1421_v25 = vadd.f32 %v1420_v22, %v1262_v11  ;;  %v1422_v2 = vpop.f32.mrb[47].mxu0 }
 0x35d   : > { %v3391_v16 = vadd.f32 %v1419_v62, %v3691_v36  ;;  %v1423_v19 = vadd.f32 %v1422_v2, %v1262_v11  ;;  %1677 = vmatprep.subr.bf16.mxu1 %v1518_v38  ;;  %v3395_v51 = vadd.f32 %v1417_v17, %v3692_v58  ;;  %v2449_v17 = vld [vmem:[%s3605_s7 + $0x18] sm:$0xff]   ;;  %v2450_v38 = vld [vmem:[%s3605_s7 + $0x20] sm:$0xff]   ;;  %v1540_v36 = vpop.permute.xlu0 %1539 }
 0x35e   : > { %v3399_v34 = vadd.f32 %v1421_v25, %v3693_v5  ;;  %1678 = vmatpush1.bf16.msra.mxu1 %v1517_v3  ;;  %v2447_v5 = vld [vmem:[%s3605_s7 + $0x8] sm:$0xff]   ;;  %v2452_v25 = vld [vmem:[%s3605_s7 + $0x30] sm:$0xff]   ;;  %v2453_v2 = vld [vmem:[%s3605_s7 + $0x38] sm:$0xff]  }
 0x35f   : > { %v3403_v6 = vadd.f32 %v1423_v19, %v3694_v9  ;;  %v3655_v30 = vmax.f32 %v3391_v16, 0.0  ;;  %v3656_v62 = vmax.f32 %v3395_v51, 0.0  ;;  %v2448_v9 = vld [vmem:[%s3605_s7 + $0x10] sm:$0xff]   ;;  %v2451_v3 = vld [vmem:[%s3605_s7 + $0x28] sm:$0xff]  }
 0x360   : > { %v3654_v22 = vmax.f32 %v3399_v34, 0.0 }
 0x361   : > { %v3653_v11 = vmax.f32 %v3403_v6, 0.0 }
 0x362   : > { %v1519_v43 = vpack.c.bf16 %v3654_v22, %v3656_v62  ;;  %v1550_v62 = vpop.permute.xlu0 %1549 }
 0x363   : > { %v1520_v40 = vpack.c.bf16 %v3653_v11, %v3655_v30 }
 0x365   : > { %1679 = vmatprep.subr.bf16.mxu1 %v1520_v40 }
 0x366   : > { %1680 = vmatpush1.bf16.msra.mxu1 %v1519_v43  ;;  %v1545_v43 = vpop.permute.xlu1 %1544 }
 0x369   : > { %1698 = vmatmul.mubr.bf16.vlgmr.msra.gmra.mrb[48].mxu1 %v2446_v10 }
 0x36a   : > { %1707 = vmatprep.mubr.bf16.mxu1 %v2526_v4  ;;  %v1555_v1 = vpop.permute.xlu1 %1554 }
 0x371   : > { %1708 = vmatmul.mubr.bf16.gmra.mrb[52].mxu1 %v2447_v5 }
 0x372   : > { %1717 = vmatprep.mubr.bf16.mxu1 %v2526_v4 }
 0x379   : > { %1718 = vmatmul.mubr.bf16.gmra.mrb[56].mxu1 %v2448_v9 }
 0x37a   : > { %1727 = vmatprep.mubr.bf16.mxu1 %v2526_v4 }
 0x381   : > { %1728 = vmatmul.mubr.bf16.gmra.mrb[60].mxu1 %v2449_v17 }
 0x382   : > { %1737 = vmatprep.mubr.bf16.mxu1 %v2526_v4 }
 0x389   : > { %1738 = vmatmul.mubr.bf16.gmra.mrb[64].mxu1 %v2450_v38 }
 0x38a   : > { %1747 = vmatprep.mubr.bf16.mxu1 %v2526_v4 }
 0x391   : > { %1748 = vmatmul.mubr.bf16.gmra.mrb[68].mxu1 %v2451_v3 }
 0x392   : > { %1757 = vmatprep.mubr.bf16.mxu1 %v2526_v4 }
 0x399   : > { %1758 = vmatmul.mubr.bf16.gmra.mrb[72].mxu1 %v2452_v25 }
 0x39a   : > { %1767 = vmatprep.mubr.bf16.mxu1 %v2526_v4 }
 0x3a1   : > { %1768 = vmatmul.mubr.bf16.gmra.mrb[76].mxu1 %v2453_v2 }
 0x3a2   : > { %2218 = vmatprep.mubr.bf16.mxu1 %v2526_v4 }
 0x43c   : > { %v1699_v19 = vpop.f32.mrb[48].mxu1 }
 0x43d   : > { %v1700_v58 = vadd.f32 %v1699_v19, %v1540_v36  ;;  %v1701_v40 = vpop.f32.mrb[49].mxu1 }
 0x43e   : > { %v1702_v10 = vadd.f32 %v1701_v40, %v1540_v36  ;;  %v1703_v5 = vpop.f32.mrb[50].mxu1 }
 0x43f   : > { %v1704_v9 = vadd.f32 %v1703_v5, %v1545_v43  ;;  %v1705_v17 = vpop.f32.mrb[51].mxu1  ;;  %v1778_v3 = vmax.f32 %v1700_v58, 0.0 }
 0x440   : > { %v1706_v38 = vadd.f32 %v1705_v17, %v1545_v43  ;;  %v1779_v11 = vmax.f32 %v1702_v10, 0.0  ;;  %v1560_v17 = vpop.permute.xlu0 %1559 }
 0x441   : > { %v1780_v25 = vmax.f32 %v1704_v9, 0.0 }
 0x442   : > { %v1781_v22 = vmax.f32 %v1706_v38, 0.0 }
 0x443   : > { %v1826_v30 = vpack.c.bf16 %v1780_v25, %v1778_v3  ;;  %v1565_v25 = vpop.permute.xlu1 %1564 }
 0x444   : > { %v1827_v39 = vpack.c.bf16 %v1781_v22, %v1779_v11  ;;  %v1709_v2 = vpop.f32.mrb[52].mxu1 }
 0x445   : > { %v1710_v57 = vadd.f32 %v1709_v2, %v1550_v62  ;;  %v1711_v26 = vpop.f32.mrb[53].mxu1 }
 0x446   : > { %v1712_v37 = vadd.f32 %v1711_v26, %v1550_v62  ;;  %v1713_v19 = vpop.f32.mrb[54].mxu1  ;;  %1986 = vmatprep.subr.bf16.mxu0 %v1827_v39 }
 0x447   : > { %v1714_v21 = vadd.f32 %v1713_v19, %v1555_v1  ;;  %v1715_v36 = vpop.f32.mrb[55].mxu1  ;;  %1987 = vmatpush1.bf16.msra.mxu0 %v1826_v30  ;;  %v1782_v5 = vmax.f32 %v1710_v57, 0.0  ;;  %v1570_v19 = vpop.permute.xlu0 %1569 }
 0x448   : > { %v1716_v40 = vadd.f32 %v1715_v36, %v1555_v1  ;;  %v1783_v58 = vmax.f32 %v1712_v37, 0.0 }
 0x449   : > { %v1784_v43 = vmax.f32 %v1714_v21, 0.0 }
 0x44a   : > { %v1785_v9 = vmax.f32 %v1716_v40, 0.0 }
 0x44b   : > { %v1828_v10 = vpack.c.bf16 %v1784_v43, %v1782_v5 }
 0x44c   : > { %v1829_v38 = vpack.c.bf16 %v1785_v9, %v1783_v58  ;;  %v1719_v3 = vpop.f32.mrb[56].mxu1  ;;  %v1575_v58 = vpop.permute.xlu1 %1574 }
 0x44d   : > { %v1720_v22 = vadd.f32 %v1719_v3, %v1560_v17  ;;  %v1721_v11 = vpop.f32.mrb[57].mxu1 }
 0x44e   : > { %v1722_v2 = vadd.f32 %v1721_v11, %v1560_v17  ;;  %v1723_v55 = vpop.f32.mrb[58].mxu1  ;;  %1988 = vmatprep.subr.bf16.mxu0 %v1829_v38 }
 0x44f   : > { %v1724_v26 = vadd.f32 %v1723_v55, %v1565_v25  ;;  %v1725_v39 = vpop.f32.mrb[59].mxu1  ;;  %1989 = vmatpush1.bf16.msra.mxu0 %v1828_v10  ;;  %v1786_v30 = vmax.f32 %v1720_v22, 0.0 }
 0x450   : > { %v1726_v62 = vadd.f32 %v1725_v39, %v1565_v25  ;;  %v1787_v57 = vmax.f32 %v1722_v2, 0.0 }
 0x451   : > { %v1788_v1 = vmax.f32 %v1724_v26, 0.0  ;;  %v1580_v26 = vpop.permute.xlu0 %1579 }
 0x452   : > { %v1789_v21 = vmax.f32 %v1726_v62, 0.0 }
 0x453   : > { %v1830_v37 = vpack.c.bf16 %v1788_v1, %v1786_v30 }
 0x454   : > { %v1831_v36 = vpack.c.bf16 %v1789_v21, %v1787_v57  ;;  %v1729_v40 = vpop.f32.mrb[60].mxu1  ;;  %v1585_v57 = vpop.permute.xlu1 %1584 }
 0x455   : > { %v1730_v5 = vadd.f32 %v1729_v40, %v1570_v19  ;;  %v1731_v43 = vpop.f32.mrb[61].mxu1 }
 0x456   : > { %v1732_v9 = vadd.f32 %v1731_v43, %v1570_v19  ;;  %v1733_v3 = vpop.f32.mrb[62].mxu1  ;;  %1990 = vmatprep.subr.bf16.mxu0 %v1831_v36 }
 0x457   : > { %v1734_v17 = vadd.f32 %v1733_v3, %v1575_v58  ;;  %v1735_v38 = vpop.f32.mrb[63].mxu1  ;;  %1991 = vmatpush1.bf16.msra.mxu0 %v1830_v37  ;;  %v1790_v10 = vmax.f32 %v1730_v5, 0.0 }
 0x458   : > { %v1736_v55 = vadd.f32 %v1735_v38, %v1575_v58  ;;  %v1791_v22 = vmax.f32 %v1732_v9, 0.0 }
 0x459   : > { %v1792_v11 = vmax.f32 %v1734_v17, 0.0  ;;  %v1590_v17 = vpop.permute.xlu0 %1589 }
 0x45a   : > { %v1793_v25 = vmax.f32 %v1736_v55, 0.0 }
 0x45b   : > { %v1832_v2 = vpack.c.bf16 %v1792_v11, %v1790_v10 }
 0x45c   : > { %v1833_v39 = vpack.c.bf16 %v1793_v25, %v1791_v22  ;;  %v1739_v62 = vpop.f32.mrb[64].mxu1  ;;  %v1595_v22 = vpop.permute.xlu1 %1594 }
 0x45d   : > { %v1740_v30 = vadd.f32 %v1739_v62, %v1580_v26  ;;  %v1741_v1 = vpop.f32.mrb[65].mxu1 }
 0x45e   : > { %v1742_v21 = vadd.f32 %v1741_v1, %v1580_v26  ;;  %v1743_v40 = vpop.f32.mrb[66].mxu1  ;;  %1992 = vmatprep.subr.bf16.mxu0 %v1833_v39 }
 0x45f   : > { %v1744_v19 = vadd.f32 %v1743_v40, %v1585_v57  ;;  %v1745_v36 = vpop.f32.mrb[67].mxu1  ;;  %1993 = vmatpush1.bf16.msra.mxu0 %v1832_v2  ;;  %v1794_v37 = vmax.f32 %v1740_v30, 0.0 }
 0x460   : > { %v1746_v43 = vadd.f32 %v1745_v36, %v1585_v57  ;;  %v1795_v5 = vmax.f32 %v1742_v21, 0.0 }
 0x461   : > { %v1796_v58 = vmax.f32 %v1744_v19, 0.0  ;;  %v1600_v19 = vpop.permute.xlu0 %1599 }
 0x462   : > { %v1797_v3 = vmax.f32 %v1746_v43, 0.0 }
 0x463   : > { %v1834_v9 = vpack.c.bf16 %v1796_v58, %v1794_v37 }
 0x464   : > { %v1835_v38 = vpack.c.bf16 %v1797_v3, %v1795_v5  ;;  %v1749_v55 = vpop.f32.mrb[68].mxu1  ;;  %v1605_v5 = vpop.permute.xlu1 %1604 }
 0x465   : > { %v1750_v10 = vadd.f32 %v1749_v55, %v1590_v17  ;;  %v1751_v11 = vpop.f32.mrb[69].mxu1 }
 0x466   : > { %v1752_v25 = vadd.f32 %v1751_v11, %v1590_v17  ;;  %v1753_v62 = vpop.f32.mrb[70].mxu1  ;;  %1994 = vmatprep.subr.bf16.mxu0 %v1835_v38 }
 0x467   : > { %v1754_v26 = vadd.f32 %v1753_v62, %v1595_v22  ;;  %v1755_v39 = vpop.f32.mrb[71].mxu1  ;;  %1995 = vmatpush1.bf16.msra.mxu0 %v1834_v9  ;;  %v1798_v2 = vmax.f32 %v1750_v10, 0.0 }
 0x468   : > { %v1756_v1 = vadd.f32 %v1755_v39, %v1595_v22  ;;  %v1799_v30 = vmax.f32 %v1752_v25, 0.0 }
 0x469   : > { %v1800_v57 = vmax.f32 %v1754_v26, 0.0  ;;  %v1610_v26 = vpop.permute.xlu0 %1609 }
 0x46a   : > { %v1801_v40 = vmax.f32 %v1756_v1, 0.0 }
 0x46b   : > { %v1836_v21 = vpack.c.bf16 %v1800_v57, %v1798_v2 }
 0x46c   : > { %v1837_v36 = vpack.c.bf16 %v1801_v40, %v1799_v30  ;;  %v1759_v43 = vpop.f32.mrb[72].mxu1  ;;  %v1615_v30 = vpop.permute.xlu1 %1614 }
 0x46d   : > { %v1760_v37 = vadd.f32 %v1759_v43, %v1600_v19  ;;  %v1761_v58 = vpop.f32.mrb[73].mxu1 }
 0x46e   : > { %v1762_v3 = vadd.f32 %v1761_v58, %v1600_v19  ;;  %v1763_v55 = vpop.f32.mrb[74].mxu1  ;;  %1996 = vmatprep.subr.bf16.mxu0 %v1837_v36 }
 0x46f   : > { %v1764_v17 = vadd.f32 %v1763_v55, %v1605_v5  ;;  %v1765_v38 = vpop.f32.mrb[75].mxu1  ;;  %1997 = vmatpush1.bf16.msra.mxu0 %v1836_v21  ;;  %v1802_v9 = vmax.f32 %v1760_v37, 0.0 }
 0x470   : > { %v1766_v11 = vadd.f32 %v1765_v38, %v1605_v5  ;;  %v1803_v10 = vmax.f32 %v1762_v3, 0.0  ;;  %v2454_v38 = vld [vmem:[%s3607_s9] sm:$0xff]  }
 0x471   : > { %v1804_v22 = vmax.f32 %v1764_v17, 0.0 }
 0x472   : > { %v1805_v62 = vmax.f32 %v1766_v11, 0.0  ;;  %v2455_v11 = vld [vmem:[%s3607_s9 + $0x8] sm:$0xff]  }
 0x473   : > { %v1838_v25 = vpack.c.bf16 %v1804_v22, %v1802_v9  ;;  %v2456_v9 = vld [vmem:[%s3607_s9 + $0x10] sm:$0xff]   ;;  %v2457_v22 = vld [vmem:[%s3607_s9 + $0x18] sm:$0xff]  }
 0x474   : > { %v1839_v39 = vpack.c.bf16 %v1805_v62, %v1803_v10  ;;  %v1769_v1 = vpop.f32.mrb[76].mxu1  ;;  %v2458_v10 = vld [vmem:[%s3607_s9 + $0x20] sm:$0xff]   ;;  %v2459_v62 = vld [vmem:[%s3607_s9 + $0x28] sm:$0xff]  }
 0x475   : > { %v1770_v2 = vadd.f32 %v1769_v1, %v1610_v26  ;;  %v1771_v57 = vpop.f32.mrb[77].mxu1 }
 0x476   : > { %v1772_v40 = vadd.f32 %v1771_v57, %v1610_v26  ;;  %v1773_v43 = vpop.f32.mrb[78].mxu1  ;;  %1998 = vmatprep.subr.bf16.mxu0 %v1839_v39  ;;  %v2461_v26 = vld [vmem:[%s3607_s9 + $0x38] sm:$0xff]   ;;  %v1861_v39 = vpop.permute.xlu0 %1860 }
 0x477   : > { %v1774_v19 = vadd.f32 %v1773_v43, %v1615_v30  ;;  %v1775_v36 = vpop.f32.mrb[79].mxu1  ;;  %1999 = vmatpush1.bf16.msra.mxu0 %v1838_v25  ;;  %v1806_v21 = vmax.f32 %v1770_v2, 0.0  ;;  %v2460_v25 = vld [vmem:[%s3607_s9 + $0x30] sm:$0xff]  }
 0x478   : > { %v1776_v58 = vadd.f32 %v1775_v36, %v1615_v30  ;;  %v1807_v37 = vmax.f32 %v1772_v40, 0.0  ;;  %v1866_v30 = vpop.permute.xlu1 %1865 }
 0x479   : > { %v1808_v5 = vmax.f32 %v1774_v19, 0.0 }
 0x47a   : > { %v1809_v55 = vmax.f32 %v1776_v58, 0.0 }
 0x47b   : > { %v1840_v3 = vpack.c.bf16 %v1808_v5, %v1806_v21 }
 0x47c   : > { %v1841_v17 = vpack.c.bf16 %v1809_v55, %v1807_v37 }
 0x47e   : > { %2000 = vmatprep.subr.bf16.mxu0 %v1841_v17  ;;  %v1871_v17 = vpop.permute.xlu0 %1870 }
 0x47f   : > { %2001 = vmatpush1.bf16.msra.mxu0 %v1840_v3 }
 0x482   : > { %2019 = vmatmul.mubr.bf16.vlgmr.msra.gmra.mrb[48].mxu0 %v2454_v38 }
 0x483   : > { %2028 = vmatprep.mubr.bf16.mxu0 %v2526_v4 }
 0x48a   : > { %2029 = vmatmul.mubr.bf16.gmra.mrb[52].mxu0 %v2455_v11 }
 0x48b   : > { %2038 = vmatprep.mubr.bf16.mxu0 %v2526_v4 }
 0x492   : > { %2039 = vmatmul.mubr.bf16.gmra.mrb[56].mxu0 %v2456_v9 }
 0x493   : > { %2048 = vmatprep.mubr.bf16.mxu0 %v2526_v4 }
 0x49a   : > { %2049 = vmatmul.mubr.bf16.gmra.mrb[60].mxu0 %v2457_v22 }
 0x49b   : > { %2058 = vmatprep.mubr.bf16.mxu0 %v2526_v4 }
 0x4a2   : > { %2059 = vmatmul.mubr.bf16.gmra.mrb[64].mxu0 %v2458_v10  ;;  %v1876_v10 = vpop.permute.xlu1 %1875 }
 0x4a3   : > { %2068 = vmatprep.mubr.bf16.mxu0 %v2526_v4 }
 0x4a6   : > { %v1886_v52 = vpop.permute.xlu1 %1885 }
 0x4aa   : > { %2069 = vmatmul.mubr.bf16.gmra.mrb[68].mxu0 %v2459_v62 }
 0x4ab   : > { %2078 = vmatprep.mubr.bf16.mxu0 %v2526_v4 }
 0x4b2   : > { %2079 = vmatmul.mubr.bf16.gmra.mrb[72].mxu0 %v2460_v25 }
 0x4b3   : > { %2088 = vmatprep.mubr.bf16.mxu0 %v2526_v4 }
 0x4ba   : > { %2089 = vmatmul.mubr.bf16.gmra.mrb[76].mxu0 %v2461_v26 }
 0x555   : > { %v2020_v1 = vpop.f32.mrb[48].mxu0 }
 0x556   : > { %v2021_v2 = vadd.f32 %v2020_v1, %v1861_v39  ;;  %v2022_v57 = vpop.f32.mrb[49].mxu0 }
 0x557   : > { %v2023_v40 = vadd.f32 %v2022_v57, %v1861_v39  ;;  %v2024_v43 = vpop.f32.mrb[50].mxu0  ;;  %v3695_v39 = vmax.f32 %v3235_v20, 0.0  ;;  %v3697_v20 = vmax.f32 %v3251_v53, 0.0  ;;  %v1896_v53 = vpop.permute.xlu1 %1895 }
 0x558   : > { %v2099_v19 = vadd.f32 %v2021_v2, %v1457_v44  ;;  %v2025_v36 = vadd.f32 %v2024_v43, %v1866_v30  ;;  %v2026_v58 = vpop.f32.mrb[51].mxu0 }
 0x559   : > { %v2100_v4 = vadd.f32 %v2023_v40, %v1458_v41  ;;  %v2027_v21 = vadd.f32 %v2026_v58, %v1866_v30  ;;  %v1881_v30 = vpop.permute.xlu0 %1880 }
 0x55a   : > { %v2101_v5 = vadd.f32 %v2025_v36, %v1459_v24  ;;  %v2131_v55 = vmax.f32 %v2099_v19, 0.0 }
 0x55b   : > { %v2102_v37 = vadd.f32 %v2027_v21, %v1460_v50  ;;  %v2132_v38 = vmax.f32 %v2100_v4, 0.0 }
 0x55c   : > { %v2133_v3 = vmax.f32 %v2101_v5, 0.0 }
 0x55d   : > { %v2134_v11 = vmax.f32 %v2102_v37, 0.0  ;;  %v2030_v9 = vpop.f32.mrb[52].mxu0 }
 0x55e   : > { %v2164_v31 = vpack.c.bf16 %v2133_v3, %v2131_v55  ;;  %v2031_v44 = vadd.f32 %v2030_v9, %v1871_v17  ;;  %v2032_v22 = vpop.f32.mrb[53].mxu0  ;;  %v3698_v3 = vmax.f32 %v3259_v47, 0.0  ;;  %v3700_v47 = vmax.f32 %v3283_v33, 0.0 }
 0x55f   : > { %v2033_v62 = vadd.f32 %v2032_v22, %v1871_v17  ;;  %v2034_v48 = vpop.f32.mrb[54].mxu0  ;;  %v2165_v41 = vpack.c.bf16 %v2134_v11, %v2132_v38  ;;  %v3699_v38 = vmax.f32 %v3263_v54, 0.0  ;;  %v3701_v54 = vmax.f32 %v3279_v27, 0.0  ;;  %v1906_v27 = vpop.permute.xlu1 %1905 }
 0x560   : > { %v2103_v29 = vadd.f32 %v2031_v44, %v1461_v63  ;;  %v2035_v24 = vadd.f32 %v2034_v48, %v1876_v10  ;;  %v2036_v25 = vpop.f32.mrb[55].mxu0  ;;  %v1891_v44 = vpop.permute.xlu0 %1890 }
 0x561   : > { %v2104_v8 = vadd.f32 %v2033_v62, %v1462_v7  ;;  %v2037_v50 = vadd.f32 %v2036_v25, %v1876_v10  ;;  %2186 = vmatprep.subr.bf16.mxu1 %v2165_v41 }
 0x562   : > { %v2105_v26 = vadd.f32 %v2035_v24, %v1463_v23  ;;  %2187 = vmatpush1.bf16.msra.mxu1 %v2164_v31  ;;  %v2135_v2 = vmax.f32 %v2103_v29, 0.0 }
 0x563   : > { %v2106_v1 = vadd.f32 %v2037_v50, %v3695_v39  ;;  %v2136_v40 = vmax.f32 %v2104_v8, 0.0 }
 0x564   : > { %v2137_v57 = vmax.f32 %v2105_v26, 0.0 }
 0x565   : > { %v2138_v28 = vmax.f32 %v2106_v1, 0.0  ;;  %v2040_v63 = vpop.f32.mrb[56].mxu0 }
 0x566   : > { %v2166_v43 = vpack.c.bf16 %v2137_v57, %v2135_v2  ;;  %v2041_v19 = vadd.f32 %v2040_v63, %v1881_v30  ;;  %v2042_v36 = vpop.f32.mrb[57].mxu0  ;;  %v3702_v2 = vmax.f32 %v3287_v49, 0.0  ;;  %v3704_v49 = vmax.f32 %v3311_v46, 0.0 }
 0x567   : > { %v2043_v7 = vadd.f32 %v2042_v36, %v1881_v30  ;;  %v2044_v58 = vpop.f32.mrb[58].mxu0  ;;  %v2167_v4 = vpack.c.bf16 %v2138_v28, %v2136_v40  ;;  %v3703_v30 = vmax.f32 %v3291_v18, 0.0  ;;  %v3705_v18 = vmax.f32 %v3307_v61, 0.0  ;;  %v1916_v61 = vpop.permute.xlu1 %1915 }
 0x568   : > { %v2107_v23 = vadd.f32 %v2041_v19, %v3696_v14  ;;  %v2045_v21 = vadd.f32 %v2044_v58, %v1886_v52  ;;  %v2046_v5 = vpop.f32.mrb[59].mxu0 }
 0x569   : > { %v2108_v37 = vadd.f32 %v2043_v7, %v3697_v20  ;;  %v2047_v55 = vadd.f32 %v2046_v5, %v1886_v52  ;;  %2188 = vmatprep.subr.bf16.mxu1 %v2167_v4 }
 0x56a   : > { %v2109_v17 = vadd.f32 %v2045_v21, %v3698_v3  ;;  %2189 = vmatpush1.bf16.msra.mxu1 %v2166_v43  ;;  %v2139_v9 = vmax.f32 %v2107_v23, 0.0  ;;  %v1901_v43 = vpop.permute.xlu0 %1900  ;;  %v3706_v3 = vmax.f32 %v3315_v0, 0.0  ;;  %v3708_v0 = vmax.f32 %v3339_v15, 0.0 }
 0x56b   : > { %v2110_v11 = vadd.f32 %v2047_v55, %v3699_v38  ;;  %v2140_v22 = vmax.f32 %v2108_v37, 0.0  ;;  %v3707_v38 = vmax.f32 %v3319_v60, 0.0  ;;  %v3709_v60 = vmax.f32 %v3335_v13, 0.0  ;;  %v1926_v13 = vpop.permute.xlu1 %1925 }
 0x56c   : > { %v2141_v31 = vmax.f32 %v2109_v17, 0.0 }
 0x56d   : > { %v2142_v45 = vmax.f32 %v2110_v11, 0.0  ;;  %v2050_v10 = vpop.f32.mrb[60].mxu0 }
 0x56e   : > { %v2168_v62 = vpack.c.bf16 %v2141_v31, %v2139_v9  ;;  %v2051_v48 = vadd.f32 %v2050_v10, %v1891_v44  ;;  %v2052_v41 = vpop.f32.mrb[61].mxu0 }
 0x56f   : > { %v2053_v29 = vadd.f32 %v2052_v41, %v1891_v44  ;;  %v2054_v24 = vpop.f32.mrb[62].mxu0  ;;  %v2169_v25 = vpack.c.bf16 %v2142_v45, %v2140_v22  ;;  %v1911_v44 = vpop.permute.xlu0 %1910 }
 0x570   : > { %v2111_v8 = vadd.f32 %v2051_v48, %v3700_v47  ;;  %v2055_v50 = vadd.f32 %v2054_v24, %v1896_v53  ;;  %v2056_v26 = vpop.f32.mrb[63].mxu0 }
 0x571   : > { %v2112_v39 = vadd.f32 %v2053_v29, %v3701_v54  ;;  %v2057_v1 = vadd.f32 %v2056_v26, %v1896_v53  ;;  %2190 = vmatprep.subr.bf16.mxu1 %v2169_v25  ;;  %v3710_v26 = vmax.f32 %v3343_v59, 0.0  ;;  %v3712_v59 = vmax.f32 %v3367_v32, 0.0 }
 0x572   : > { %v2113_v57 = vadd.f32 %v2055_v50, %v3702_v2  ;;  %2191 = vmatpush1.bf16.msra.mxu1 %v2168_v62  ;;  %v2143_v28 = vmax.f32 %v2111_v8, 0.0 }
 0x573   : > { %v2114_v40 = vadd.f32 %v2057_v1, %v3703_v30  ;;  %v2144_v19 = vmax.f32 %v2112_v39, 0.0  ;;  %v3711_v39 = vmax.f32 %v3347_v56, 0.0  ;;  %v1921_v30 = vpop.permute.xlu0 %1920  ;;  %v3713_v56 = vmax.f32 %v3363_v35, 0.0  ;;  %v1936_v35 = vpop.permute.xlu1 %1935 }
 0x574   : > { %v2145_v63 = vmax.f32 %v2113_v57, 0.0 }
 0x575   : > { %v2146_v33 = vmax.f32 %v2114_v40, 0.0  ;;  %v2060_v36 = vpop.f32.mrb[64].mxu0 }
 0x576   : > { %v2170_v52 = vpack.c.bf16 %v2145_v63, %v2143_v28  ;;  %v2061_v7 = vadd.f32 %v2060_v36, %v1901_v43  ;;  %v2062_v58 = vpop.f32.mrb[65].mxu0 }
 0x577   : > { %v2063_v4 = vadd.f32 %v2062_v58, %v1901_v43  ;;  %v2064_v14 = vpop.f32.mrb[66].mxu0  ;;  %v2171_v23 = vpack.c.bf16 %v2146_v33, %v2144_v19 }
 0x578   : > { %v2115_v21 = vadd.f32 %v2061_v7, %v3704_v49  ;;  %v2065_v5 = vadd.f32 %v2064_v14, %v1906_v27  ;;  %v2066_v20 = vpop.f32.mrb[67].mxu0 }
 0x579   : > { %v2116_v37 = vadd.f32 %v2063_v4, %v3705_v18  ;;  %v2067_v55 = vadd.f32 %v2066_v20, %v1906_v27  ;;  %2192 = vmatprep.subr.bf16.mxu1 %v2171_v23  ;;  %v3714_v23 = vmax.f32 %v3371_v12, 0.0  ;;  %v3716_v12 = vmax.f32 %v3395_v51, 0.0 }
 0x57a   : > { %v2117_v17 = vadd.f32 %v2065_v5, %v3706_v3  ;;  %2193 = vmatpush1.bf16.msra.mxu1 %v2170_v52  ;;  %v2147_v9 = vmax.f32 %v2115_v21, 0.0  ;;  %v3715_v21 = vmax.f32 %v3375_v42, 0.0  ;;  %v3717_v42 = vmax.f32 %v3391_v16, 0.0  ;;  %v2163_v16 = vld [vmem:[%s3609_s11] sm:$0xf] }
 0x57b   : > { %v2118_v11 = vadd.f32 %v2067_v55, %v3707_v38  ;;  %v2148_v22 = vmax.f32 %v2116_v37, 0.0  ;;  %v1931_v37 = vpop.permute.xlu0 %1930 }
 0x57c   : > { %v2149_v31 = vmax.f32 %v2117_v17, 0.0 }
 0x57d   : > { %v2150_v46 = vmax.f32 %v2118_v11, 0.0  ;;  %v2070_v45 = vpop.f32.mrb[68].mxu0 }
 0x57e   : > { %v2172_v10 = vpack.c.bf16 %v2149_v31, %v2147_v9  ;;  %v2071_v62 = vadd.f32 %v2070_v45, %v1911_v44  ;;  %v2072_v48 = vpop.f32.mrb[69].mxu0 }
 0x57f   : > { %v2073_v41 = vadd.f32 %v2072_v48, %v1911_v44  ;;  %v2074_v53 = vpop.f32.mrb[70].mxu0  ;;  %v2173_v29 = vpack.c.bf16 %v2150_v46, %v2148_v22  ;;  %v3718_v48 = vmax.f32 %v3399_v34, 0.0 }
 0x580   : > { %v2119_v24 = vadd.f32 %v2071_v62, %v3708_v0  ;;  %v2075_v25 = vadd.f32 %v2074_v53, %v1916_v61  ;;  %v2076_v47 = vpop.f32.mrb[71].mxu0 }
 0x581   : > { %v2120_v8 = vadd.f32 %v2073_v41, %v3709_v60  ;;  %v2077_v50 = vadd.f32 %v2076_v47, %v1916_v61  ;;  %2194 = vmatprep.subr.bf16.mxu1 %v2173_v29  ;;  %v3719_v41 = vmax.f32 %v3403_v6, 0.0  ;;  %v2184_v6 = vpop.permute.xlu0 %2183 }
 0x582   : > { %v2121_v54 = vadd.f32 %v2075_v25, %v3710_v26  ;;  %2195 = vmatpush1.bf16.msra.mxu1 %v2172_v10  ;;  %v2151_v2 = vmax.f32 %v2119_v24, 0.0 }
 0x583   : > { %v2122_v1 = vadd.f32 %v2077_v50, %v3711_v39  ;;  %v2152_v40 = vmax.f32 %v2120_v8, 0.0 }
 0x584   : > { %v2153_v57 = vmax.f32 %v2121_v54, 0.0 }
 0x585   : > { %v2154_v15 = vmax.f32 %v2122_v1, 0.0  ;;  %v2080_v28 = vpop.f32.mrb[72].mxu0 }
 0x586   : > { %v2174_v63 = vpack.c.bf16 %v2153_v57, %v2151_v2  ;;  %v2081_v43 = vadd.f32 %v2080_v28, %v1921_v30  ;;  %v2082_v19 = vpop.f32.mrb[73].mxu0 }
 0x587   : > { %v2083_v33 = vadd.f32 %v2082_v19, %v1921_v30  ;;  %v2084_v36 = vpop.f32.mrb[74].mxu0  ;;  %v2175_v52 = vpack.c.bf16 %v2154_v15, %v2152_v40 }
 0x588   : > { %v2123_v7 = vadd.f32 %v2081_v43, %v3712_v59  ;;  %v2085_v58 = vadd.f32 %v2084_v36, %v1926_v13  ;;  %v2086_v27 = vpop.f32.mrb[75].mxu0 }
 0x589   : > { %v2124_v4 = vadd.f32 %v2083_v33, %v3713_v56  ;;  %v2087_v14 = vadd.f32 %v2086_v27, %v1926_v13  ;;  %2196 = vmatprep.subr.bf16.mxu1 %v2175_v52 }
 0x58a   : > { %v2125_v49 = vadd.f32 %v2085_v58, %v3714_v23  ;;  %2197 = vmatpush1.bf16.msra.mxu1 %v2174_v63  ;;  %v2155_v20 = vmax.f32 %v2123_v7, 0.0 }
 0x58b   : > { %v2126_v5 = vadd.f32 %v2087_v14, %v3715_v21  ;;  %v2156_v55 = vmax.f32 %v2124_v4, 0.0 }
 0x58c   : > { %v2157_v18 = vmax.f32 %v2125_v49, 0.0 }
 0x58d   : > { %v2158_v32 = vmax.f32 %v2126_v5, 0.0  ;;  %v2090_v3 = vpop.f32.mrb[76].mxu0 }
 0x58e   : > { %v2176_v17 = vpack.c.bf16 %v2157_v18, %v2155_v20  ;;  %v2091_v38 = vadd.f32 %v2090_v3, %v1931_v37  ;;  %v2092_v11 = vpop.f32.mrb[77].mxu0 }
 0x58f   : > { %v2093_v9 = vadd.f32 %v2092_v11, %v1931_v37  ;;  %v2094_v31 = vpop.f32.mrb[78].mxu0  ;;  %v2177_v44 = vpack.c.bf16 %v2158_v32, %v2156_v55 }
 0x590   : > { %v2127_v22 = vadd.f32 %v2091_v38, %v3716_v12  ;;  %v2095_v46 = vadd.f32 %v2094_v31, %v1936_v35  ;;  %v2096_v45 = vpop.f32.mrb[79].mxu0 }
 0x591   : > { %v2128_v10 = vadd.f32 %v2093_v9, %v3717_v42  ;;  %v2097_v62 = vadd.f32 %v2096_v45, %v1936_v35  ;;  %2198 = vmatprep.subr.bf16.mxu1 %v2177_v44 }
 0x592   : > { %v2129_v61 = vadd.f32 %v2095_v46, %v3718_v48  ;;  %2199 = vmatpush1.bf16.msra.mxu1 %v2176_v17  ;;  %v2159_v29 = vmax.f32 %v2127_v22, 0.0 }
 0x593   : > { %v2130_v53 = vadd.f32 %v2097_v62, %v3719_v41  ;;  %v2160_v51 = vmax.f32 %v2128_v10, 0.0 }
 0x594   : > { %v2161_v0 = vmax.f32 %v2129_v61, 0.0 }
 0x595   : > { %v2162_v24 = vmax.f32 %v2130_v53, 0.0 }
 0x596   : > { %v2178_v25 = vpack.c.bf16 %v2161_v0, %v2159_v29 }
 0x597   : > { %v2179_v47 = vpack.c.bf16 %v2162_v24, %v2160_v51 }
 0x599   : > { %2200 = vmatprep.subr.bf16.mxu1 %v2179_v47 }
 0x59a   : > { %2201 = vmatpush1.bf16.msra.mxu1 %v2178_v25 }
 0x59d   : > { %2219 = vmatmul.mubr.bf16.vlgmr.msra.gmra.mrb[80].mxu1 %v2163_v16 }
 0x670   : > { %v2220_v34 = vpop.f32.mrb[80].mxu1 }
 0x671   : > { %v2221_v60 = vadd.f32 %v2220_v34, %v2184_v6  ;;  %v2222_v8 = vpop.f32.mrb[81].mxu1 }
 0x672   : > { %v2223_v50 = vadd.f32 %v2222_v8, %v2184_v6  ;;  %v2224_v26 = vpop.f32.mrb[82].mxu1 }
 0x673   : > { %2227 = vst [vmem:[%s477_s20] sm:$0xff] %v2221_v60  ;;  %v2225_v54 = vpop.f32.mrb[83].mxu1 }
 0x674   : > { %2228 = vst [vmem:[%s477_s20 + $0x8] sm:$0xff] %v2223_v50 }
 0x675   : > { %2475 = shalt.err (!%p2472_p5)
}
 0x676   : > { %s2476_s20 = scalar_lea.hbm %s3553_s22, 256  ;;  %s2480_s15 = scalar_lea.hbm %s3611_s13, 512 }
 0x677   : > { %p2477_p7 = scmp.ne.s32.totalorder %s3553_s22, %s2476_s20  ;;  %p2481_p12 = scmp.lt.u32.totalorder %s3553_s22, %s3611_s13 }
 0x678   : > { %p2482_p13 = scmp.lt.u32.totalorder %s2480_s15, %s2476_s20  ;;  %p2484_p1 = scmp.lt.u32.totalorder %s2476_s20, %s3553_s22 }
 0x679   : > { %p2478_p10 = pnand %p2477_p7, %p2636_p6 }
 0x67a   : > { %p2483_p0 = por %p2482_p13, %p2481_p12 }
 0x67b   : > { %p2479_p11 = pneg %p2478_p10 }
 0x67c   : > { %p2485_p2 = por %p2484_p1, %p2483_p0 }
 0x67e   : > { %p2486_p3 = pnand %p2485_p2, %p2479_p11 }
 0x680   : > { %2489 = shalt.err (!%p2486_p3)
}
 0x681   : > { %2377 = dma.vmem_to_hbm [thread:$0]  (%p2636_p6), %s3555_s21, 256, %s3553_s22, %s2230_s29  }
 0x682 PF: > { %s2256_s30 = sand.u32 1, %s2512_s25   ;;  %p2380_p4 = pnand %p2311_p9, %p2640_p8 }
 0x683   : > { %s2257_s1 = scalar_lea.sflag [#allocation4], %s2256_s30 }
 0x684   : > { %2507 = dma.done.wait (!%p2380_p4), %s2257_s1, 256  }
 0x685   : > { %2509 = vsyncadd (!%p2380_p4), %s2257_s1, 4294967040  ;;  %p23_p5 = scmp.ge.s32.totalorder %s2621_s14, 4   ;;  %s3722_s25 = smov %s2516_s26 }
 0x686   : > { %s3723_s26 = smov %s2520_s27  ;;  %s3724_s27 = smov %s2634_s17 }
 0x687   : > { %s3725_s28 = smov %s2621_s14  ;;  %25 = sbr.rel (!%p23_p5) target bundleno = 6 (0x6), region = 150 }
 0x68e   :  { %2262 = vsyncpa [#allocation4], 1 }
 0x68f   :  { %2264 = vsyncpa [#allocation4 + $0x1], 1 }

// kernel: tpu_custom_call.1
= control target key start
LH: loop header
LB: loop body
LE: loop exit
PB: predicated region body
PF: predicated region fallthrough
CT: control target
= control target key end

     0   :  { %s3598_s0 = inlined_call_operand.vmem [shape: bf16[16,512], index: 0, kind: input, shape index: {}]   ;;  %s3599_s1 = inlined_call_operand.vmem [shape: bf16[128,16], index: 1, kind: input, shape index: {}]   ;;  %s3600_s2 = inlined_call_operand.vmem [shape: f32[128,1], index: 2, kind: input, shape index: {}]   ;;  %s3601_s3 = inlined_call_operand.vmem [shape: bf16[128,128], index: 3, kind: input, shape index: {}]   ;;  %s3602_s4 = inlined_call_operand.vmem [shape: f32[128,1], index: 4, kind: input, shape index: {}]   ;;  %s3603_s5 = inlined_call_operand.vmem [shape: bf16[128,128], index: 5, kind: input, shape index: {}]   ;;  %s3604_s6 = inlined_call_operand.vmem [shape: f32[128,1], index: 6, kind: input, shape index: {}]   ;;  %s3605_s7 = inlined_call_operand.vmem [shape: bf16[128,128], index: 7, kind: input, shape index: {}]   ;;  %s3606_s8 = inlined_call_operand.vmem [shape: f32[128,1], index: 8, kind: input, shape index: {}]   ;;  %s3607_s9 = inlined_call_operand.vmem [shape: bf16[128,128], index: 9, kind: input, shape index: {}]   ;;  %s3608_s10 = inlined_call_operand.vmem [shape: f32[128,1], index: 10, kind: input, shape index: {}]   ;;  %s3609_s11 = inlined_call_operand.vmem [shape: bf16[8,128], index: 11, kind: input, shape index: {}]   ;;  %s3610_s12 = inlined_call_operand.vmem [shape: f32[8,1], index: 12, kind: input, shape index: {}]   ;;  %s3611_s13 = inlined_call_operand.hbm [shape: f32[8,512], index: 13, kind: output, shape index: {}]  }
   0x1   :  { %3664 = sst [smem:[#allocation6_spill]] %s3598_s0 }
   0x2   :  { %3665 = sst [smem:[#allocation7_spill]] %s3599_s1 }
   0x3   :  { %18 = vsyncpa [#allocation4], 0 }
   0x4   :  { %20 = vsyncpa [#allocation4 + $0x1], 0  ;;  %s2598_s25 = smov 0   ;;  %s2600_s26 = smov 0  }
   0x5   :  { %s2602_s27 = smov 0   ;;  %s2604_s28 = smov 0  }
   0x6 LB: > { %s3612_s29 = sadd.s32 4294967295, %s2524_s28   ;;  %s2309_s30 = sadd.s32 4294967294, %s2524_s28   ;;  %s2524_s28 = sphi %s2604_s28, %s3725_s28   ;;  %s2520_s27 = sphi %s2602_s27, %s3724_s27   ;;  %s2516_s26 = sphi %s2600_s26, %s3723_s26   ;;  %s2512_s25 = sphi %s2598_s25, %s3722_s25  }
   0x7   : > { %s2621_s14 = sadd.s32 1, %s2524_s28   ;;  %s33_s15 = sadd.s32 1, %s2520_s27 }
   0x8   : > { %s30_s16 = ssub.s32 %s2524_s28, %s2621_s14  ;;  %p40_p0 = scmp.ne.s32.totalorder %s2520_s27, %s2516_s26 }
   0x9   : > { %p31_p1 = scmp.eq.s32.totalorder %s30_s16, 0  ;;  %p41_p2 = scmp.eq.s32.totalorder %s2524_s28, 0 }
   0xa   : > { %p322_p3 = scmp.eq.s32.totalorder %s3612_s29, 1  ;;  %p327_p4 = scmp.ne.s32.totalorder %s2516_s26, %s2512_s25 }
   0xb   : > { %s2634_s17 = scalar_select %p31_p1, %s2520_s27, %s33_s15  }
   0xc   : > { %p42_p5 = por %p41_p2, %p40_p0  ;;  %p2636_p6 = por %p322_p3, %p40_p0 }
   0xd   : > { %p328_p7 = scmp.eq.s32.totalorder %s2309_s30, 1  ;;  %p2311_p9 = scmp.ge.s32.totalorder %s2524_s28, 2 }
   0xf   : > { %p2640_p8 = por %p328_p7, %p327_p4  ;;  %380 = sbr.rel (%p2311_p9) target bundleno = 33 (0x21), region = 64 }
  0x16   : > { %383 = sbr.rel (!%p42_p5) target bundleno = 33 (0x21), region = 68  ;;  %s385_s20 = sand.u32 (%p42_p5), 1, %s2520_s27  }
  0x17   : > { %s2373_s21 = sshll.u32 (%p42_p5), %s2524_s28, 3  ;;  %s2312_s22 = sshll.u32 (%p42_p5), %s385_s20, 4 }
  0x18   : > { %s3668_s0 = sld [smem:[#allocation6_spill]] (%p42_p5)  ;;  %s387_s30 = scalar_lea.vmem (%p42_p5), [#allocation2], %s2312_s22 }
  0x1e   : > { %s390_s15 = scalar_lea.vmem %s3668_s0, %s2373_s21 }
  0x1f   : > { %v420_v0 = vld [vmem:[%s390_s15] sm:$0xff]  ;;  %v422_v1 = vld [vmem:[%s390_s15 + $0x10] sm:$0xff] }
  0x20   : > { %421 = vst [vmem:[%s387_s30] sm:$0xff] %v420_v0  ;;  %423 = vst [vmem:[%s387_s30 + $0x8] sm:$0xff] %v422_v1 }
  0x21 PF: > { %p2315_p10 = scmp.ge.s32.totalorder %s2524_s28, 1  ;;  %p428_p11 = scmp.lt.s32.totalorder %s2524_s28, 3 }
  0x23   : > { %p429_p12 = pnand %p2315_p10, %p428_p11 }
  0x24   : > { %v501_v2 = vld [vmem:[%s3600_s2 + $0x10] sm:$0xff] (!%p429_p12)  ;;  %v499_v3 = vld [vmem:[%s3600_s2] sm:$0xff] (!%p429_p12)  ;;  %s3613_s22 = sand.u32 (!%p429_p12), 1, %s2516_s26   ;;  %v2526_v4 = vmov (!%p429_p12), 0   ;;  %v502_v5 = vld [vmem:[%s3600_s2 + $0x18] sm:$0xff] (!%p429_p12)  ;;  %s3669_s1 = sld [smem:[#allocation7_spill]] (!%p429_p12) }
  0x25   : > { %432 = sbr.rel (%p429_p12) target bundleno = 1666 (0x682), region = 106  ;;  %2418 = vset.pattern.permute.xlu1 (!%p429_p12), %v2526_v4  ;;  %2417 = vset.pattern.permute.xlu0 (!%p429_p12), %v2526_v4  ;;  %s2668_s15 = sshll.u32 (!%p429_p12), %s3613_s22, 4  ;;  %v500_v6 = vld [vmem:[%s3600_s2 + $0x8] sm:$0xff] (!%p429_p12)  ;;  %v503_v10 = vld [vmem:[%s3600_s2 + $0x20] sm:$0xff] (!%p429_p12)  ;;  %vm645_vm0 = vcmask (!%p429_p12), 130048   ;;  %v506_v13 = vld [vmem:[%s3600_s2 + $0x38] sm:$0xff] (!%p429_p12) }
  0x26   : > { %527 = vperm.xlu1 (!%p429_p12), %2418, %v501_v2   ;;  %517 = vperm.xlu0 (!%p429_p12), %2417, %v499_v3   ;;  %s437_s16 = scalar_lea.vmem (!%p429_p12), [#allocation2], %s2668_s15  ;;  %v504_v9 = vld [vmem:[%s3600_s2 + $0x28] sm:$0xff] (!%p429_p12)  ;;  %v505_v14 = vld [vmem:[%s3600_s2 + $0x30] sm:$0xff] (!%p429_p12)  ;;  %v507_v16 = vld [vmem:[%s3600_s2 + $0x40] sm:$0xff] (!%p429_p12)  ;;  %s3720_s0 = sadd.s32 (!%p429_p12), 4294967295, %s2524_s28  }
  0x27   : > { %v2419_v7 = vld [vmem:[%s437_s16 + $0x4] ss:$8 sps:$4 sm:$0xff] (!%p429_p12)   ;;  %702 = vmatprep.mubr.bf16.mxu0 (!%p429_p12), %v2526_v4  ;;  %742 = vmatprep.mubr.bf16.mxu1 (!%p429_p12), %v2526_v4  ;;  %v2421_v8 = vld [vmem:[%s437_s16] ss:$8 sps:$4 sm:$0xff] (!%p429_p12)   ;;  %s477_s20 = scalar_lea.vmem (!%p429_p12), [#allocation3], %s2668_s15  ;;  %s3721_s15 = sand.u32 (!%p429_p12), 1, %s2516_s26  }
  0x28   : > { %670 = vmatprep.subr.bf16.mxu0 (!%p429_p12), %v2419_v7  ;;  %2375 = vmatprep.subr.bf16.mxu1 (!%p429_p12), %v2419_v7  ;;  %v508_v15 = vld [vmem:[%s3600_s2 + $0x48] sm:$0xff] (!%p429_p12)  ;;  %v510_v19 = vld [vmem:[%s3600_s2 + $0x58] sm:$0xff] (!%p429_p12)  ;;  %v509_v20 = vld [vmem:[%s3600_s2 + $0x50] sm:$0xff] (!%p429_p12)  ;;  %s2244_s21 = sshll.u32 (!%p429_p12), %s477_s20, 4  ;;  %s2230_s29 = scalar_lea.sflag (!%p429_p12), [#allocation4], %s3721_s15  ;;  %s3555_s21 = int_to_ptr.vmem [resolvable:$true] %s2244_s21 }
  0x29   : > { %671 = vmatpush1.bf16.msra.mxu0 (!%p429_p12), %v2421_v8  ;;  %2376 = vmatpush1.bf16.msra.mxu1 (!%p429_p12), %v2421_v8  ;;  %v512_v21 = vld [vmem:[%s3600_s2 + $0x68] sm:$0xff] (!%p429_p12)  ;;  %v511_v22 = vld [vmem:[%s3600_s2 + $0x60] sm:$0xff] (!%p429_p12)  ;;  %v514_v25 = vld [vmem:[%s3600_s2 + $0x78] sm:$0xff] (!%p429_p12)  ;;  %s2462_s30 = scalar_lea.vmem (!%p429_p12), %s3555_s21, 256  ;;  %s2527_s16 = smov (!%p429_p12), [#allocation3]  }
  0x2a   : > { %532 = vperm.xlu1 (!%p429_p12), %2418, %v502_v5   ;;  %522 = vperm.xlu0 (!%p429_p12), %2417, %v500_v6   ;;  %v2422_v11 = vld [vmem:[%s3669_s1] sm:$0xff] (!%p429_p12)   ;;  %v2424_v17 = vld [vmem:[%s3669_s1 + $0x8] sm:$0xff] (!%p429_p12)   ;;  %v2426_v23 = vld [vmem:[%s3669_s1 + $0x10] sm:$0xff] (!%p429_p12)   ;;  %p2463_p13 = scmp.ne.s32.totalorder (!%p429_p12), %s3555_s21, %s2462_s30 }
  0x2b   : > { %v2423_v12 = vld [vmem:[%s3669_s1 + $0x20] sm:$0xff] (!%p429_p12)   ;;  %v2425_v18 = vld [vmem:[%s3669_s1 + $0x28] sm:$0xff] (!%p429_p12)   ;;  %v2427_v24 = vld [vmem:[%s3669_s1 + $0x30] sm:$0xff] (!%p429_p12)  }
  0x2c   : > { %2328 = vmatmul.mubr.msk.bf16.vlgmr.msra.gmra.mrb[0].mxu0 %vm645_vm0, %v2422_v11  ;;  %2332 = vmatmul.mubr.msk.bf16.vlgmr.msra.gmra.mrb[0].mxu1 %vm645_vm0, %v2423_v12  ;;  %v513_v26 = vld [vmem:[%s3600_s2 + $0x70] sm:$0xff]  ;;  %v848_v27 = vld [vmem:[%s3602_s4 + $0x8] sm:$0xff]  ;;  %v847_v28 = vld [vmem:[%s3602_s4] sm:$0xff]  ;;  %p2464_p0 = pnand %p2463_p13, %p2636_p6 }
  0x2d   : > { %712 = vmatprep.mubr.bf16.mxu0 %v2526_v4  ;;  %752 = vmatprep.mubr.bf16.mxu1 %v2526_v4  ;;  %v2428_v29 = vld [vmem:[%s3669_s1 + $0x18] sm:$0xff]   ;;  %v849_v32 = vld [vmem:[%s3602_s4 + $0x10] sm:$0xff]  ;;  %v852_v33 = vld [vmem:[%s3602_s4 + $0x28] sm:$0xff] }
  0x2e   : > { %542 = vperm.xlu1 %2418, %v504_v9   ;;  %537 = vperm.xlu0 %2417, %v503_v10   ;;  %v2429_v30 = vld [vmem:[%s3669_s1 + $0x38] sm:$0xff]   ;;  %v851_v34 = vld [vmem:[%s3602_s4 + $0x20] sm:$0xff]  ;;  %v853_v36 = vld [vmem:[%s3602_s4 + $0x30] sm:$0xff]  ;;  %s2374_s1 = sshll.u32 %s3720_s0, 8  ;;  %p2465_p1 = pneg %p2464_p0 }
  0x2f   : > { %v850_v31 = vld [vmem:[%s3602_s4 + $0x18] sm:$0xff]  ;;  %v856_v37 = vld [vmem:[%s3602_s4 + $0x48] sm:$0xff]  ;;  %v855_v38 = vld [vmem:[%s3602_s4 + $0x40] sm:$0xff]  ;;  %s3553_s22 = scalar_lea.hbm %s3611_s13, %s2374_s1  ;;  %s2466_s0 = sshll.u32 %s2527_s16, 4  ;;  %s2467_s0 = int_to_ptr.vmem [resolvable:$false] %s2466_s0 }
  0x30   : > { %v854_v35 = vld [vmem:[%s3602_s4 + $0x38] sm:$0xff]  ;;  %v857_v40 = vld [vmem:[%s3602_s4 + $0x50] sm:$0xff]  ;;  %v860_v41 = vld [vmem:[%s3602_s4 + $0x68] sm:$0xff]  ;;  %s2468_s1 = scalar_lea.vmem %s2467_s0, 512  ;;  %p2469_p2 = scmp.lt.s32.totalorder %s3555_s21, %s2467_s0 }
  0x31   : > { %v858_v39 = vld [vmem:[%s3602_s4 + $0x58] sm:$0xff]  ;;  %v859_v42 = vld [vmem:[%s3602_s4 + $0x60] sm:$0xff]  ;;  %v861_v44 = vld [vmem:[%s3602_s4 + $0x70] sm:$0xff]  ;;  %p2470_p3 = scmp.lt.s32.totalorder %s2468_s1, %s2462_s30 }
  0x32   : > { %552 = vperm.xlu1 %2418, %v506_v13   ;;  %547 = vperm.xlu0 %2417, %v505_v14   ;;  %v862_v43 = vld [vmem:[%s3602_s4 + $0x78] sm:$0xff]  ;;  %v1169_v45 = vld [vmem:[%s3604_s6 + $0x8] sm:$0xff]  ;;  %v1168_v46 = vld [vmem:[%s3604_s6] sm:$0xff] }
  0x33   : > { %v1171_v47 = vld [vmem:[%s3604_s6 + $0x18] sm:$0xff]  ;;  %v1170_v48 = vld [vmem:[%s3604_s6 + $0x10] sm:$0xff]  ;;  %v1173_v49 = vld [vmem:[%s3604_s6 + $0x28] sm:$0xff]  ;;  %p2471_p4 = por %p2470_p3, %p2469_p2 }
  0x34   : > { %2329 = vmatmul.mubr.msk.bf16.gmra.mrb[4].mxu0 %vm645_vm0, %v2424_v17  ;;  %2333 = vmatmul.mubr.msk.bf16.gmra.mrb[4].mxu1 %vm645_vm0, %v2425_v18  ;;  %v1172_v50 = vld [vmem:[%s3604_s6 + $0x20] sm:$0xff]  ;;  %v1175_v51 = vld [vmem:[%s3604_s6 + $0x38] sm:$0xff]  ;;  %v1174_v52 = vld [vmem:[%s3604_s6 + $0x30] sm:$0xff] }
  0x35   : > { %722 = vmatprep.mubr.bf16.mxu0 %v2526_v4  ;;  %762 = vmatprep.mubr.bf16.mxu1 %v2526_v4  ;;  %v1177_v53 = vld [vmem:[%s3604_s6 + $0x48] sm:$0xff]  ;;  %v1176_v54 = vld [vmem:[%s3604_s6 + $0x40] sm:$0xff]  ;;  %v1179_v55 = vld [vmem:[%s3604_s6 + $0x58] sm:$0xff]  ;;  %p2472_p5 = pnand %p2471_p4, %p2465_p1 }
  0x36   : > { %562 = vperm.xlu1 %2418, %v508_v15   ;;  %557 = vperm.xlu0 %2417, %v507_v16   ;;  %v1178_v56 = vld [vmem:[%s3604_s6 + $0x50] sm:$0xff]  ;;  %v1181_v57 = vld [vmem:[%s3604_s6 + $0x68] sm:$0xff]  ;;  %v1180_v58 = vld [vmem:[%s3604_s6 + $0x60] sm:$0xff] }
  0x37   : > { %v1183_v59 = vld [vmem:[%s3604_s6 + $0x78] sm:$0xff]  ;;  %v1182_v60 = vld [vmem:[%s3604_s6 + $0x70] sm:$0xff]  ;;  %v1522_v61 = vld [vmem:[%s3606_s8 + $0x8] sm:$0xff] }
  0x38   : > { %v1521_v62 = vld [vmem:[%s3606_s8] sm:$0xff]  ;;  %v1524_v63 = vld [vmem:[%s3606_s8 + $0x18] sm:$0xff]  ;;  %v1523_v0 = vld [vmem:[%s3606_s8 + $0x10] sm:$0xff] }
  0x39   : > { %v1526_v1 = vld [vmem:[%s3606_s8 + $0x28] sm:$0xff]  ;;  %v1525_v2 = vld [vmem:[%s3606_s8 + $0x20] sm:$0xff]  ;;  %v1528_v3 = vld [vmem:[%s3606_s8 + $0x38] sm:$0xff] }
  0x3a   : > { %572 = vperm.xlu1 %2418, %v510_v19   ;;  %567 = vperm.xlu0 %2417, %v509_v20   ;;  %v1527_v5 = vld [vmem:[%s3606_s8 + $0x30] sm:$0xff]  ;;  %v1530_v6 = vld [vmem:[%s3606_s8 + $0x48] sm:$0xff]  ;;  %v1529_v7 = vld [vmem:[%s3606_s8 + $0x40] sm:$0xff] }
  0x3b   : > { %v1532_v8 = vld [vmem:[%s3606_s8 + $0x58] sm:$0xff]  ;;  %v1531_v9 = vld [vmem:[%s3606_s8 + $0x50] sm:$0xff]  ;;  %v1534_v10 = vld [vmem:[%s3606_s8 + $0x68] sm:$0xff] }
  0x3c   : > { %2330 = vmatmul.mubr.msk.bf16.gmra.mrb[8].mxu0 %vm645_vm0, %v2426_v23  ;;  %2334 = vmatmul.mubr.msk.bf16.gmra.mrb[8].mxu1 %vm645_vm0, %v2427_v24  ;;  %v1533_v11 = vld [vmem:[%s3606_s8 + $0x60] sm:$0xff]  ;;  %v1536_v12 = vld [vmem:[%s3606_s8 + $0x78] sm:$0xff]  ;;  %v1535_v13 = vld [vmem:[%s3606_s8 + $0x70] sm:$0xff] }
  0x3d   : > { %732 = vmatprep.mubr.bf16.mxu0 %v2526_v4  ;;  %772 = vmatprep.mubr.bf16.mxu1 %v2526_v4  ;;  %v1843_v14 = vld [vmem:[%s3608_s10 + $0x8] sm:$0xff]  ;;  %v1842_v15 = vld [vmem:[%s3608_s10] sm:$0xff]  ;;  %v1845_v16 = vld [vmem:[%s3608_s10 + $0x18] sm:$0xff] }
  0x3e   : > { %582 = vperm.xlu1 %2418, %v512_v21   ;;  %577 = vperm.xlu0 %2417, %v511_v22   ;;  %v1844_v17 = vld [vmem:[%s3608_s10 + $0x10] sm:$0xff]  ;;  %v1847_v18 = vld [vmem:[%s3608_s10 + $0x28] sm:$0xff]  ;;  %v1846_v19 = vld [vmem:[%s3608_s10 + $0x20] sm:$0xff] }
  0x3f   : > { %v1849_v20 = vld [vmem:[%s3608_s10 + $0x38] sm:$0xff]  ;;  %v1848_v21 = vld [vmem:[%s3608_s10 + $0x30] sm:$0xff]  ;;  %v1851_v22 = vld [vmem:[%s3608_s10 + $0x48] sm:$0xff] }
  0x40   : > { %v1850_v23 = vld [vmem:[%s3608_s10 + $0x40] sm:$0xff]  ;;  %v1853_v24 = vld [vmem:[%s3608_s10 + $0x58] sm:$0xff] }
  0x42   : > { %592 = vperm.xlu1 %2418, %v514_v25   ;;  %587 = vperm.xlu0 %2417, %v513_v26   ;;  %v1852_v25 = vld [vmem:[%s3608_s10 + $0x50] sm:$0xff]  ;;  %v1855_v26 = vld [vmem:[%s3608_s10 + $0x68] sm:$0xff] }
  0x44   : > { %2331 = vmatmul.mubr.msk.bf16.gmra.mrb[12].mxu0 %vm645_vm0, %v2428_v29  ;;  %2335 = vmatmul.mubr.msk.bf16.gmra.mrb[12].mxu1 %vm645_vm0, %v2429_v30  ;;  %v1856_v29 = vld [vmem:[%s3608_s10 + $0x70] sm:$0xff]  ;;  %v2180_v30 = vld [vmem:[%s3610_s12] sm:$0xff] }
  0x45   : > { %1023 = vmatprep.mubr.bf16.mxu1 %v2526_v4  ;;  %1344 = vmatprep.mubr.bf16.mxu0 %v2526_v4 }
  0x46   : > { %870 = vperm.xlu1 %2418, %v848_v27   ;;  %865 = vperm.xlu0 %2417, %v847_v28   ;;  %v1854_v27 = vld [vmem:[%s3608_s10 + $0x60] sm:$0xff]  ;;  %v1857_v28 = vld [vmem:[%s3608_s10 + $0x78] sm:$0xff] }
  0x4a   : > { %880 = vperm.xlu1 %2418, %v850_v31   ;;  %875 = vperm.xlu0 %2417, %v849_v32  }
  0x4e   : > { %890 = vperm.xlu1 %2418, %v852_v33   ;;  %885 = vperm.xlu0 %2417, %v851_v34  }
  0x52   : > { %900 = vperm.xlu1 %2418, %v854_v35   ;;  %895 = vperm.xlu0 %2417, %v853_v36  }
  0x56   : > { %910 = vperm.xlu1 %2418, %v856_v37   ;;  %905 = vperm.xlu0 %2417, %v855_v38  }
  0x5a   : > { %920 = vperm.xlu1 %2418, %v858_v39   ;;  %915 = vperm.xlu0 %2417, %v857_v40  }
  0x5e   : > { %930 = vperm.xlu1 %2418, %v860_v41   ;;  %925 = vperm.xlu0 %2417, %v859_v42  }
  0x62   : > { %940 = vperm.xlu1 %2418, %v862_v43   ;;  %935 = vperm.xlu0 %2417, %v861_v44  }
  0x66   : > { %1191 = vperm.xlu1 %2418, %v1169_v45   ;;  %1186 = vperm.xlu0 %2417, %v1168_v46  }
  0x6a   : > { %1201 = vperm.xlu1 %2418, %v1171_v47   ;;  %1196 = vperm.xlu0 %2417, %v1170_v48  }
  0x6e   : > { %1211 = vperm.xlu1 %2418, %v1173_v49   ;;  %1206 = vperm.xlu0 %2417, %v1172_v50  }
  0x72   : > { %1221 = vperm.xlu1 %2418, %v1175_v51   ;;  %1216 = vperm.xlu0 %2417, %v1174_v52  }
  0x76   : > { %1231 = vperm.xlu1 %2418, %v1177_v53   ;;  %1226 = vperm.xlu0 %2417, %v1176_v54  }
  0x7a   : > { %1241 = vperm.xlu1 %2418, %v1179_v55   ;;  %1236 = vperm.xlu0 %2417, %v1178_v56  }
  0x7e   : > { %1251 = vperm.xlu1 %2418, %v1181_v57   ;;  %1246 = vperm.xlu0 %2417, %v1180_v58  }
  0x82   : > { %1261 = vperm.xlu1 %2418, %v1183_v59   ;;  %1256 = vperm.xlu0 %2417, %v1182_v60  }
  0x86   : > { %1544 = vperm.xlu1 %2418, %v1522_v61   ;;  %1539 = vperm.xlu0 %2417, %v1521_v62  }
  0x8a   : > { %1554 = vperm.xlu1 %2418, %v1524_v63   ;;  %1549 = vperm.xlu0 %2417, %v1523_v0  }
  0x8e   : > { %1564 = vperm.xlu1 %2418, %v1526_v1   ;;  %1559 = vperm.xlu0 %2417, %v1525_v2  }
  0x92   : > { %1574 = vperm.xlu1 %2418, %v1528_v3   ;;  %1569 = vperm.xlu0 %2417, %v1527_v5  }
  0x96   : > { %1584 = vperm.xlu1 %2418, %v1530_v6   ;;  %1579 = vperm.xlu0 %2417, %v1529_v7  }
  0x9a   : > { %1594 = vperm.xlu1 %2418, %v1532_v8   ;;  %1589 = vperm.xlu0 %2417, %v1531_v9  }
  0x9e   : > { %1604 = vperm.xlu1 %2418, %v1534_v10   ;;  %1599 = vperm.xlu0 %2417, %v1533_v11  }
  0xa2   : > { %1614 = vperm.xlu1 %2418, %v1536_v12   ;;  %1609 = vperm.xlu0 %2417, %v1535_v13  }
  0xa5   : > { %v528_v31 = vpop.permute.xlu1 %527  ;;  %v518_v32 = vpop.permute.xlu0 %517 }
  0xa6   : > { %1865 = vperm.xlu1 %2418, %v1843_v14   ;;  %1860 = vperm.xlu0 %2417, %v1842_v15  }
  0xa9   : > { %v533_v33 = vpop.permute.xlu1 %532  ;;  %v523_v34 = vpop.permute.xlu0 %522 }
  0xaa   : > { %1875 = vperm.xlu1 %2418, %v1845_v16   ;;  %1870 = vperm.xlu0 %2417, %v1844_v17  }
  0xad   : > { %v543_v35 = vpop.permute.xlu1 %542  ;;  %v538_v36 = vpop.permute.xlu0 %537 }
  0xae   : > { %1885 = vperm.xlu1 %2418, %v1847_v18   ;;  %1880 = vperm.xlu0 %2417, %v1846_v19  }
  0xb1   : > { %v2962_v52 = vpop.permute.xlu1 %552  ;;  %v548_v54 = vpop.permute.xlu0 %547 }
  0xb2   : > { %1895 = vperm.xlu1 %2418, %v1849_v20   ;;  %1890 = vperm.xlu0 %2417, %v1848_v21  }
  0xb5   : > { %v563_v10 = vpop.permute.xlu1 %562  ;;  %v558_v13 = vpop.permute.xlu0 %557 }
  0xb6   : > { %1905 = vperm.xlu1 %2418, %v1851_v22   ;;  %1900 = vperm.xlu0 %2417, %v1850_v23  }
  0xba   : > { %1915 = vperm.xlu1 %2418, %v1853_v24   ;;  %1910 = vperm.xlu0 %2417, %v1852_v25  }
  0xbe   : > { %1925 = vperm.xlu1 %2418, %v1855_v26   ;;  %1920 = vperm.xlu0 %2417, %v1854_v27  }
  0xc2   : > { %1935 = vperm.xlu1 %2418, %v1857_v28   ;;  %1930 = vperm.xlu0 %2417, %v1856_v29  }
  0xc6   : > { %2183 = vperm.xlu0 %2417, %v2180_v30  }
  0xff   : > { %v704_v37 = vpop.f32.mrb[0].mxu0  ;;  %v2947_v38 = vpop.f32.mrb[0].mxu1 }
 0x100   : > { %v706_v39 = vpop.f32.mrb[1].mxu0  ;;  %v746_v40 = vpop.f32.mrb[1].mxu1  ;;  %v2953_v44 = vadd.f32 %v704_v37, %v518_v32 }
 0x101   : > { %v2949_v41 = vadd.f32 %v706_v39, %v518_v32  ;;  %v708_v42 = vpop.f32.mrb[2].mxu0  ;;  %v2951_v43 = vpop.f32.mrb[2].mxu1 }
 0x102   : > { %v2955_v45 = vadd.f32 %v708_v42, %v523_v34  ;;  %v710_v46 = vpop.f32.mrb[3].mxu0  ;;  %v750_v48 = vpop.f32.mrb[3].mxu1  ;;  %v783_v53 = vmax.f32 %v2953_v44, 0.0 }
 0x103   : > { %v2957_v47 = vadd.f32 %v710_v46, %v523_v34  ;;  %v784_v50 = vmax.f32 %v2949_v41, 0.0  ;;  %v573_v32 = vpop.permute.xlu1 %572 }
 0x104   : > { %v785_v49 = vmax.f32 %v2955_v45, 0.0 }
 0x105   : > { %v786_v51 = vmax.f32 %v2957_v47, 0.0 }
 0x106   : > { %v831_v57 = vpack.c.bf16 %v785_v49, %v783_v53 }
 0x107   : > { %v832_v55 = vpack.c.bf16 %v786_v51, %v784_v50  ;;  %v714_v56 = vpop.f32.mrb[4].mxu0  ;;  %v2973_v58 = vpop.f32.mrb[4].mxu1 }
 0x108   : > { %v716_v59 = vpop.f32.mrb[5].mxu0  ;;  %v756_v61 = vpop.f32.mrb[5].mxu1  ;;  %v2977_v63 = vadd.f32 %v714_v56, %v528_v31 }
 0x109   : > { %v2975_v60 = vadd.f32 %v716_v59, %v528_v31  ;;  %v718_v62 = vpop.f32.mrb[6].mxu0  ;;  %991 = vmatprep.subr.bf16.mxu1 %v832_v55  ;;  %v2981_v1 = vpop.f32.mrb[6].mxu1 }
 0x10a   : > { %v2979_v0 = vadd.f32 %v718_v62, %v533_v33  ;;  %v720_v2 = vpop.f32.mrb[7].mxu0  ;;  %992 = vmatpush1.bf16.msra.mxu1 %v831_v57  ;;  %v760_v5 = vpop.f32.mrb[7].mxu1  ;;  %v787_v9 = vmax.f32 %v2977_v63, 0.0  ;;  %v3033_v62 = vadd.f32 %v2947_v38, %v558_v13 }
 0x10b   : > { %v2983_v3 = vadd.f32 %v720_v2, %v533_v33  ;;  %v788_v7 = vmax.f32 %v2975_v60, 0.0  ;;  %v568_v33 = vpop.permute.xlu0 %567 }
 0x10c   : > { %v789_v6 = vmax.f32 %v2979_v0, 0.0 }
 0x10d   : > { %v3638_v8 = vmax.f32 %v2983_v3, 0.0 }
 0x10e   : > { %v833_v14 = vpack.c.bf16 %v789_v6, %v787_v9 }
 0x10f   : > { %v834_v11 = vpack.c.bf16 %v3638_v8, %v788_v7  ;;  %v724_v12 = vpop.f32.mrb[8].mxu0  ;;  %v2997_v15 = vpop.f32.mrb[8].mxu1 }
 0x110   : > { %v726_v16 = vpop.f32.mrb[9].mxu0  ;;  %v766_v17 = vpop.f32.mrb[9].mxu1  ;;  %v3001_v21 = vadd.f32 %v724_v12, %v538_v36  ;;  %v3040_v12 = vadd.f32 %v2951_v43, %v563_v10 }
 0x111   : > { %993 = vmatprep.subr.bf16.mxu1 %v834_v11  ;;  %v2999_v18 = vadd.f32 %v726_v16, %v538_v36  ;;  %v728_v19 = vpop.f32.mrb[10].mxu0  ;;  %v768_v20 = vpop.f32.mrb[10].mxu1  ;;  %v3019_v36 = vadd.f32 %v750_v48, %v563_v10  ;;  %v3044_v16 = vadd.f32 %v756_v61, %v568_v33 }
 0x112   : > { %994 = vmatpush1.bf16.msra.mxu1 %v833_v14  ;;  %v3003_v22 = vadd.f32 %v728_v19, %v543_v35  ;;  %v730_v23 = vpop.f32.mrb[11].mxu0  ;;  %v770_v24 = vpop.f32.mrb[11].mxu1  ;;  %v3636_v29 = vmax.f32 %v3001_v21, 0.0  ;;  %v3046_v19 = vadd.f32 %v760_v5, %v573_v32  ;;  %v3617_v61 = vmax.f32 %v3040_v12, 0.0 }
 0x113   : > { %v3005_v25 = vadd.f32 %v730_v23, %v543_v35  ;;  %v3637_v27 = vmax.f32 %v2999_v18, 0.0  ;;  %v3017_v35 = vadd.f32 %v746_v40, %v558_v13  ;;  %v583_v13 = vpop.permute.xlu1 %582  ;;  %v578_v10 = vpop.permute.xlu0 %577  ;;  %v3058_v5 = vadd.f32 %v2973_v58, %v568_v33 }
 0x114   : > { %v3635_v26 = vmax.f32 %v3003_v22, 0.0  ;;  %v3075_v58 = vadd.f32 %v766_v17, %v578_v10 }
 0x115   : > { %v3634_v28 = vmax.f32 %v3005_v25, 0.0  ;;  %v3616_v11 = vmax.f32 %v3017_v35, 0.0  ;;  %v3629_v33 = vmax.f32 %v3058_v5, 0.0 }
 0x116   : > { %v835_v37 = vpack.c.bf16 %v3635_v26, %v3636_v29 }
 0x117   : > { %v734_v30 = vpop.f32.mrb[12].mxu0  ;;  %v3011_v31 = vpop.f32.mrb[12].mxu1  ;;  %v836_v34 = vpack.c.bf16 %v3634_v28, %v3637_v27 }
 0x118   : > { %v736_v39 = vpop.f32.mrb[13].mxu0  ;;  %v776_v42 = vpop.f32.mrb[13].mxu1  ;;  %v3027_v57 = vadd.f32 %v734_v30, %v548_v54  ;;  %v3618_v30 = vmax.f32 %v3033_v62, 0.0 }
 0x119   : > { %v3025_v46 = vadd.f32 %v736_v39, %v548_v54  ;;  %v738_v55 = vpop.f32.mrb[14].mxu0  ;;  %v778_v56 = vpop.f32.mrb[14].mxu1  ;;  %995 = vmatprep.subr.bf16.mxu1 %v836_v34  ;;  %v3615_v54 = vmax.f32 %v3019_v36, 0.0  ;;  %v3061_v34 = vadd.f32 %v2981_v1, %v573_v32 }
 0x11a   : > { %v3030_v59 = vadd.f32 %v738_v55, %v2962_v52  ;;  %v740_v40 = vpop.f32.mrb[15].mxu0  ;;  %v780_v48 = vpop.f32.mrb[15].mxu1  ;;  %996 = vmatpush1.bf16.msra.mxu1 %v835_v37  ;;  %v3630_v55 = vmax.f32 %v3044_v16, 0.0  ;;  %v839_v32 = vpack.c.bf16 %v3617_v61, %v3618_v30  ;;  %v3627_v61 = vmax.f32 %v3075_v58, 0.0 }
 0x11b   : > { %v3036_v2 = vadd.f32 %v740_v40, %v2962_v52  ;;  %v3633_v23 = vmax.f32 %v3025_v46, 0.0  ;;  %v3632_v52 = vmax.f32 %v3027_v57, 0.0  ;;  %v840_v39 = vpack.c.bf16 %v3615_v54, %v3616_v11  ;;  %v593_v1 = vpop.permute.xlu1 %592 }
 0x11c   : > { %v3631_v14 = vmax.f32 %v3030_v59, 0.0  ;;  %v3619_v40 = vmax.f32 %v3046_v19, 0.0  ;;  %v3628_v54 = vmax.f32 %v3061_v34, 0.0  ;;  %v3083_v11 = vadd.f32 %v768_v20, %v583_v13 }
 0x11d   : > { %v3614_v38 = vmax.f32 %v3036_v2, 0.0 }
 0x11e   : > { %v837_v37 = vpack.c.bf16 %v3631_v14, %v3632_v52  ;;  %v841_v20 = vpack.c.bf16 %v3628_v54, %v3629_v33 }
 0x11f   : > { %v838_v43 = vpack.c.bf16 %v3614_v38, %v3633_v23  ;;  %v3073_v38 = vadd.f32 %v770_v24, %v583_v13  ;;  %v842_v24 = vpack.c.bf16 %v3619_v40, %v3630_v55  ;;  %v3625_v13 = vmax.f32 %v3083_v11, 0.0 }
 0x120   : > { %v3103_v40 = vadd.f32 %v778_v56, %v593_v1 }
 0x121   : > { %997 = vmatprep.subr.bf16.mxu1 %v838_v43  ;;  %v3620_v17 = vmax.f32 %v3073_v38, 0.0  ;;  %v3090_v43 = vadd.f32 %v780_v48, %v593_v1 }
 0x122   : > { %998 = vmatpush1.bf16.msra.mxu1 %v837_v37  ;;  %v588_v37 = vpop.permute.xlu0 %587  ;;  %v3622_v1 = vmax.f32 %v3103_v40, 0.0 }
 0x123   : > { %999 = vmatprep.subr.bf16.mxu1 %v840_v39  ;;  %v3093_v39 = vadd.f32 %v2997_v15, %v578_v10  ;;  %v3096_v30 = vadd.f32 %v776_v42, %v588_v37  ;;  %v844_v15 = vpack.c.bf16 %v3620_v17, %v3627_v61  ;;  %v3621_v48 = vmax.f32 %v3090_v43, 0.0 }
 0x124   : > { %v3112_v10 = vadd.f32 %v3011_v31, %v588_v37  ;;  %v2430_v37 = vld [vmem:[%s3601_s3] sm:$0xff]  }
 0x125   : > { %v3626_v42 = vmax.f32 %v3093_v39, 0.0 }
 0x126   : > { %1000 = vmatpush1.bf16.msra.mxu1 %v839_v32  ;;  %v3624_v32 = vmax.f32 %v3096_v30, 0.0  ;;  %v3623_v17 = vmax.f32 %v3112_v10, 0.0 }
 0x127   : > { %1001 = vmatprep.subr.bf16.mxu1 %v842_v24  ;;  %v843_v56 = vpack.c.bf16 %v3625_v13, %v3626_v42 }
 0x128   : > { %v846_v24 = vpack.c.bf16 %v3621_v48, %v3624_v32  ;;  %v845_v31 = vpack.c.bf16 %v3622_v1, %v3623_v17  ;;  %v871_v48 = vpop.permute.xlu1 %870 }
 0x12a   : > { %1002 = vmatpush1.bf16.msra.mxu1 %v841_v20  ;;  %v2431_v20 = vld [vmem:[%s3601_s3 + $0x8] sm:$0xff]  }
 0x12b   : > { %1003 = vmatprep.subr.bf16.mxu1 %v844_v15  ;;  %v2432_v15 = vld [vmem:[%s3601_s3 + $0x10] sm:$0xff]  }
 0x12c   : > { %v881_v26 = vpop.permute.xlu1 %880 }
 0x12e   : > { %1004 = vmatpush1.bf16.msra.mxu1 %v843_v56  ;;  %v2433_v56 = vld [vmem:[%s3601_s3 + $0x18] sm:$0xff]  }
 0x12f   : > { %1005 = vmatprep.subr.bf16.mxu1 %v846_v24  ;;  %v2434_v24 = vld [vmem:[%s3601_s3 + $0x20] sm:$0xff]  }
 0x132   : > { %1006 = vmatpush1.bf16.msra.mxu1 %v845_v31  ;;  %v2435_v31 = vld [vmem:[%s3601_s3 + $0x28] sm:$0xff]  }
 0x135   : > { %1024 = vmatmul.mubr.bf16.vlgmr.msra.gmra.mrb[16].mxu1 %v2430_v37  ;;  %v2436_v37 = vld [vmem:[%s3601_s3 + $0x30] sm:$0xff]  }
 0x136   : > { %1033 = vmatprep.mubr.bf16.mxu1 %v2526_v4 }
 0x13d   : > { %1034 = vmatmul.mubr.bf16.gmra.mrb[20].mxu1 %v2431_v20  ;;  %v2437_v20 = vld [vmem:[%s3601_s3 + $0x38] sm:$0xff]  }
 0x13e   : > { %1043 = vmatprep.mubr.bf16.mxu1 %v2526_v4 }
 0x145   : > { %1044 = vmatmul.mubr.bf16.gmra.mrb[24].mxu1 %v2432_v15  ;;  %v866_v15 = vpop.permute.xlu0 %865 }
 0x146   : > { %1053 = vmatprep.mubr.bf16.mxu1 %v2526_v4 }
 0x149   : > { %v876_v14 = vpop.permute.xlu0 %875 }
 0x14d   : > { %1054 = vmatmul.mubr.bf16.gmra.mrb[28].mxu1 %v2433_v56 }
 0x14e   : > { %1063 = vmatprep.mubr.bf16.mxu1 %v2526_v4 }
 0x155   : > { %1064 = vmatmul.mubr.bf16.gmra.mrb[32].mxu1 %v2434_v24 }
 0x156   : > { %1073 = vmatprep.mubr.bf16.mxu1 %v2526_v4 }
 0x15d   : > { %1074 = vmatmul.mubr.bf16.gmra.mrb[36].mxu1 %v2435_v31 }
 0x15e   : > { %1083 = vmatprep.mubr.bf16.mxu1 %v2526_v4 }
 0x165   : > { %1084 = vmatmul.mubr.bf16.gmra.mrb[40].mxu1 %v2436_v37 }
 0x166   : > { %1093 = vmatprep.mubr.bf16.mxu1 %v2526_v4 }
 0x16d   : > { %1094 = vmatmul.mubr.bf16.gmra.mrb[44].mxu1 %v2437_v20 }
 0x16e   : > { %1697 = vmatprep.mubr.bf16.mxu1 %v2526_v4 }
 0x208   : > { %v1025_v56 = vpop.f32.mrb[16].mxu1 }
 0x209   : > { %v1026_v24 = vadd.f32 %v1025_v56, %v866_v15  ;;  %v1027_v31 = vpop.f32.mrb[17].mxu1 }
 0x20a   : > { %v1028_v1 = vadd.f32 %v1027_v31, %v866_v15  ;;  %v1029_v17 = vpop.f32.mrb[18].mxu1 }
 0x20b   : > { %v1030_v32 = vadd.f32 %v1029_v17, %v871_v48  ;;  %v1031_v13 = vpop.f32.mrb[19].mxu1  ;;  %v1104_v37 = vmax.f32 %v1026_v24, 0.0 }
 0x20c   : > { %v1032_v42 = vadd.f32 %v1031_v13, %v871_v48  ;;  %v1105_v54 = vmax.f32 %v1028_v1, 0.0 }
 0x20d   : > { %v1106_v61 = vmax.f32 %v1030_v32, 0.0 }
 0x20e   : > { %v1107_v33 = vmax.f32 %v1032_v42, 0.0  ;;  %v886_v42 = vpop.permute.xlu0 %885 }
 0x20f   : > { %v1152_v55 = vpack.c.bf16 %v1106_v61, %v1104_v37  ;;  %v891_v37 = vpop.permute.xlu1 %890 }
 0x210   : > { %v1153_v52 = vpack.c.bf16 %v1107_v33, %v1105_v54  ;;  %v1035_v20 = vpop.f32.mrb[20].mxu1 }
 0x211   : > { %v1036_v23 = vadd.f32 %v1035_v20, %v876_v14  ;;  %v1037_v28 = vpop.f32.mrb[21].mxu1 }
 0x212   : > { %v1038_v29 = vadd.f32 %v1037_v28, %v876_v14  ;;  %v1039_v56 = vpop.f32.mrb[22].mxu1  ;;  %1312 = vmatprep.subr.bf16.mxu0 %v1153_v52 }
 0x213   : > { %v1040_v27 = vadd.f32 %v1039_v56, %v881_v26  ;;  %v1041_v15 = vpop.f32.mrb[23].mxu1  ;;  %1313 = vmatpush1.bf16.msra.mxu0 %v1152_v55  ;;  %v1108_v31 = vmax.f32 %v1036_v23, 0.0  ;;  %v896_v56 = vpop.permute.xlu0 %895 }
 0x214   : > { %v1042_v17 = vadd.f32 %v1041_v15, %v881_v26  ;;  %v1109_v48 = vmax.f32 %v1038_v29, 0.0 }
 0x215   : > { %v1110_v13 = vmax.f32 %v1040_v27, 0.0 }
 0x216   : > { %v1111_v32 = vmax.f32 %v1042_v17, 0.0 }
 0x217   : > { %v1154_v1 = vpack.c.bf16 %v1110_v13, %v1108_v31 }
 0x218   : > { %v1155_v61 = vpack.c.bf16 %v1111_v32, %v1109_v48  ;;  %v1045_v24 = vpop.f32.mrb[24].mxu1  ;;  %v901_v48 = vpop.permute.xlu1 %900 }
 0x219   : > { %v1046_v54 = vadd.f32 %v1045_v24, %v886_v42  ;;  %v1047_v33 = vpop.f32.mrb[25].mxu1 }
 0x21a   : > { %v1048_v20 = vadd.f32 %v1047_v33, %v886_v42  ;;  %v1049_v8 = vpop.f32.mrb[26].mxu1  ;;  %1314 = vmatprep.subr.bf16.mxu0 %v1155_v61 }
 0x21b   : > { %v1050_v28 = vadd.f32 %v1049_v8, %v891_v37  ;;  %v1051_v14 = vpop.f32.mrb[27].mxu1  ;;  %1315 = vmatpush1.bf16.msra.mxu0 %v1154_v1  ;;  %v1112_v55 = vmax.f32 %v1046_v54, 0.0 }
 0x21c   : > { %v1052_v52 = vadd.f32 %v1051_v14, %v891_v37  ;;  %v1113_v23 = vmax.f32 %v1048_v20, 0.0 }
 0x21d   : > { %v1114_v26 = vmax.f32 %v1050_v28, 0.0  ;;  %v906_v28 = vpop.permute.xlu0 %905 }
 0x21e   : > { %v1115_v27 = vmax.f32 %v1052_v52, 0.0 }
 0x21f   : > { %v1156_v29 = vpack.c.bf16 %v1114_v26, %v1112_v55 }
 0x220   : > { %v1157_v15 = vpack.c.bf16 %v1115_v27, %v1113_v23  ;;  %v1055_v17 = vpop.f32.mrb[28].mxu1  ;;  %v911_v23 = vpop.permute.xlu1 %910 }
 0x221   : > { %v1056_v31 = vadd.f32 %v1055_v17, %v896_v56  ;;  %v1057_v13 = vpop.f32.mrb[29].mxu1 }
 0x222   : > { %v1058_v32 = vadd.f32 %v1057_v13, %v896_v56  ;;  %v1059_v24 = vpop.f32.mrb[30].mxu1  ;;  %1316 = vmatprep.subr.bf16.mxu0 %v1157_v15 }
 0x223   : > { %v1060_v42 = vadd.f32 %v1059_v24, %v901_v48  ;;  %v1061_v61 = vpop.f32.mrb[31].mxu1  ;;  %1317 = vmatpush1.bf16.msra.mxu0 %v1156_v29  ;;  %v1116_v1 = vmax.f32 %v1056_v31, 0.0 }
 0x224   : > { %v1062_v8 = vadd.f32 %v1061_v61, %v901_v48  ;;  %v1117_v54 = vmax.f32 %v1058_v32, 0.0 }
 0x225   : > { %v1118_v33 = vmax.f32 %v1060_v42, 0.0  ;;  %v916_v42 = vpop.permute.xlu0 %915 }
 0x226   : > { %v1119_v37 = vmax.f32 %v1062_v8, 0.0 }
 0x227   : > { %v1158_v20 = vpack.c.bf16 %v1118_v33, %v1116_v1 }
 0x228   : > { %v1159_v14 = vpack.c.bf16 %v1119_v37, %v1117_v54  ;;  %v1065_v52 = vpop.f32.mrb[32].mxu1  ;;  %v921_v54 = vpop.permute.xlu1 %920 }
 0x229   : > { %v1066_v55 = vadd.f32 %v1065_v52, %v906_v28  ;;  %v1067_v26 = vpop.f32.mrb[33].mxu1 }
 0x22a   : > { %v1068_v27 = vadd.f32 %v1067_v26, %v906_v28  ;;  %v1069_v17 = vpop.f32.mrb[34].mxu1  ;;  %1318 = vmatprep.subr.bf16.mxu0 %v1159_v14 }
 0x22b   : > { %v1070_v56 = vadd.f32 %v1069_v17, %v911_v23  ;;  %v1071_v15 = vpop.f32.mrb[35].mxu1  ;;  %1319 = vmatpush1.bf16.msra.mxu0 %v1158_v20  ;;  %v1120_v29 = vmax.f32 %v1066_v55, 0.0 }
 0x22c   : > { %v1072_v13 = vadd.f32 %v1071_v15, %v911_v23  ;;  %v1121_v31 = vmax.f32 %v1068_v27, 0.0 }
 0x22d   : > { %v1122_v48 = vmax.f32 %v1070_v56, 0.0  ;;  %v926_v56 = vpop.permute.xlu0 %925 }
 0x22e   : > { %v1123_v24 = vmax.f32 %v1072_v13, 0.0 }
 0x22f   : > { %v1160_v32 = vpack.c.bf16 %v1122_v48, %v1120_v29 }
 0x230   : > { %v1161_v61 = vpack.c.bf16 %v1123_v24, %v1121_v31  ;;  %v1075_v8 = vpop.f32.mrb[36].mxu1  ;;  %v931_v31 = vpop.permute.xlu1 %930 }
 0x231   : > { %v1076_v1 = vadd.f32 %v1075_v8, %v916_v42  ;;  %v1077_v33 = vpop.f32.mrb[37].mxu1 }
 0x232   : > { %v1078_v37 = vadd.f32 %v1077_v33, %v916_v42  ;;  %v1079_v52 = vpop.f32.mrb[38].mxu1  ;;  %1320 = vmatprep.subr.bf16.mxu0 %v1161_v61 }
 0x233   : > { %v1080_v28 = vadd.f32 %v1079_v52, %v921_v54  ;;  %v1081_v14 = vpop.f32.mrb[39].mxu1  ;;  %1321 = vmatpush1.bf16.msra.mxu0 %v1160_v32  ;;  %v1124_v20 = vmax.f32 %v1076_v1, 0.0 }
 0x234   : > { %v1082_v26 = vadd.f32 %v1081_v14, %v921_v54  ;;  %v1125_v55 = vmax.f32 %v1078_v37, 0.0 }
 0x235   : > { %v1126_v23 = vmax.f32 %v1080_v28, 0.0  ;;  %v936_v28 = vpop.permute.xlu0 %935 }
 0x236   : > { %v1127_v17 = vmax.f32 %v1082_v26, 0.0 }
 0x237   : > { %v1162_v27 = vpack.c.bf16 %v1126_v23, %v1124_v20 }
 0x238   : > { %v1163_v15 = vpack.c.bf16 %v1127_v17, %v1125_v55  ;;  %v1085_v13 = vpop.f32.mrb[40].mxu1  ;;  %v941_v55 = vpop.permute.xlu1 %940 }
 0x239   : > { %v1086_v29 = vadd.f32 %v1085_v13, %v926_v56  ;;  %v1087_v48 = vpop.f32.mrb[41].mxu1 }
 0x23a   : > { %v1088_v24 = vadd.f32 %v1087_v48, %v926_v56  ;;  %v1089_v8 = vpop.f32.mrb[42].mxu1  ;;  %1322 = vmatprep.subr.bf16.mxu0 %v1163_v15 }
 0x23b   : > { %v1090_v42 = vadd.f32 %v1089_v8, %v931_v31  ;;  %v1091_v61 = vpop.f32.mrb[43].mxu1  ;;  %1323 = vmatpush1.bf16.msra.mxu0 %v1162_v27  ;;  %v1128_v32 = vmax.f32 %v1086_v29, 0.0 }
 0x23c   : > { %v1092_v33 = vadd.f32 %v1091_v61, %v931_v31  ;;  %v1129_v1 = vmax.f32 %v1088_v24, 0.0  ;;  %v2438_v61 = vld [vmem:[%s3603_s5] sm:$0xff]  }
 0x23d   : > { %v1130_v54 = vmax.f32 %v1090_v42, 0.0 }
 0x23e   : > { %v1131_v52 = vmax.f32 %v1092_v33, 0.0  ;;  %v2439_v33 = vld [vmem:[%s3603_s5 + $0x8] sm:$0xff]  }
 0x23f   : > { %v1164_v37 = vpack.c.bf16 %v1130_v54, %v1128_v32  ;;  %v2440_v32 = vld [vmem:[%s3603_s5 + $0x10] sm:$0xff]   ;;  %v2441_v54 = vld [vmem:[%s3603_s5 + $0x18] sm:$0xff]  }
 0x240   : > { %v1165_v14 = vpack.c.bf16 %v1131_v52, %v1129_v1  ;;  %v1095_v26 = vpop.f32.mrb[44].mxu1  ;;  %v2442_v1 = vld [vmem:[%s3603_s5 + $0x20] sm:$0xff]   ;;  %v2443_v52 = vld [vmem:[%s3603_s5 + $0x28] sm:$0xff]  }
 0x241   : > { %v1096_v20 = vadd.f32 %v1095_v26, %v936_v28  ;;  %v1097_v23 = vpop.f32.mrb[45].mxu1 }
 0x242   : > { %v1098_v17 = vadd.f32 %v1097_v23, %v936_v28  ;;  %v1099_v13 = vpop.f32.mrb[46].mxu1  ;;  %1324 = vmatprep.subr.bf16.mxu0 %v1165_v14  ;;  %v2445_v28 = vld [vmem:[%s3603_s5 + $0x38] sm:$0xff]   ;;  %v1187_v14 = vpop.permute.xlu0 %1186 }
 0x243   : > { %v1100_v56 = vadd.f32 %v1099_v13, %v941_v55  ;;  %v1101_v15 = vpop.f32.mrb[47].mxu1  ;;  %1325 = vmatpush1.bf16.msra.mxu0 %v1164_v37  ;;  %v1132_v27 = vmax.f32 %v1096_v20, 0.0  ;;  %v2444_v37 = vld [vmem:[%s3603_s5 + $0x30] sm:$0xff]  }
 0x244   : > { %v1102_v48 = vadd.f32 %v1101_v15, %v941_v55  ;;  %v1133_v29 = vmax.f32 %v1098_v17, 0.0  ;;  %v1192_v55 = vpop.permute.xlu1 %1191 }
 0x245   : > { %v1134_v31 = vmax.f32 %v1100_v56, 0.0 }
 0x246   : > { %v1135_v8 = vmax.f32 %v1102_v48, 0.0 }
 0x247   : > { %v1166_v24 = vpack.c.bf16 %v1134_v31, %v1132_v27 }
 0x248   : > { %v1167_v42 = vpack.c.bf16 %v1135_v8, %v1133_v29 }
 0x24a   : > { %1326 = vmatprep.subr.bf16.mxu0 %v1167_v42  ;;  %v1197_v42 = vpop.permute.xlu0 %1196 }
 0x24b   : > { %1327 = vmatpush1.bf16.msra.mxu0 %v1166_v24 }
 0x24e   : > { %1345 = vmatmul.mubr.bf16.vlgmr.msra.gmra.mrb[16].mxu0 %v2438_v61  ;;  %v1207_v60 = vpop.permute.xlu0 %1206 }
 0x24f   : > { %1354 = vmatprep.mubr.bf16.mxu0 %v2526_v4 }
 0x256   : > { %1355 = vmatmul.mubr.bf16.gmra.mrb[20].mxu0 %v2439_v33 }
 0x257   : > { %1364 = vmatprep.mubr.bf16.mxu0 %v2526_v4 }
 0x25e   : > { %1365 = vmatmul.mubr.bf16.gmra.mrb[24].mxu0 %v2440_v32  ;;  %v1202_v32 = vpop.permute.xlu1 %1201 }
 0x25f   : > { %1374 = vmatprep.mubr.bf16.mxu0 %v2526_v4 }
 0x262   : > { %v1212_v0 = vpop.permute.xlu1 %1211 }
 0x266   : > { %1375 = vmatmul.mubr.bf16.gmra.mrb[28].mxu0 %v2441_v54 }
 0x267   : > { %1384 = vmatprep.mubr.bf16.mxu0 %v2526_v4 }
 0x26e   : > { %1385 = vmatmul.mubr.bf16.gmra.mrb[32].mxu0 %v2442_v1 }
 0x26f   : > { %1394 = vmatprep.mubr.bf16.mxu0 %v2526_v4 }
 0x276   : > { %1395 = vmatmul.mubr.bf16.gmra.mrb[36].mxu0 %v2443_v52 }
 0x277   : > { %1404 = vmatprep.mubr.bf16.mxu0 %v2526_v4 }
 0x27e   : > { %1405 = vmatmul.mubr.bf16.gmra.mrb[40].mxu0 %v2444_v37 }
 0x27f   : > { %1414 = vmatprep.mubr.bf16.mxu0 %v2526_v4 }
 0x286   : > { %1415 = vmatmul.mubr.bf16.gmra.mrb[44].mxu0 %v2445_v28 }
 0x287   : > { %2018 = vmatprep.mubr.bf16.mxu0 %v2526_v4 }
 0x321   : > { %v1346_v26 = vpop.f32.mrb[16].mxu0 }
 0x322   : > { %v1347_v20 = vadd.f32 %v1346_v26, %v1187_v14  ;;  %v1348_v23 = vpop.f32.mrb[17].mxu0  ;;  %v3670_v26 = vmax.f32 %v2983_v3, 0.0 }
 0x323   : > { %v1349_v17 = vadd.f32 %v1348_v23, %v1187_v14  ;;  %v1350_v13 = vpop.f32.mrb[18].mxu0 }
 0x324   : > { %v1351_v56 = vadd.f32 %v1350_v13, %v1192_v55  ;;  %v1352_v15 = vpop.f32.mrb[19].mxu0  ;;  %v3199_v31 = vadd.f32 %v1347_v20, %v783_v53 }
 0x325   : > { %v3195_v48 = vadd.f32 %v1349_v17, %v784_v50  ;;  %v1353_v27 = vadd.f32 %v1352_v15, %v1192_v55 }
 0x326   : > { %v3203_v29 = vadd.f32 %v1351_v56, %v785_v49  ;;  %v1457_v44 = vmax.f32 %v3199_v31, 0.0 }
 0x327   : > { %v3207_v8 = vadd.f32 %v1353_v27, %v786_v51  ;;  %v1458_v41 = vmax.f32 %v3195_v48, 0.0 }
 0x328   : > { %v1459_v24 = vmax.f32 %v3203_v29, 0.0 }
 0x329   : > { %v1460_v50 = vmax.f32 %v3207_v8, 0.0  ;;  %v1356_v61 = vpop.f32.mrb[20].mxu0 }
 0x32a   : > { %v1357_v53 = vadd.f32 %v1356_v61, %v1197_v42  ;;  %v1358_v33 = vpop.f32.mrb[21].mxu0  ;;  %v1505_v51 = vpack.c.bf16 %v1459_v24, %v1457_v44  ;;  %v3671_v61 = vmax.f32 %v2999_v18, 0.0  ;;  %v1217_v18 = vpop.permute.xlu0 %1216 }
 0x32b   : > { %v1359_v45 = vadd.f32 %v1358_v33, %v1197_v42  ;;  %v1360_v49 = vpop.f32.mrb[22].mxu0  ;;  %v1506_v47 = vpack.c.bf16 %v1460_v50, %v1458_v41 }
 0x32c   : > { %v1361_v54 = vadd.f32 %v1360_v49, %v1202_v32  ;;  %v1362_v1 = vpop.f32.mrb[23].mxu0  ;;  %v3227_v28 = vadd.f32 %v1357_v53, %v787_v9  ;;  %v3673_v49 = vmax.f32 %v3003_v22, 0.0  ;;  %v1222_v22 = vpop.permute.xlu1 %1221 }
 0x32d   : > { %v3223_v52 = vadd.f32 %v1359_v45, %v788_v7  ;;  %v1363_v37 = vadd.f32 %v1362_v1, %v1202_v32  ;;  %1665 = vmatprep.subr.bf16.mxu1 %v1506_v47  ;;  %v3672_v32 = vmax.f32 %v3001_v21, 0.0 }
 0x32e   : > { %v3231_v14 = vadd.f32 %v1361_v54, %v789_v6  ;;  %1666 = vmatpush1.bf16.msra.mxu1 %v1505_v51  ;;  %v1461_v63 = vmax.f32 %v3227_v28, 0.0  ;;  %v3674_v51 = vmax.f32 %v3005_v25, 0.0 }
 0x32f   : > { %v3235_v20 = vadd.f32 %v1363_v37, %v3670_v26  ;;  %v1462_v7 = vmax.f32 %v3223_v52, 0.0 }
 0x330   : > { %v1463_v23 = vmax.f32 %v3231_v14, 0.0 }
 0x331   : > { %v3663_v55 = vmax.f32 %v3235_v20, 0.0  ;;  %v1366_v17 = vpop.f32.mrb[24].mxu0 }
 0x332   : > { %v1367_v9 = vadd.f32 %v1366_v17, %v1207_v60  ;;  %v1368_v13 = vpop.f32.mrb[25].mxu0  ;;  %v1507_v15 = vpack.c.bf16 %v1463_v23, %v1461_v63 }
 0x333   : > { %v1369_v6 = vadd.f32 %v1368_v13, %v1207_v60  ;;  %v1370_v56 = vpop.f32.mrb[26].mxu0  ;;  %v1508_v3 = vpack.c.bf16 %v3663_v55, %v1462_v7 }
 0x334   : > { %v1371_v27 = vadd.f32 %v1370_v56, %v1212_v0  ;;  %v1372_v42 = vpop.f32.mrb[27].mxu0  ;;  %v3255_v45 = vadd.f32 %v1367_v9, %v3672_v32  ;;  %v3677_v32 = vmax.f32 %v3030_v59, 0.0  ;;  %v1232_v59 = vpop.permute.xlu1 %1231 }
 0x335   : > { %v3251_v53 = vadd.f32 %v1369_v6, %v3671_v61  ;;  %v1373_v33 = vadd.f32 %v1372_v42, %v1212_v0  ;;  %1667 = vmatprep.subr.bf16.mxu1 %v1508_v3  ;;  %v3676_v61 = vmax.f32 %v3027_v57, 0.0 }
 0x336   : > { %v3259_v47 = vadd.f32 %v1371_v27, %v3673_v49  ;;  %1668 = vmatpush1.bf16.msra.mxu1 %v1507_v15  ;;  %v3662_v21 = vmax.f32 %v3255_v45, 0.0  ;;  %v3675_v15 = vmax.f32 %v3025_v46, 0.0  ;;  %v1227_v46 = vpop.permute.xlu0 %1226  ;;  %v3696_v14 = vmax.f32 %v3255_v45, 0.0 }
 0x337   : > { %v3263_v54 = vadd.f32 %v1373_v33, %v3674_v51  ;;  %v3661_v37 = vmax.f32 %v3251_v53, 0.0  ;;  %v3678_v51 = vmax.f32 %v3036_v2, 0.0 }
 0x338   : > { %v3660_v1 = vmax.f32 %v3259_v47, 0.0 }
 0x339   : > { %v3659_v26 = vmax.f32 %v3263_v54, 0.0  ;;  %v1376_v60 = vpop.f32.mrb[28].mxu0 }
 0x33a   : > { %v1377_v17 = vadd.f32 %v1376_v60, %v1217_v18  ;;  %v1378_v9 = vpop.f32.mrb[29].mxu0  ;;  %v1509_v6 = vpack.c.bf16 %v3660_v1, %v3662_v21 }
 0x33b   : > { %v1379_v13 = vadd.f32 %v1378_v9, %v1217_v18  ;;  %v1380_v0 = vpop.f32.mrb[30].mxu0  ;;  %v1510_v25 = vpack.c.bf16 %v3659_v26, %v3661_v37 }
 0x33c   : > { %v1381_v56 = vadd.f32 %v1380_v0, %v1222_v22  ;;  %v1382_v3 = vpop.f32.mrb[31].mxu0  ;;  %v3283_v33 = vadd.f32 %v1377_v17, %v3676_v61 }
 0x33d   : > { %v3279_v27 = vadd.f32 %v1379_v13, %v3675_v15  ;;  %v1383_v42 = vadd.f32 %v1382_v3, %v1222_v22  ;;  %1669 = vmatprep.subr.bf16.mxu1 %v1510_v25 }
 0x33e   : > { %v3287_v49 = vadd.f32 %v1381_v56, %v3677_v32  ;;  %1670 = vmatpush1.bf16.msra.mxu1 %v1509_v6  ;;  %v3658_v57 = vmax.f32 %v3283_v33, 0.0 }
 0x33f   : > { %v3291_v18 = vadd.f32 %v1383_v42, %v3678_v51  ;;  %v3641_v9 = vmax.f32 %v3279_v27, 0.0  ;;  %v3679_v42 = vmax.f32 %v3017_v35, 0.0  ;;  %v3680_v51 = vmax.f32 %v3033_v62, 0.0  ;;  %v1237_v35 = vpop.permute.xlu0 %1236 }
 0x340   : > { %v3640_v60 = vmax.f32 %v3287_v49, 0.0 }
 0x341   : > { %v3639_v22 = vmax.f32 %v3291_v18, 0.0  ;;  %v1386_v13 = vpop.f32.mrb[32].mxu0 }
 0x342   : > { %v1387_v17 = vadd.f32 %v1386_v13, %v1227_v46  ;;  %v1388_v0 = vpop.f32.mrb[33].mxu0  ;;  %v1511_v6 = vpack.c.bf16 %v3640_v60, %v3658_v57  ;;  %v3681_v13 = vmax.f32 %v3040_v12, 0.0  ;;  %v1242_v12 = vpop.permute.xlu1 %1241 }
 0x343   : > { %v1389_v25 = vadd.f32 %v1388_v0, %v1227_v46  ;;  %v1390_v56 = vpop.f32.mrb[34].mxu0  ;;  %v1512_v2 = vpack.c.bf16 %v3639_v22, %v3641_v9  ;;  %v3682_v22 = vmax.f32 %v3019_v36, 0.0  ;;  %v3685_v9 = vmax.f32 %v3061_v34, 0.0 }
 0x344   : > { %v1391_v3 = vadd.f32 %v1390_v56, %v1232_v59  ;;  %v1392_v15 = vpop.f32.mrb[35].mxu0  ;;  %v3311_v46 = vadd.f32 %v1387_v17, %v3680_v51  ;;  %v3683_v51 = vmax.f32 %v3044_v16, 0.0  ;;  %v1247_v16 = vpop.permute.xlu0 %1246 }
 0x345   : > { %v3307_v61 = vadd.f32 %v1389_v25, %v3679_v42  ;;  %v1393_v32 = vadd.f32 %v1392_v15, %v1232_v59  ;;  %1671 = vmatprep.subr.bf16.mxu1 %v1512_v2 }
 0x346   : > { %v3315_v0 = vadd.f32 %v1391_v3, %v3681_v13  ;;  %1672 = vmatpush1.bf16.msra.mxu1 %v1511_v6  ;;  %v3645_v62 = vmax.f32 %v3311_v46, 0.0  ;;  %v1252_v34 = vpop.permute.xlu1 %1251 }
 0x347   : > { %v3319_v60 = vadd.f32 %v1393_v32, %v3682_v22  ;;  %v3643_v25 = vmax.f32 %v3307_v61, 0.0 }
 0x348   : > { %v3644_v56 = vmax.f32 %v3315_v0, 0.0 }
 0x349   : > { %v3642_v59 = vmax.f32 %v3319_v60, 0.0  ;;  %v1396_v2 = vpop.f32.mrb[36].mxu0 }
 0x34a   : > { %v1397_v17 = vadd.f32 %v1396_v2, %v1237_v35  ;;  %v1398_v15 = vpop.f32.mrb[37].mxu0  ;;  %v1513_v22 = vpack.c.bf16 %v3644_v56, %v3645_v62  ;;  %v3689_v62 = vmax.f32 %v3083_v11, 0.0  ;;  %v1262_v11 = vpop.permute.xlu1 %1261 }
 0x34b   : > { %v1399_v3 = vadd.f32 %v1398_v15, %v1237_v35  ;;  %v1400_v42 = vpop.f32.mrb[38].mxu0  ;;  %v1514_v36 = vpack.c.bf16 %v3642_v59, %v3643_v25  ;;  %v3684_v35 = vmax.f32 %v3058_v5, 0.0  ;;  %v3686_v25 = vmax.f32 %v3046_v19, 0.0 }
 0x34c   : > { %v1401_v6 = vadd.f32 %v1400_v42, %v1242_v12  ;;  %v1402_v32 = vpop.f32.mrb[39].mxu0 }
 0x34d   : > { %v3335_v13 = vadd.f32 %v1399_v3, %v3683_v51  ;;  %v1403_v2 = vadd.f32 %v1402_v32, %v1242_v12  ;;  %1673 = vmatprep.subr.bf16.mxu1 %v1514_v36  ;;  %v3339_v15 = vadd.f32 %v1397_v17, %v3684_v35 }
 0x34e   : > { %v3343_v59 = vadd.f32 %v1401_v6, %v3685_v9  ;;  %1674 = vmatpush1.bf16.msra.mxu1 %v1513_v22 }
 0x34f   : > { %v3347_v56 = vadd.f32 %v1403_v2, %v3686_v25  ;;  %v3647_v3 = vmax.f32 %v3335_v13, 0.0  ;;  %v3649_v5 = vmax.f32 %v3339_v15, 0.0  ;;  %v3687_v2 = vmax.f32 %v3075_v58, 0.0  ;;  %v1257_v58 = vpop.permute.xlu0 %1256 }
 0x350   : > { %v3648_v42 = vmax.f32 %v3343_v59, 0.0 }
 0x351   : > { %v3646_v12 = vmax.f32 %v3347_v56, 0.0  ;;  %v1406_v36 = vpop.f32.mrb[40].mxu0 }
 0x352   : > { %v1407_v17 = vadd.f32 %v1406_v36, %v1247_v16  ;;  %v1408_v32 = vpop.f32.mrb[41].mxu0  ;;  %v1515_v25 = vpack.c.bf16 %v3648_v42, %v3649_v5  ;;  %v3693_v5 = vmax.f32 %v3103_v40, 0.0 }
 0x353   : > { %v1409_v9 = vadd.f32 %v1408_v32, %v1247_v16  ;;  %v1410_v6 = vpop.f32.mrb[42].mxu0  ;;  %v1516_v19 = vpack.c.bf16 %v3646_v12, %v3647_v3  ;;  %v3688_v16 = vmax.f32 %v3093_v39, 0.0  ;;  %v3690_v3 = vmax.f32 %v3073_v38, 0.0 }
 0x354   : > { %v1411_v22 = vadd.f32 %v1410_v6, %v1252_v34  ;;  %v1412_v51 = vpop.f32.mrb[43].mxu0 }
 0x355   : > { %v3363_v35 = vadd.f32 %v1409_v9, %v3687_v2  ;;  %v1413_v36 = vadd.f32 %v1412_v51, %v1252_v34  ;;  %1675 = vmatprep.subr.bf16.mxu1 %v1516_v19  ;;  %v3367_v32 = vadd.f32 %v1407_v17, %v3688_v16 }
 0x356   : > { %v3371_v12 = vadd.f32 %v1411_v22, %v3689_v62  ;;  %1676 = vmatpush1.bf16.msra.mxu1 %v1515_v25 }
 0x357   : > { %v3375_v42 = vadd.f32 %v1413_v36, %v3690_v3  ;;  %v3651_v9 = vmax.f32 %v3363_v35, 0.0  ;;  %v3657_v39 = vmax.f32 %v3367_v32, 0.0  ;;  %v3691_v36 = vmax.f32 %v3096_v30, 0.0 }
 0x358   : > { %v3652_v6 = vmax.f32 %v3371_v12, 0.0 }
 0x359   : > { %v3650_v34 = vmax.f32 %v3375_v42, 0.0  ;;  %v1416_v19 = vpop.f32.mrb[44].mxu0 }
 0x35a   : > { %v1417_v17 = vadd.f32 %v1416_v19, %v1257_v58  ;;  %v1418_v51 = vpop.f32.mrb[45].mxu0  ;;  %v1517_v3 = vpack.c.bf16 %v3652_v6, %v3657_v39 }
 0x35b   : > { %v1419_v62 = vadd.f32 %v1418_v51, %v1257_v58  ;;  %v1420_v22 = vpop.f32.mrb[46].mxu0  ;;  %v1518_v38 = vpack.c.bf16 %v3650_v34, %v3651_v9  ;;  %v3692_v58 = vmax.f32 %v3112_v10, 0.0  ;;  %v3694_v9 = vmax.f32 %v3090_v43, 0.0  ;;  %v2446_v10 = vld [vmem:[%s3605_s7] sm:$0xff]  }
 0x35c   : > { %v1421_v25 = vadd.f32 %v1420_v22, %v1262_v11  ;;  %v1422_v2 = vpop.f32.mrb[47].mxu0 }
 0x35d   : > { %v3391_v16 = vadd.f32 %v1419_v62, %v3691_v36  ;;  %v1423_v19 = vadd.f32 %v1422_v2, %v1262_v11  ;;  %1677 = vmatprep.subr.bf16.mxu1 %v1518_v38  ;;  %v3395_v51 = vadd.f32 %v1417_v17, %v3692_v58  ;;  %v2449_v17 = vld [vmem:[%s3605_s7 + $0x18] sm:$0xff]   ;;  %v2450_v38 = vld [vmem:[%s3605_s7 + $0x20] sm:$0xff]   ;;  %v1540_v36 = vpop.permute.xlu0 %1539 }
 0x35e   : > { %v3399_v34 = vadd.f32 %v1421_v25, %v3693_v5  ;;  %1678 = vmatpush1.bf16.msra.mxu1 %v1517_v3  ;;  %v2447_v5 = vld [vmem:[%s3605_s7 + $0x8] sm:$0xff]   ;;  %v2452_v25 = vld [vmem:[%s3605_s7 + $0x30] sm:$0xff]   ;;  %v2453_v2 = vld [vmem:[%s3605_s7 + $0x38] sm:$0xff]  }
 0x35f   : > { %v3403_v6 = vadd.f32 %v1423_v19, %v3694_v9  ;;  %v3655_v30 = vmax.f32 %v3391_v16, 0.0  ;;  %v3656_v62 = vmax.f32 %v3395_v51, 0.0  ;;  %v2448_v9 = vld [vmem:[%s3605_s7 + $0x10] sm:$0xff]   ;;  %v2451_v3 = vld [vmem:[%s3605_s7 + $0x28] sm:$0xff]  }
 0x360   : > { %v3654_v22 = vmax.f32 %v3399_v34, 0.0 }
 0x361   : > { %v3653_v11 = vmax.f32 %v3403_v6, 0.0 }
 0x362   : > { %v1519_v43 = vpack.c.bf16 %v3654_v22, %v3656_v62  ;;  %v1550_v62 = vpop.permute.xlu0 %1549 }
 0x363   : > { %v1520_v40 = vpack.c.bf16 %v3653_v11, %v3655_v30 }
 0x365   : > { %1679 = vmatprep.subr.bf16.mxu1 %v1520_v40 }
 0x366   : > { %1680 = vmatpush1.bf16.msra.mxu1 %v1519_v43  ;;  %v1545_v43 = vpop.permute.xlu1 %1544 }
 0x369   : > { %1698 = vmatmul.mubr.bf16.vlgmr.msra.gmra.mrb[48].mxu1 %v2446_v10 }
 0x36a   : > { %1707 = vmatprep.mubr.bf16.mxu1 %v2526_v4  ;;  %v1555_v1 = vpop.permute.xlu1 %1554 }
 0x371   : > { %1708 = vmatmul.mubr.bf16.gmra.mrb[52].mxu1 %v2447_v5 }
 0x372   : > { %1717 = vmatprep.mubr.bf16.mxu1 %v2526_v4 }
 0x379   : > { %1718 = vmatmul.mubr.bf16.gmra.mrb[56].mxu1 %v2448_v9 }
 0x37a   : > { %1727 = vmatprep.mubr.bf16.mxu1 %v2526_v4 }
 0x381   : > { %1728 = vmatmul.mubr.bf16.gmra.mrb[60].mxu1 %v2449_v17 }
 0x382   : > { %1737 = vmatprep.mubr.bf16.mxu1 %v2526_v4 }
 0x389   : > { %1738 = vmatmul.mubr.bf16.gmra.mrb[64].mxu1 %v2450_v38 }
 0x38a   : > { %1747 = vmatprep.mubr.bf16.mxu1 %v2526_v4 }
 0x391   : > { %1748 = vmatmul.mubr.bf16.gmra.mrb[68].mxu1 %v2451_v3 }
 0x392   : > { %1757 = vmatprep.mubr.bf16.mxu1 %v2526_v4 }
 0x399   : > { %1758 = vmatmul.mubr.bf16.gmra.mrb[72].mxu1 %v2452_v25 }
 0x39a   : > { %1767 = vmatprep.mubr.bf16.mxu1 %v2526_v4 }
 0x3a1   : > { %1768 = vmatmul.mubr.bf16.gmra.mrb[76].mxu1 %v2453_v2 }
 0x3a2   : > { %2218 = vmatprep.mubr.bf16.mxu1 %v2526_v4 }
 0x43c   : > { %v1699_v19 = vpop.f32.mrb[48].mxu1 }
 0x43d   : > { %v1700_v58 = vadd.f32 %v1699_v19, %v1540_v36  ;;  %v1701_v40 = vpop.f32.mrb[49].mxu1 }
 0x43e   : > { %v1702_v10 = vadd.f32 %v1701_v40, %v1540_v36  ;;  %v1703_v5 = vpop.f32.mrb[50].mxu1 }
 0x43f   : > { %v1704_v9 = vadd.f32 %v1703_v5, %v1545_v43  ;;  %v1705_v17 = vpop.f32.mrb[51].mxu1  ;;  %v1778_v3 = vmax.f32 %v1700_v58, 0.0 }
 0x440   : > { %v1706_v38 = vadd.f32 %v1705_v17, %v1545_v43  ;;  %v1779_v11 = vmax.f32 %v1702_v10, 0.0  ;;  %v1560_v17 = vpop.permute.xlu0 %1559 }
 0x441   : > { %v1780_v25 = vmax.f32 %v1704_v9, 0.0 }
 0x442   : > { %v1781_v22 = vmax.f32 %v1706_v38, 0.0 }
 0x443   : > { %v1826_v30 = vpack.c.bf16 %v1780_v25, %v1778_v3  ;;  %v1565_v25 = vpop.permute.xlu1 %1564 }
 0x444   : > { %v1827_v39 = vpack.c.bf16 %v1781_v22, %v1779_v11  ;;  %v1709_v2 = vpop.f32.mrb[52].mxu1 }
 0x445   : > { %v1710_v57 = vadd.f32 %v1709_v2, %v1550_v62  ;;  %v1711_v26 = vpop.f32.mrb[53].mxu1 }
 0x446   : > { %v1712_v37 = vadd.f32 %v1711_v26, %v1550_v62  ;;  %v1713_v19 = vpop.f32.mrb[54].mxu1  ;;  %1986 = vmatprep.subr.bf16.mxu0 %v1827_v39 }
 0x447   : > { %v1714_v21 = vadd.f32 %v1713_v19, %v1555_v1  ;;  %v1715_v36 = vpop.f32.mrb[55].mxu1  ;;  %1987 = vmatpush1.bf16.msra.mxu0 %v1826_v30  ;;  %v1782_v5 = vmax.f32 %v1710_v57, 0.0  ;;  %v1570_v19 = vpop.permute.xlu0 %1569 }
 0x448   : > { %v1716_v40 = vadd.f32 %v1715_v36, %v1555_v1  ;;  %v1783_v58 = vmax.f32 %v1712_v37, 0.0 }
 0x449   : > { %v1784_v43 = vmax.f32 %v1714_v21, 0.0 }
 0x44a   : > { %v1785_v9 = vmax.f32 %v1716_v40, 0.0 }
 0x44b   : > { %v1828_v10 = vpack.c.bf16 %v1784_v43, %v1782_v5 }
 0x44c   : > { %v1829_v38 = vpack.c.bf16 %v1785_v9, %v1783_v58  ;;  %v1719_v3 = vpop.f32.mrb[56].mxu1  ;;  %v1575_v58 = vpop.permute.xlu1 %1574 }
 0x44d   : > { %v1720_v22 = vadd.f32 %v1719_v3, %v1560_v17  ;;  %v1721_v11 = vpop.f32.mrb[57].mxu1 }
 0x44e   : > { %v1722_v2 = vadd.f32 %v1721_v11, %v1560_v17  ;;  %v1723_v55 = vpop.f32.mrb[58].mxu1  ;;  %1988 = vmatprep.subr.bf16.mxu0 %v1829_v38 }
 0x44f   : > { %v1724_v26 = vadd.f32 %v1723_v55, %v1565_v25  ;;  %v1725_v39 = vpop.f32.mrb[59].mxu1  ;;  %1989 = vmatpush1.bf16.msra.mxu0 %v1828_v10  ;;  %v1786_v30 = vmax.f32 %v1720_v22, 0.0 }
 0x450   : > { %v1726_v62 = vadd.f32 %v1725_v39, %v1565_v25  ;;  %v1787_v57 = vmax.f32 %v1722_v2, 0.0 }
 0x451   : > { %v1788_v1 = vmax.f32 %v1724_v26, 0.0  ;;  %v1580_v26 = vpop.permute.xlu0 %1579 }
 0x452   : > { %v1789_v21 = vmax.f32 %v1726_v62, 0.0 }
 0x453   : > { %v1830_v37 = vpack.c.bf16 %v1788_v1, %v1786_v30 }
 0x454   : > { %v1831_v36 = vpack.c.bf16 %v1789_v21, %v1787_v57  ;;  %v1729_v40 = vpop.f32.mrb[60].mxu1  ;;  %v1585_v57 = vpop.permute.xlu1 %1584 }
 0x455   : > { %v1730_v5 = vadd.f32 %v1729_v40, %v1570_v19  ;;  %v1731_v43 = vpop.f32.mrb[61].mxu1 }
 0x456   : > { %v1732_v9 = vadd.f32 %v1731_v43, %v1570_v19  ;;  %v1733_v3 = vpop.f32.mrb[62].mxu1  ;;  %1990 = vmatprep.subr.bf16.mxu0 %v1831_v36 }
 0x457   : > { %v1734_v17 = vadd.f32 %v1733_v3, %v1575_v58  ;;  %v1735_v38 = vpop.f32.mrb[63].mxu1  ;;  %1991 = vmatpush1.bf16.msra.mxu0 %v1830_v37  ;;  %v1790_v10 = vmax.f32 %v1730_v5, 0.0 }
 0x458   : > { %v1736_v55 = vadd.f32 %v1735_v38, %v1575_v58  ;;  %v1791_v22 = vmax.f32 %v1732_v9, 0.0 }
 0x459   : > { %v1792_v11 = vmax.f32 %v1734_v17, 0.0  ;;  %v1590_v17 = vpop.permute.xlu0 %1589 }
 0x45a   : > { %v1793_v25 = vmax.f32 %v1736_v55, 0.0 }
 0x45b   : > { %v1832_v2 = vpack.c.bf16 %v1792_v11, %v1790_v10 }
 0x45c   : > { %v1833_v39 = vpack.c.bf16 %v1793_v25, %v1791_v22  ;;  %v1739_v62 = vpop.f32.mrb[64].mxu1  ;;  %v1595_v22 = vpop.permute.xlu1 %1594 }
 0x45d   : > { %v1740_v30 = vadd.f32 %v1739_v62, %v1580_v26  ;;  %v1741_v1 = vpop.f32.mrb[65].mxu1 }
 0x45e   : > { %v1742_v21 = vadd.f32 %v1741_v1, %v1580_v26  ;;  %v1743_v40 = vpop.f32.mrb[66].mxu1  ;;  %1992 = vmatprep.subr.bf16.mxu0 %v1833_v39 }
 0x45f   : > { %v1744_v19 = vadd.f32 %v1743_v40, %v1585_v57  ;;  %v1745_v36 = vpop.f32.mrb[67].mxu1  ;;  %1993 = vmatpush1.bf16.msra.mxu0 %v1832_v2  ;;  %v1794_v37 = vmax.f32 %v1740_v30, 0.0 }
 0x460   : > { %v1746_v43 = vadd.f32 %v1745_v36, %v1585_v57  ;;  %v1795_v5 = vmax.f32 %v1742_v21, 0.0 }
 0x461   : > { %v1796_v58 = vmax.f32 %v1744_v19, 0.0  ;;  %v1600_v19 = vpop.permute.xlu0 %1599 }
 0x462   : > { %v1797_v3 = vmax.f32 %v1746_v43, 0.0 }
 0x463   : > { %v1834_v9 = vpack.c.bf16 %v1796_v58, %v1794_v37 }
 0x464   : > { %v1835_v38 = vpack.c.bf16 %v1797_v3, %v1795_v5  ;;  %v1749_v55 = vpop.f32.mrb[68].mxu1  ;;  %v1605_v5 = vpop.permute.xlu1 %1604 }
 0x465   : > { %v1750_v10 = vadd.f32 %v1749_v55, %v1590_v17  ;;  %v1751_v11 = vpop.f32.mrb[69].mxu1 }
 0x466   : > { %v1752_v25 = vadd.f32 %v1751_v11, %v1590_v17  ;;  %v1753_v62 = vpop.f32.mrb[70].mxu1  ;;  %1994 = vmatprep.subr.bf16.mxu0 %v1835_v38 }
 0x467   : > { %v1754_v26 = vadd.f32 %v1753_v62, %v1595_v22  ;;  %v1755_v39 = vpop.f32.mrb[71].mxu1  ;;  %1995 = vmatpush1.bf16.msra.mxu0 %v1834_v9  ;;  %v1798_v2 = vmax.f32 %v1750_v10, 0.0 }
 0x468   : > { %v1756_v1 = vadd.f32 %v1755_v39, %v1595_v22  ;;  %v1799_v30 = vmax.f32 %v1752_v25, 0.0 }
 0x469   : > { %v1800_v57 = vmax.f32 %v1754_v26, 0.0  ;;  %v1610_v26 = vpop.permute.xlu0 %1609 }
 0x46a   : > { %v1801_v40 = vmax.f32 %v1756_v1, 0.0 }
 0x46b   : > { %v1836_v21 = vpack.c.bf16 %v1800_v57, %v1798_v2 }
 0x46c   : > { %v1837_v36 = vpack.c.bf16 %v1801_v40, %v1799_v30  ;;  %v1759_v43 = vpop.f32.mrb[72].mxu1  ;;  %v1615_v30 = vpop.permute.xlu1 %1614 }
 0x46d   : > { %v1760_v37 = vadd.f32 %v1759_v43, %v1600_v19  ;;  %v1761_v58 = vpop.f32.mrb[73].mxu1 }
 0x46e   : > { %v1762_v3 = vadd.f32 %v1761_v58, %v1600_v19  ;;  %v1763_v55 = vpop.f32.mrb[74].mxu1  ;;  %1996 = vmatprep.subr.bf16.mxu0 %v1837_v36 }
 0x46f   : > { %v1764_v17 = vadd.f32 %v1763_v55, %v1605_v5  ;;  %v1765_v38 = vpop.f32.mrb[75].mxu1  ;;  %1997 = vmatpush1.bf16.msra.mxu0 %v1836_v21  ;;  %v1802_v9 = vmax.f32 %v1760_v37, 0.0 }
 0x470   : > { %v1766_v11 = vadd.f32 %v1765_v38, %v1605_v5  ;;  %v1803_v10 = vmax.f32 %v1762_v3, 0.0  ;;  %v2454_v38 = vld [vmem:[%s3607_s9] sm:$0xff]  }
 0x471   : > { %v1804_v22 = vmax.f32 %v1764_v17, 0.0 }
 0x472   : > { %v1805_v62 = vmax.f32 %v1766_v11, 0.0  ;;  %v2455_v11 = vld [vmem:[%s3607_s9 + $0x8] sm:$0xff]  }
 0x473   : > { %v1838_v25 = vpack.c.bf16 %v1804_v22, %v1802_v9  ;;  %v2456_v9 = vld [vmem:[%s3607_s9 + $0x10] sm:$0xff]   ;;  %v2457_v22 = vld [vmem:[%s3607_s9 + $0x18] sm:$0xff]  }
 0x474   : > { %v1839_v39 = vpack.c.bf16 %v1805_v62, %v1803_v10  ;;  %v1769_v1 = vpop.f32.mrb[76].mxu1  ;;  %v2458_v10 = vld [vmem:[%s3607_s9 + $0x20] sm:$0xff]   ;;  %v2459_v62 = vld [vmem:[%s3607_s9 + $0x28] sm:$0xff]  }
 0x475   : > { %v1770_v2 = vadd.f32 %v1769_v1, %v1610_v26  ;;  %v1771_v57 = vpop.f32.mrb[77].mxu1 }
 0x476   : > { %v1772_v40 = vadd.f32 %v1771_v57, %v1610_v26  ;;  %v1773_v43 = vpop.f32.mrb[78].mxu1  ;;  %1998 = vmatprep.subr.bf16.mxu0 %v1839_v39  ;;  %v2461_v26 = vld [vmem:[%s3607_s9 + $0x38] sm:$0xff]   ;;  %v1861_v39 = vpop.permute.xlu0 %1860 }
 0x477   : > { %v1774_v19 = vadd.f32 %v1773_v43, %v1615_v30  ;;  %v1775_v36 = vpop.f32.mrb[79].mxu1  ;;  %1999 = vmatpush1.bf16.msra.mxu0 %v1838_v25  ;;  %v1806_v21 = vmax.f32 %v1770_v2, 0.0  ;;  %v2460_v25 = vld [vmem:[%s3607_s9 + $0x30] sm:$0xff]  }
 0x478   : > { %v1776_v58 = vadd.f32 %v1775_v36, %v1615_v30  ;;  %v1807_v37 = vmax.f32 %v1772_v40, 0.0  ;;  %v1866_v30 = vpop.permute.xlu1 %1865 }
 0x479   : > { %v1808_v5 = vmax.f32 %v1774_v19, 0.0 }
 0x47a   : > { %v1809_v55 = vmax.f32 %v1776_v58, 0.0 }
 0x47b   : > { %v1840_v3 = vpack.c.bf16 %v1808_v5, %v1806_v21 }
 0x47c   : > { %v1841_v17 = vpack.c.bf16 %v1809_v55, %v1807_v37 }
 0x47e   : > { %2000 = vmatprep.subr.bf16.mxu0 %v1841_v17  ;;  %v1871_v17 = vpop.permute.xlu0 %1870 }
 0x47f   : > { %2001 = vmatpush1.bf16.msra.mxu0 %v1840_v3 }
 0x482   : > { %2019 = vmatmul.mubr.bf16.vlgmr.msra.gmra.mrb[48].mxu0 %v2454_v38 }
 0x483   : > { %2028 = vmatprep.mubr.bf16.mxu0 %v2526_v4 }
 0x48a   : > { %2029 = vmatmul.mubr.bf16.gmra.mrb[52].mxu0 %v2455_v11 }
 0x48b   : > { %2038 = vmatprep.mubr.bf16.mxu0 %v2526_v4 }
 0x492   : > { %2039 = vmatmul.mubr.bf16.gmra.mrb[56].mxu0 %v2456_v9 }
 0x493   : > { %2048 = vmatprep.mubr.bf16.mxu0 %v2526_v4 }
 0x49a   : > { %2049 = vmatmul.mubr.bf16.gmra.mrb[60].mxu0 %v2457_v22 }
 0x49b   : > { %2058 = vmatprep.mubr.bf16.mxu0 %v2526_v4 }
 0x4a2   : > { %2059 = vmatmul.mubr.bf16.gmra.mrb[64].mxu0 %v2458_v10  ;;  %v1876_v10 = vpop.permute.xlu1 %1875 }
 0x4a3   : > { %2068 = vmatprep.mubr.bf16.mxu0 %v2526_v4 }
 0x4a6   : > { %v1886_v52 = vpop.permute.xlu1 %1885 }
 0x4aa   : > { %2069 = vmatmul.mubr.bf16.gmra.mrb[68].mxu0 %v2459_v62 }
 0x4ab   : > { %2078 = vmatprep.mubr.bf16.mxu0 %v2526_v4 }
 0x4b2   : > { %2079 = vmatmul.mubr.bf16.gmra.mrb[72].mxu0 %v2460_v25 }
 0x4b3   : > { %2088 = vmatprep.mubr.bf16.mxu0 %v2526_v4 }
 0x4ba   : > { %2089 = vmatmul.mubr.bf16.gmra.mrb[76].mxu0 %v2461_v26 }
 0x555   : > { %v2020_v1 = vpop.f32.mrb[48].mxu0 }
 0x556   : > { %v2021_v2 = vadd.f32 %v2020_v1, %v1861_v39  ;;  %v2022_v57 = vpop.f32.mrb[49].mxu0 }
 0x557   : > { %v2023_v40 = vadd.f32 %v2022_v57, %v1861_v39  ;;  %v2024_v43 = vpop.f32.mrb[50].mxu0  ;;  %v3695_v39 = vmax.f32 %v3235_v20, 0.0  ;;  %v3697_v20 = vmax.f32 %v3251_v53, 0.0  ;;  %v1896_v53 = vpop.permute.xlu1 %1895 }
 0x558   : > { %v2099_v19 = vadd.f32 %v2021_v2, %v1457_v44  ;;  %v2025_v36 = vadd.f32 %v2024_v43, %v1866_v30  ;;  %v2026_v58 = vpop.f32.mrb[51].mxu0 }
 0x559   : > { %v2100_v4 = vadd.f32 %v2023_v40, %v1458_v41  ;;  %v2027_v21 = vadd.f32 %v2026_v58, %v1866_v30  ;;  %v1881_v30 = vpop.permute.xlu0 %1880 }
 0x55a   : > { %v2101_v5 = vadd.f32 %v2025_v36, %v1459_v24  ;;  %v2131_v55 = vmax.f32 %v2099_v19, 0.0 }
 0x55b   : > { %v2102_v37 = vadd.f32 %v2027_v21, %v1460_v50  ;;  %v2132_v38 = vmax.f32 %v2100_v4, 0.0 }
 0x55c   : > { %v2133_v3 = vmax.f32 %v2101_v5, 0.0 }
 0x55d   : > { %v2134_v11 = vmax.f32 %v2102_v37, 0.0  ;;  %v2030_v9 = vpop.f32.mrb[52].mxu0 }
 0x55e   : > { %v2164_v31 = vpack.c.bf16 %v2133_v3, %v2131_v55  ;;  %v2031_v44 = vadd.f32 %v2030_v9, %v1871_v17  ;;  %v2032_v22 = vpop.f32.mrb[53].mxu0  ;;  %v3698_v3 = vmax.f32 %v3259_v47, 0.0  ;;  %v3700_v47 = vmax.f32 %v3283_v33, 0.0 }
 0x55f   : > { %v2033_v62 = vadd.f32 %v2032_v22, %v1871_v17  ;;  %v2034_v48 = vpop.f32.mrb[54].mxu0  ;;  %v2165_v41 = vpack.c.bf16 %v2134_v11, %v2132_v38  ;;  %v3699_v38 = vmax.f32 %v3263_v54, 0.0  ;;  %v3701_v54 = vmax.f32 %v3279_v27, 0.0  ;;  %v1906_v27 = vpop.permute.xlu1 %1905 }
 0x560   : > { %v2103_v29 = vadd.f32 %v2031_v44, %v1461_v63  ;;  %v2035_v24 = vadd.f32 %v2034_v48, %v1876_v10  ;;  %v2036_v25 = vpop.f32.mrb[55].mxu0  ;;  %v1891_v44 = vpop.permute.xlu0 %1890 }
 0x561   : > { %v2104_v8 = vadd.f32 %v2033_v62, %v1462_v7  ;;  %v2037_v50 = vadd.f32 %v2036_v25, %v1876_v10  ;;  %2186 = vmatprep.subr.bf16.mxu1 %v2165_v41 }
 0x562   : > { %v2105_v26 = vadd.f32 %v2035_v24, %v1463_v23  ;;  %2187 = vmatpush1.bf16.msra.mxu1 %v2164_v31  ;;  %v2135_v2 = vmax.f32 %v2103_v29, 0.0 }
 0x563   : > { %v2106_v1 = vadd.f32 %v2037_v50, %v3695_v39  ;;  %v2136_v40 = vmax.f32 %v2104_v8, 0.0 }
 0x564   : > { %v2137_v57 = vmax.f32 %v2105_v26, 0.0 }
 0x565   : > { %v2138_v28 = vmax.f32 %v2106_v1, 0.0  ;;  %v2040_v63 = vpop.f32.mrb[56].mxu0 }
 0x566   : > { %v2166_v43 = vpack.c.bf16 %v2137_v57, %v2135_v2  ;;  %v2041_v19 = vadd.f32 %v2040_v63, %v1881_v30  ;;  %v2042_v36 = vpop.f32.mrb[57].mxu0  ;;  %v3702_v2 = vmax.f32 %v3287_v49, 0.0  ;;  %v3704_v49 = vmax.f32 %v3311_v46, 0.0 }
 0x567   : > { %v2043_v7 = vadd.f32 %v2042_v36, %v1881_v30  ;;  %v2044_v58 = vpop.f32.mrb[58].mxu0  ;;  %v2167_v4 = vpack.c.bf16 %v2138_v28, %v2136_v40  ;;  %v3703_v30 = vmax.f32 %v3291_v18, 0.0  ;;  %v3705_v18 = vmax.f32 %v3307_v61, 0.0  ;;  %v1916_v61 = vpop.permute.xlu1 %1915 }
 0x568   : > { %v2107_v23 = vadd.f32 %v2041_v19, %v3696_v14  ;;  %v2045_v21 = vadd.f32 %v2044_v58, %v1886_v52  ;;  %v2046_v5 = vpop.f32.mrb[59].mxu0 }
 0x569   : > { %v2108_v37 = vadd.f32 %v2043_v7, %v3697_v20  ;;  %v2047_v55 = vadd.f32 %v2046_v5, %v1886_v52  ;;  %2188 = vmatprep.subr.bf16.mxu1 %v2167_v4 }
 0x56a   : > { %v2109_v17 = vadd.f32 %v2045_v21, %v3698_v3  ;;  %2189 = vmatpush1.bf16.msra.mxu1 %v2166_v43  ;;  %v2139_v9 = vmax.f32 %v2107_v23, 0.0  ;;  %v1901_v43 = vpop.permute.xlu0 %1900  ;;  %v3706_v3 = vmax.f32 %v3315_v0, 0.0  ;;  %v3708_v0 = vmax.f32 %v3339_v15, 0.0 }
 0x56b   : > { %v2110_v11 = vadd.f32 %v2047_v55, %v3699_v38  ;;  %v2140_v22 = vmax.f32 %v2108_v37, 0.0  ;;  %v3707_v38 = vmax.f32 %v3319_v60, 0.0  ;;  %v3709_v60 = vmax.f32 %v3335_v13, 0.0  ;;  %v1926_v13 = vpop.permute.xlu1 %1925 }
 0x56c   : > { %v2141_v31 = vmax.f32 %v2109_v17, 0.0 }
 0x56d   : > { %v2142_v45 = vmax.f32 %v2110_v11, 0.0  ;;  %v2050_v10 = vpop.f32.mrb[60].mxu0 }
 0x56e   : > { %v2168_v62 = vpack.c.bf16 %v2141_v31, %v2139_v9  ;;  %v2051_v48 = vadd.f32 %v2050_v10, %v1891_v44  ;;  %v2052_v41 = vpop.f32.mrb[61].mxu0 }
 0x56f   : > { %v2053_v29 = vadd.f32 %v2052_v41, %v1891_v44  ;;  %v2054_v24 = vpop.f32.mrb[62].mxu0  ;;  %v2169_v25 = vpack.c.bf16 %v2142_v45, %v2140_v22  ;;  %v1911_v44 = vpop.permute.xlu0 %1910 }
 0x570   : > { %v2111_v8 = vadd.f32 %v2051_v48, %v3700_v47  ;;  %v2055_v50 = vadd.f32 %v2054_v24, %v1896_v53  ;;  %v2056_v26 = vpop.f32.mrb[63].mxu0 }
 0x571   : > { %v2112_v39 = vadd.f32 %v2053_v29, %v3701_v54  ;;  %v2057_v1 = vadd.f32 %v2056_v26, %v1896_v53  ;;  %2190 = vmatprep.subr.bf16.mxu1 %v2169_v25  ;;  %v3710_v26 = vmax.f32 %v3343_v59, 0.0  ;;  %v3712_v59 = vmax.f32 %v3367_v32, 0.0 }
 0x572   : > { %v2113_v57 = vadd.f32 %v2055_v50, %v3702_v2  ;;  %2191 = vmatpush1.bf16.msra.mxu1 %v2168_v62  ;;  %v2143_v28 = vmax.f32 %v2111_v8, 0.0 }
 0x573   : > { %v2114_v40 = vadd.f32 %v2057_v1, %v3703_v30  ;;  %v2144_v19 = vmax.f32 %v2112_v39, 0.0  ;;  %v3711_v39 = vmax.f32 %v3347_v56, 0.0  ;;  %v1921_v30 = vpop.permute.xlu0 %1920  ;;  %v3713_v56 = vmax.f32 %v3363_v35, 0.0  ;;  %v1936_v35 = vpop.permute.xlu1 %1935 }
 0x574   : > { %v2145_v63 = vmax.f32 %v2113_v57, 0.0 }
 0x575   : > { %v2146_v33 = vmax.f32 %v2114_v40, 0.0  ;;  %v2060_v36 = vpop.f32.mrb[64].mxu0 }
 0x576   : > { %v2170_v52 = vpack.c.bf16 %v2145_v63, %v2143_v28  ;;  %v2061_v7 = vadd.f32 %v2060_v36, %v1901_v43  ;;  %v2062_v58 = vpop.f32.mrb[65].mxu0 }
 0x577   : > { %v2063_v4 = vadd.f32 %v2062_v58, %v1901_v43  ;;  %v2064_v14 = vpop.f32.mrb[66].mxu0  ;;  %v2171_v23 = vpack.c.bf16 %v2146_v33, %v2144_v19 }
 0x578   : > { %v2115_v21 = vadd.f32 %v2061_v7, %v3704_v49  ;;  %v2065_v5 = vadd.f32 %v2064_v14, %v1906_v27  ;;  %v2066_v20 = vpop.f32.mrb[67].mxu0 }
 0x579   : > { %v2116_v37 = vadd.f32 %v2063_v4, %v3705_v18  ;;  %v2067_v55 = vadd.f32 %v2066_v20, %v1906_v27  ;;  %2192 = vmatprep.subr.bf16.mxu1 %v2171_v23  ;;  %v3714_v23 = vmax.f32 %v3371_v12, 0.0  ;;  %v3716_v12 = vmax.f32 %v3395_v51, 0.0 }
 0x57a   : > { %v2117_v17 = vadd.f32 %v2065_v5, %v3706_v3  ;;  %2193 = vmatpush1.bf16.msra.mxu1 %v2170_v52  ;;  %v2147_v9 = vmax.f32 %v2115_v21, 0.0  ;;  %v3715_v21 = vmax.f32 %v3375_v42, 0.0  ;;  %v3717_v42 = vmax.f32 %v3391_v16, 0.0  ;;  %v2163_v16 = vld [vmem:[%s3609_s11] sm:$0xf] }
 0x57b   : > { %v2118_v11 = vadd.f32 %v2067_v55, %v3707_v38  ;;  %v2148_v22 = vmax.f32 %v2116_v37, 0.0  ;;  %v1931_v37 = vpop.permute.xlu0 %1930 }
 0x57c   : > { %v2149_v31 = vmax.f32 %v2117_v17, 0.0 }
 0x57d   : > { %v2150_v46 = vmax.f32 %v2118_v11, 0.0  ;;  %v2070_v45 = vpop.f32.mrb[68].mxu0 }
 0x57e   : > { %v2172_v10 = vpack.c.bf16 %v2149_v31, %v2147_v9  ;;  %v2071_v62 = vadd.f32 %v2070_v45, %v1911_v44  ;;  %v2072_v48 = vpop.f32.mrb[69].mxu0 }
 0x57f   : > { %v2073_v41 = vadd.f32 %v2072_v48, %v1911_v44  ;;  %v2074_v53 = vpop.f32.mrb[70].mxu0  ;;  %v2173_v29 = vpack.c.bf16 %v2150_v46, %v2148_v22  ;;  %v3718_v48 = vmax.f32 %v3399_v34, 0.0 }
 0x580   : > { %v2119_v24 = vadd.f32 %v2071_v62, %v3708_v0  ;;  %v2075_v25 = vadd.f32 %v2074_v53, %v1916_v61  ;;  %v2076_v47 = vpop.f32.mrb[71].mxu0 }
 0x581   : > { %v2120_v8 = vadd.f32 %v2073_v41, %v3709_v60  ;;  %v2077_v50 = vadd.f32 %v2076_v47, %v1916_v61  ;;  %2194 = vmatprep.subr.bf16.mxu1 %v2173_v29  ;;  %v3719_v41 = vmax.f32 %v3403_v6, 0.0  ;;  %v2184_v6 = vpop.permute.xlu0 %2183 }
 0x582   : > { %v2121_v54 = vadd.f32 %v2075_v25, %v3710_v26  ;;  %2195 = vmatpush1.bf16.msra.mxu1 %v2172_v10  ;;  %v2151_v2 = vmax.f32 %v2119_v24, 0.0 }
 0x583   : > { %v2122_v1 = vadd.f32 %v2077_v50, %v3711_v39  ;;  %v2152_v40 = vmax.f32 %v2120_v8, 0.0 }
 0x584   : > { %v2153_v57 = vmax.f32 %v2121_v54, 0.0 }
 0x585   : > { %v2154_v15 = vmax.f32 %v2122_v1, 0.0  ;;  %v2080_v28 = vpop.f32.mrb[72].mxu0 }
 0x586   : > { %v2174_v63 = vpack.c.bf16 %v2153_v57, %v2151_v2  ;;  %v2081_v43 = vadd.f32 %v2080_v28, %v1921_v30  ;;  %v2082_v19 = vpop.f32.mrb[73].mxu0 }
 0x587   : > { %v2083_v33 = vadd.f32 %v2082_v19, %v1921_v30  ;;  %v2084_v36 = vpop.f32.mrb[74].mxu0  ;;  %v2175_v52 = vpack.c.bf16 %v2154_v15, %v2152_v40 }
 0x588   : > { %v2123_v7 = vadd.f32 %v2081_v43, %v3712_v59  ;;  %v2085_v58 = vadd.f32 %v2084_v36, %v1926_v13  ;;  %v2086_v27 = vpop.f32.mrb[75].mxu0 }
 0x589   : > { %v2124_v4 = vadd.f32 %v2083_v33, %v3713_v56  ;;  %v2087_v14 = vadd.f32 %v2086_v27, %v1926_v13  ;;  %2196 = vmatprep.subr.bf16.mxu1 %v2175_v52 }
 0x58a   : > { %v2125_v49 = vadd.f32 %v2085_v58, %v3714_v23  ;;  %2197 = vmatpush1.bf16.msra.mxu1 %v2174_v63  ;;  %v2155_v20 = vmax.f32 %v2123_v7, 0.0 }
 0x58b   : > { %v2126_v5 = vadd.f32 %v2087_v14, %v3715_v21  ;;  %v2156_v55 = vmax.f32 %v2124_v4, 0.0 }
 0x58c   : > { %v2157_v18 = vmax.f32 %v2125_v49, 0.0 }
 0x58d   : > { %v2158_v32 = vmax.f32 %v2126_v5, 0.0  ;;  %v2090_v3 = vpop.f32.mrb[76].mxu0 }
 0x58e   : > { %v2176_v17 = vpack.c.bf16 %v2157_v18, %v2155_v20  ;;  %v2091_v38 = vadd.f32 %v2090_v3, %v1931_v37  ;;  %v2092_v11 = vpop.f32.mrb[77].mxu0 }
 0x58f   : > { %v2093_v9 = vadd.f32 %v2092_v11, %v1931_v37  ;;  %v2094_v31 = vpop.f32.mrb[78].mxu0  ;;  %v2177_v44 = vpack.c.bf16 %v2158_v32, %v2156_v55 }
 0x590   : > { %v2127_v22 = vadd.f32 %v2091_v38, %v3716_v12  ;;  %v2095_v46 = vadd.f32 %v2094_v31, %v1936_v35  ;;  %v2096_v45 = vpop.f32.mrb[79].mxu0 }
 0x591   : > { %v2128_v10 = vadd.f32 %v2093_v9, %v3717_v42  ;;  %v2097_v62 = vadd.f32 %v2096_v45, %v1936_v35  ;;  %2198 = vmatprep.subr.bf16.mxu1 %v2177_v44 }
 0x592   : > { %v2129_v61 = vadd.f32 %v2095_v46, %v3718_v48  ;;  %2199 = vmatpush1.bf16.msra.mxu1 %v2176_v17  ;;  %v2159_v29 = vmax.f32 %v2127_v22, 0.0 }
 0x593   : > { %v2130_v53 = vadd.f32 %v2097_v62, %v3719_v41  ;;  %v2160_v51 = vmax.f32 %v2128_v10, 0.0 }
 0x594   : > { %v2161_v0 = vmax.f32 %v2129_v61, 0.0 }
 0x595   : > { %v2162_v24 = vmax.f32 %v2130_v53, 0.0 }
 0x596   : > { %v2178_v25 = vpack.c.bf16 %v2161_v0, %v2159_v29 }
 0x597   : > { %v2179_v47 = vpack.c.bf16 %v2162_v24, %v2160_v51 }
 0x599   : > { %2200 = vmatprep.subr.bf16.mxu1 %v2179_v47 }
 0x59a   : > { %2201 = vmatpush1.bf16.msra.mxu1 %v2178_v25 }
 0x59d   : > { %2219 = vmatmul.mubr.bf16.vlgmr.msra.gmra.mrb[80].mxu1 %v2163_v16 }
 0x670   : > { %v2220_v34 = vpop.f32.mrb[80].mxu1 }
 0x671   : > { %v2221_v60 = vadd.f32 %v2220_v34, %v2184_v6  ;;  %v2222_v8 = vpop.f32.mrb[81].mxu1 }
 0x672   : > { %v2223_v50 = vadd.f32 %v2222_v8, %v2184_v6  ;;  %v2224_v26 = vpop.f32.mrb[82].mxu1 }
 0x673   : > { %2227 = vst [vmem:[%s477_s20] sm:$0xff] %v2221_v60  ;;  %v2225_v54 = vpop.f32.mrb[83].mxu1 }
 0x674   : > { %2228 = vst [vmem:[%s477_s20 + $0x8] sm:$0xff] %v2223_v50 }
 0x675   : > { %2475 = shalt.err (!%p2472_p5)
}
 0x676   : > { %s2476_s20 = scalar_lea.hbm %s3553_s22, 256  ;;  %s2480_s15 = scalar_lea.hbm %s3611_s13, 512 }
 0x677   : > { %p2477_p7 = scmp.ne.s32.totalorder %s3553_s22, %s2476_s20  ;;  %p2481_p12 = scmp.lt.u32.totalorder %s3553_s22, %s3611_s13 }
 0x678   : > { %p2482_p13 = scmp.lt.u32.totalorder %s2480_s15, %s2476_s20  ;;  %p2484_p1 = scmp.lt.u32.totalorder %s2476_s20, %s3553_s22 }
 0x679   : > { %p2478_p10 = pnand %p2477_p7, %p2636_p6 }
 0x67a   : > { %p2483_p0 = por %p2482_p13, %p2481_p12 }
 0x67b   : > { %p2479_p11 = pneg %p2478_p10 }
 0x67c   : > { %p2485_p2 = por %p2484_p1, %p2483_p0 }
 0x67e   : > { %p2486_p3 = pnand %p2485_p2, %p2479_p11 }
 0x680   : > { %2489 = shalt.err (!%p2486_p3)
}
 0x681   : > { %2377 = dma.vmem_to_hbm [thread:$0]  (%p2636_p6), %s3555_s21, 256, %s3553_s22, %s2230_s29  }
 0x682 PF: > { %s2256_s30 = sand.u32 1, %s2512_s25   ;;  %p2380_p4 = pnand %p2311_p9, %p2640_p8 }
 0x683   : > { %s2257_s1 = scalar_lea.sflag [#allocation4], %s2256_s30 }
 0x684   : > { %2507 = dma.done.wait (!%p2380_p4), %s2257_s1, 256  }
 0x685   : > { %2509 = vsyncadd (!%p2380_p4), %s2257_s1, 4294967040  ;;  %p23_p5 = scmp.ge.s32.totalorder %s2621_s14, 4   ;;  %s3722_s25 = smov %s2516_s26 }
 0x686   : > { %s3723_s26 = smov %s2520_s27  ;;  %s3724_s27 = smov %s2634_s17 }
 0x687   : > { %s3725_s28 = smov %s2621_s14  ;;  %25 = sbr.rel (!%p23_p5) target bundleno = 6 (0x6), region = 150 }
 0x68e   :  { %2262 = vsyncpa [#allocation4], 1 }
 0x68f   :  { %2264 = vsyncpa [#allocation4 + $0x1], 1 }

</bundles_post_ra>
